<compile_context>
chip_gen: v7x
topology: tpu7x:2x2x1
jax: 0.10.0
libtpu: 0.0.40
codegen_flags: <defaults>
</compile_context>

<pallas_src>
import numpy as np
import jax
import jax.numpy as jnp
from jax import lax
from jax.experimental import pallas as pl
from jax.experimental.pallas import tpu as pltpu

# ------------------------- layer configuration (SynthesisLayer3.__init__) -------------------------
W_DIM = 32
IN_CHANNELS = 16
OUT_CHANNELS = 16
IN_SIZE = 16
OUT_SIZE = 16
IN_SAMPLING_RATE = 16.0
OUT_SAMPLING_RATE = 16.0
IN_CUTOFF = 8.0
OUT_CUTOFF = 8.0
IN_HALF_WIDTH = 4.0
OUT_HALF_WIDTH = 4.0
KERNEL_SIZE = 3
FILTER_SIZE = 6
LRELU_UPSAMPLING = 2
CONV_CLAMP = 256.0
IS_TORGB = False
BATCH = 2

assert not IS_TORGB, "this script instantiates the non-toRGB (intermediate) layer configuration"

# derived quantities (mirrors SynthesisLayer3.__init__)
CONV_KERNEL = 1 if IS_TORGB else KERNEL_SIZE
TMP_SAMPLING_RATE = max(IN_SAMPLING_RATE, OUT_SAMPLING_RATE) * (1 if IS_TORGB else LRELU_UPSAMPLING)
UP_FACTOR = int(np.rint(TMP_SAMPLING_RATE / IN_SAMPLING_RATE))
UP_TAPS = FILTER_SIZE * UP_FACTOR if (UP_FACTOR > 1 and not IS_TORGB) else 1
DOWN_FACTOR = int(np.rint(TMP_SAMPLING_RATE / OUT_SAMPLING_RATE))
DOWN_TAPS = FILTER_SIZE * DOWN_FACTOR if (DOWN_FACTOR > 1 and not IS_TORGB) else 1

_in_size = np.broadcast_to(np.asarray(IN_SIZE), [2])
_out_size = np.broadcast_to(np.asarray(OUT_SIZE), [2])
_pad_total = (_out_size - 1) * DOWN_FACTOR + 1
_pad_total = _pad_total - (_in_size + CONV_KERNEL - 1) * UP_FACTOR
_pad_total = _pad_total + UP_TAPS + DOWN_TAPS - 2
_pad_lo = (_pad_total + UP_FACTOR) // 2
_pad_hi = _pad_total - _pad_lo
PADDING = [int(_pad_lo[0]), int(_pad_hi[0]), int(_pad_lo[1]), int(_pad_hi[1])]  # [px0, px1, py0, py1]

K = CONV_KERNEL
KK = K * K
CI = IN_CHANNELS
CO = OUT_CHANNELS
KKCI = CI * KK                        # 144 — per-batch conv contraction
HO = IN_SIZE + K - 1                  # conv output spatial size (padding = K - 1) -> 18
HW = HO * HO                          # 324
HWP = 384                             # HW padded to a multiple of 128 (lane-dense)
HUP = HO * UP_FACTOR + PADDING[2] + PADDING[3] - (UP_TAPS - 1)   # after upsample FIR -> 42
HUP2 = HUP * HUP                      # 1764
HUP2P = 1792                          # HUP2 padded to a multiple of 128
SOUT = (HUP - (DOWN_TAPS - 1) + DOWN_FACTOR - 1) // DOWN_FACTOR  # after downsample FIR -> 16

STYLE_GAIN = (1.0 / np.sqrt(CI * K * K)) if IS_TORGB else 1.0
LRELU_GAIN = 1.0 if IS_TORGB else float(np.sqrt(2.0))
LRELU_SLOPE = 1.0 if IS_TORGB else 0.2
W_AVG = 1.0                                                      # magnitude EMA buffer (init value)
AFFINE_WEIGHT_GAIN = 1.0 / np.sqrt(W_DIM)
PRECISION = jax.lax.Precision.HIGHEST                            # wrapper-side XLA ops only


# ------------------------- filter design (scipy-free firwin + kaiser window) -------------------------
def design_lowpass_filter(numtaps, cutoff, width, fs):
    assert numtaps >= 1
    if numtaps == 1:
        return None
    nyq = fs / 2.0
    atten = 2.285 * (numtaps - 1) * np.pi * (width / nyq) + 7.95      # scipy.signal.kaiser_atten
    if atten > 50:
        beta = 0.1102 * (atten - 8.7)                                 # scipy.signal.kaiser_beta
    elif atten > 21:
        beta = 0.5842 * (atten - 21) ** 0.4 + 0.07886 * (atten - 21)
    else:
        beta = 0.0
    c = cutoff / nyq
    m = np.arange(numtaps) - (numtaps - 1) / 2.0
    h = c * np.sinc(c * m)
    h = h * np.kaiser(numtaps, beta)
    h = h / np.sum(h)                                                 # DC gain = 1
    return h.astype(np.float32)


def make_up_matrix(f, n_in, up, pad0, pad1):
    # out = U @ y  realizes: zero-insert upsample by `up`, pad (pad0, pad1), valid FIR with
    # flipped filter scaled by `up` per axis (upfirdn2d semantics, flip_filter=False).
    taps = len(f)
    fe = f[::-1] * float(up)
    n_out = n_in * up + pad0 + pad1 - (taps - 1)
    U = np.zeros((n_out, n_in), np.float32)
    for u in range(n_out):
        for i in range(n_in):
            t = pad0 + up * i - u
            if 0 <= t < taps:
                U[u, i] = fe[t]
    return U


def make_down_matrix(f, n_in, down):
    # out = D @ z  realizes: valid FIR with flipped filter then [::down] subsampling.
    taps = len(f)
    fe = f[::-1]
    n_conv = n_in - (taps - 1)
    n_out = (n_conv + down - 1) // down
    D = np.zeros((n_out, n_in), np.float32)
    for i in range(n_out):
        for t in range(taps):
            D[i, down * i + t] = fe[t]
    return D


UP_FILTER = design_lowpass_filter(UP_TAPS, IN_CUTOFF, IN_HALF_WIDTH * 2, TMP_SAMPLING_RATE)
DOWN_FILTER = design_lowpass_filter(DOWN_TAPS, OUT_CUTOFF, OUT_HALF_WIDTH * 2, TMP_SAMPLING_RATE)

# this config is square/symmetric in x & y, so a single U / D serves both axes
assert PADDING[0] == PADDING[2] and PADDING[1] == PADDING[3]
U_MAT = make_up_matrix(UP_FILTER, HO, UP_FACTOR, PADDING[2], PADDING[3])   # [HUP, HO]
D_MAT = make_down_matrix(DOWN_FILTER, HUP, DOWN_FACTOR)                    # [SOUT, HUP]
assert U_MAT.shape == (HUP, HO) and D_MAT.shape == (SOUT, HUP)
assert SOUT == OUT_SIZE

# Channel-batched separable-filter operators acting on the flattened-spatial lane axis:
#   pre_lrelu[c, u*HUP+v] = sum_{h,w} y[c, h*HO+w] * U[u,h] * U[v,w]   ->  y @ KUP
#   out     [c, s*SO +t] = sum_{u,v} l[c, u*HUP+v] * D[s,u] * D[t,v]   ->  l @ KDN
KUP_MAT = np.kron(U_MAT.T, U_MAT.T).astype(np.float32)   # [HW, HUP2]   = [324, 1764]
KDN_MAT = np.kron(D_MAT.T, D_MAT.T).astype(np.float32)   # [HUP2, 256]  = [1764, 256]
assert KUP_MAT.shape == (HW, HUP2) and KDN_MAT.shape == (HUP2, SOUT * SOUT)

# lane-dense (multiple-of-128) zero-padded variants (review item 3); extra rows/cols are zero,
# so the padded lanes of the intermediates contribute nothing.
KUP_PAD = np.zeros((HWP, HUP2P), np.float32)
KUP_PAD[:HW, :HUP2] = KUP_MAT
KDN_PAD = np.zeros((HUP2P, SOUT * SOUT), np.float32)
KDN_PAD[:HUP2, :] = KDN_MAT


# ------------------------- fused Pallas kernel (whole batch in one grid step) -------------------------
def fused_kernel(xcol_ref, wbd_ref, bias_ref, kup_ref, kdn_ref, out_ref):
    # xcol: [B*KKCI, HWP]   bf16  (im2col, batches stacked along the contraction dim, lane-padded)
    # wbd:  [B*CO, B*KKCI]  bf16  (block-diagonal modulated + demodulated conv weights)
    # bias: [B*CO, 1]       f32
    # kup:  [HWP, HUP2P]    bf16  kron(U^T, U^T) zero-padded
    # kdn:  [HUP2P, 256]    bf16  kron(D^T, D^T) zero-padded
    # out:  [B*CO, 256]     f32   (lane-dense stores)
    # modulated conv for the whole batch: single bf16 MXU contraction (K = B*144)
    y = jnp.dot(wbd_ref[...], xcol_ref[...],
                preferred_element_type=jnp.float32)                       # [B*CO, HWP]
    y = y + bias_ref[...]                                                 # bias broadcast over lanes
    # separable 2x zero-insert upsample + FIR (both axes), channel-batched, lane-dense
    z = jnp.dot(y.astype(jnp.bfloat16), kup_ref[...],
                preferred_element_type=jnp.float32)                       # [B*CO, HUP2P]
    # leaky-ReLU * gain, clamp
    z = jnp.where(z >= 0.0, z, z * LRELU_SLOPE) * LRELU_GAIN
    z = jnp.clip(z, -CONV_CLAMP, CONV_CLAMP)
    # separable FIR + stride-2 downsample (both axes); lane-dense [B*CO, 256] store
    out_ref[...] = jnp.dot(z.astype(jnp.bfloat16), kdn_ref[...],
                           preferred_element_type=jnp.float32)


# ------------------------- wrapper -------------------------
def synthesis_layer3_forward(x, wlat, conv_w, conv_b, aff_w, aff_b):
    B = x.shape[0]
    # magnitude-EMA input gain (eval mode; buffer w_avg == 1  =>  gain == 1)
    input_gain = 1.0 / np.sqrt(W_AVG)
    xs = x * input_gain if input_gain != 1.0 else x

    # affine styles for the whole batch (tiny XLA matmul, hoisted out of the kernel)
    styles = jnp.dot(wlat, (aff_w * AFFINE_WEIGHT_GAIN).T, precision=PRECISION) + aff_b[None, :]
    styles = styles * STYLE_GAIN                                           # [B, CI]

    # modulate + demodulate the WEIGHTS (not the activations); flatten contraction to 144
    w = conv_w[None] * styles[:, None, :, None, None]                      # [B, CO, CI, K, K]
    dcoefs = lax.rsqrt(jnp.sum(w * w, axis=(2, 3, 4)) + 1e-8)              # [B, CO]
    wmod = (w * dcoefs[:, :, None, None, None]).reshape(B, CO, KKCI)       # [B, CO, 144] f32
    # block-diagonal weight: one [B*CO, B*KKCI] matmul covers the whole batch in one grid step
    eye_b = jnp.eye(B, dtype=wmod.dtype)
    w_bd = (eye_b[:, None, :, None] * wmod[:, :, None, :]).reshape(B * CO, B * KKCI)
    w_bd = w_bd.astype(jnp.bfloat16)                                       # [32, 288]

    # im2col (cross-correlation, padding = K - 1); contraction index order = (ci, dy, dx)
    PAD = K - 1
    xp = jnp.pad(xs, ((0, 0), (0, 0), (PAD, PAD), (PAD, PAD)))
    patches = jnp.stack([xp[:, :, dy:dy + HO, dx:dx + HO]
                         for dy in range(K) for dx in range(K)], axis=2)   # [B, CI, KK, HO, HO]
    xcol = patches.reshape(B, KKCI, HW)
    xcol = jnp.pad(xcol, ((0, 0), (0, 0), (0, HWP - HW)))                  # lane-dense 384
    xcol = xcol.reshape(B * KKCI, HWP).astype(jnp.bfloat16)                # [288, 384]

    bias_bd = jnp.tile(conv_b, B).reshape(B * CO, 1).astype(jnp.float32)   # [32, 1]
    kup = jnp.asarray(KUP_PAD, dtype=jnp.bfloat16)                         # [384, 1792]
    kdn = jnp.asarray(KDN_PAD, dtype=jnp.bfloat16)                         # [1792, 256]

    out = pl.pallas_call(
        fused_kernel,
        out_shape=jax.ShapeDtypeStruct((B * CO, SOUT * SOUT), jnp.float32),
        grid=(1,),
        in_specs=[
            pl.BlockSpec((B * KKCI, HWP), lambda i: (0, 0)),
            pl.BlockSpec((B * CO, B * KKCI), lambda i: (0, 0)),
            pl.BlockSpec((B * CO, 1), lambda i: (0, 0)),
            pl.BlockSpec((HWP, HUP2P), lambda i: (0, 0)),
            pl.BlockSpec((HUP2P, SOUT * SOUT), lambda i: (0, 0)),
        ],
        out_specs=pl.BlockSpec((B * CO, SOUT * SOUT), lambda i: (0, 0)),
        compiler_params=pltpu.CompilerParams(
            dimension_semantics=("arbitrary",),
            vmem_limit_bytes=32 * 1024 * 1024),
    )(xcol, w_bd, bias_bd, kup, kdn)

    # final layout fix on the tiny (32 KB) output: [B*CO, 256] -> NCHW [B, CO, 16, 16]
    return out.reshape(B, CO, SOUT, SOUT)


# ------------------------- pure numpy reference (mirrors the PyTorch forward) -------------------------
def reference_forward(x, wlat, conv_w, conv_b, aff_w, aff_b):
    x = x.astype(np.float64) * (1.0 / np.sqrt(W_AVG))
    styles = wlat.astype(np.float64) @ (aff_w.astype(np.float64) * AFFINE_WEIGHT_GAIN).T + aff_b
    styles = styles * STYLE_GAIN
    B = x.shape[0]
    w = conv_w.astype(np.float64)[None] * styles[:, None, :, None, None]      # [B, CO, CI, K, K]
    dcoef = 1.0 / np.sqrt(np.sum(w ** 2, axis=(2, 3, 4)) + 1e-8)              # [B, CO]
    w = w * dcoef[:, :, None, None, None]
    PAD = K - 1
    xp = np.pad(x, ((0, 0), (0, 0), (PAD, PAD), (PAD, PAD)))
    y = np.zeros((B, CO, HO, HO), np.float64)
    for dy in range(K):
        for dx in range(K):
            y += np.einsum('bchw,boc->bohw', xp[:, :, dy:dy + HO, dx:dx + HO], w[:, :, :, dy, dx])
    y = y + conv_b[None, :, None, None]
    # upsample (zero insertion + pad + separable FIR, gain = up^2)
    up = UP_FACTOR
    n_up = HO * up
    Hpad = n_up + PADDING[2] + PADDING[3]
    xu = np.zeros((B, CO, Hpad, Hpad), np.float64)
    xu[:, :, PADDING[2]:PADDING[2] + n_up:up, PADDING[0]:PADDING[0] + n_up:up] = y
    fe = UP_FILTER[::-1].astype(np.float64) * up
    taps = UP_TAPS
    t1 = np.zeros((B, CO, Hpad, HUP), np.float64)
    for t in range(taps):
        t1 += xu[:, :, :, t:t + HUP] * fe[t]
    t2 = np.zeros((B, CO, HUP, HUP), np.float64)
    for t in range(taps):
        t2 += t1[:, :, t:t + HUP, :] * fe[t]
    # leaky relu + gain + clamp
    z = np.where(t2 >= 0, t2, t2 * LRELU_SLOPE) * LRELU_GAIN
    z = np.clip(z, -CONV_CLAMP, CONV_CLAMP)
    # downsample (separable FIR + stride-2 subsampling)
    fde = DOWN_FILTER[::-1].astype(np.float64)
    Lc = HUP - (DOWN_TAPS - 1)
    d1 = np.zeros((B, CO, HUP, Lc), np.float64)
    for t in range(DOWN_TAPS):
        d1 += z[:, :, :, t:t + Lc] * fde[t]
    d2 = np.zeros((B, CO, Lc, Lc), np.float64)
    for t in range(DOWN_TAPS):
        d2 += d1[:, :, t:t + Lc, :] * fde[t]
    return d2[:, :, ::DOWN_FACTOR, ::DOWN_FACTOR].astype(np.float32)


if __name__ == "__main__":
    key = jax.random.PRNGKey(0)
    k1, k2, k3, k4 = jax.random.split(key, 4)
    # inputs
    x = jax.random.normal(k1, (BATCH, IN_CHANNELS, IN_SIZE, IN_SIZE), jnp.float32)
    wlat = jax.random.normal(k2, (BATCH, W_DIM), jnp.float32)
    # parameters (deterministic init per module __init__: randn weights, zero conv bias, affine bias_init=1)
    conv_w = jax.random.normal(k3, (OUT_CHANNELS, IN_CHANNELS, CONV_KERNEL, CONV_KERNEL), jnp.float32)
    conv_b = jnp.zeros((OUT_CHANNELS,), jnp.float32)
    aff_w = jax.random.normal(k4, (IN_CHANNELS, W_DIM), jnp.float32)
    aff_b = jnp.full((IN_CHANNELS,), 1.0, jnp.float32)

    out = synthesis_layer3_forward(x, wlat, conv_w, conv_b, aff_w, aff_b)
    out = jax.block_until_ready(out)
    assert out.shape == (BATCH, OUT_CHANNELS, OUT_SIZE, OUT_SIZE)
    assert out.dtype == jnp.float32

    ref = reference_forward(np.asarray(x), np.asarray(wlat), np.asarray(conv_w),
                            np.asarray(conv_b), np.asarray(aff_w), np.asarray(aff_b))
    # tolerances account for bf16 operands on all three MXU contractions (f32 accumulation)
    np.testing.assert_allclose(np.asarray(out), ref, rtol=2e-2, atol=5e-2)
    print("KERNEL_OK")
</pallas_src>

<mosaic_0001>
module attributes {stable_mosaic.version = 11 : i64} {
  func.func @fused_kernel(%arg0: i32, %arg1: memref<288x384xbf16, #tpu.memory_space<vmem>>, %arg2: memref<32x288xbf16, #tpu.memory_space<vmem>>, %arg3: memref<32x1xf32, #tpu.memory_space<vmem>>, %arg4: memref<384x1792xbf16, #tpu.memory_space<vmem>>, %arg5: memref<1792x256xbf16, #tpu.memory_space<vmem>>, %arg6: memref<32x256xf32, #tpu.memory_space<vmem>>) attributes {dimension_semantics = [#tpu.dimension_semantics<arbitrary>], iteration_bounds = array<i64: 1>, scalar_prefetch = 0 : i64, scratch_operands = 0 : i64, tpu.core_type = #tpu.core_type<tc>, window_params = [{pipeline_mode = #tpu.pipeline_mode<synchronous>, transform_indices = @transform_0, window_bounds = array<i64: 288, 384>}, {pipeline_mode = #tpu.pipeline_mode<synchronous>, transform_indices = @transform_1, window_bounds = array<i64: 32, 288>}, {pipeline_mode = #tpu.pipeline_mode<synchronous>, transform_indices = @transform_2, window_bounds = array<i64: 32, 1>}, {pipeline_mode = #tpu.pipeline_mode<synchronous>, transform_indices = @transform_3, window_bounds = array<i64: 384, 1792>}, {pipeline_mode = #tpu.pipeline_mode<synchronous>, transform_indices = @transform_4, window_bounds = array<i64: 1792, 256>}, {pipeline_mode = #tpu.pipeline_mode<synchronous>, transform_indices = @transform_5, window_bounds = array<i64: 32, 256>}]} {
    %c0 = arith.constant 0 : index
    %c0_0 = arith.constant 0 : index
    %0 = vector.load %arg2[%c0, %c0_0] : memref<32x288xbf16, #tpu.memory_space<vmem>>, vector<32x288xbf16>
    %c0_1 = arith.constant 0 : index
    %c0_2 = arith.constant 0 : index
    %1 = vector.load %arg1[%c0_1, %c0_2] : memref<288x384xbf16, #tpu.memory_space<vmem>>, vector<288x384xbf16>
    %cst = arith.constant dense<0.000000e+00> : vector<32x384xf32>
    %2 = tpu.matmul %0, %1, %cst {dimension_numbers = #tpu.dot_dimension_numbers<[1], [0], [0], [1], [0, 0, 1, 1], [], []>} : vector<32x288xbf16>, vector<288x384xbf16>, vector<32x384xf32> -> vector<32x384xf32>
    %c0_3 = arith.constant 0 : index
    %c0_4 = arith.constant 0 : index
    %3 = vector.load %arg3[%c0_3, %c0_4] : memref<32x1xf32, #tpu.memory_space<vmem>>, vector<32x1xf32>
    %4 = vector.broadcast %3 : vector<32x1xf32> to vector<32x384xf32>
    %5 = arith.addf %2, %4 : vector<32x384xf32>
    %6 = arith.truncf %5 : vector<32x384xf32> to vector<32x384xbf16>
    %c0_5 = arith.constant 0 : index
    %c0_6 = arith.constant 0 : index
    %7 = vector.load %arg4[%c0_5, %c0_6] : memref<384x1792xbf16, #tpu.memory_space<vmem>>, vector<384x1792xbf16>
    %cst_7 = arith.constant dense<0.000000e+00> : vector<32x1792xf32>
    %8 = tpu.matmul %6, %7, %cst_7 {dimension_numbers = #tpu.dot_dimension_numbers<[1], [0], [0], [1], [0, 0, 1, 1], [], []>} : vector<32x384xbf16>, vector<384x1792xbf16>, vector<32x1792xf32> -> vector<32x1792xf32>
    %cst_8 = arith.constant 0.000000e+00 : f32
    %9 = vector.broadcast %cst_8 : f32 to vector<32x1792xf32>
    %10 = arith.cmpf oge, %8, %9 : vector<32x1792xf32>
    %cst_9 = arith.constant 2.000000e-01 : f32
    %11 = vector.broadcast %cst_9 : f32 to vector<32x1792xf32>
    %12 = arith.mulf %8, %11 : vector<32x1792xf32>
    %13 = arith.select %10, %8, %12 : vector<32x1792xi1>, vector<32x1792xf32>
    %cst_10 = arith.constant 1.41421354 : f32
    %14 = vector.broadcast %cst_10 : f32 to vector<32x1792xf32>
    %15 = arith.mulf %13, %14 : vector<32x1792xf32>
    %cst_11 = arith.constant -2.560000e+02 : f32
    %cst_12 = arith.constant 2.560000e+02 : f32
    %16 = vector.broadcast %cst_11 : f32 to vector<32x1792xf32>
    %17 = arith.maximumf %16, %15 : vector<32x1792xf32>
    %18 = vector.broadcast %cst_12 : f32 to vector<32x1792xf32>
    %19 = arith.minimumf %18, %17 : vector<32x1792xf32>
    %20 = arith.truncf %19 : vector<32x1792xf32> to vector<32x1792xbf16>
    %c0_13 = arith.constant 0 : index
    %c0_14 = arith.constant 0 : index
    %21 = vector.load %arg5[%c0_13, %c0_14] : memref<1792x256xbf16, #tpu.memory_space<vmem>>, vector<1792x256xbf16>
    %cst_15 = arith.constant dense<0.000000e+00> : vector<32x256xf32>
    %22 = tpu.matmul %20, %21, %cst_15 {dimension_numbers = #tpu.dot_dimension_numbers<[1], [0], [0], [1], [0, 0, 1, 1], [], []>} : vector<32x1792xbf16>, vector<1792x256xbf16>, vector<32x256xf32> -> vector<32x256xf32>
    %c0_16 = arith.constant 0 : index
    %c0_17 = arith.constant 0 : index
    %23 = vector.load %arg6[%c0_16, %c0_17] : memref<32x256xf32, #tpu.memory_space<vmem>>, vector<32x256xf32>
    tpu.vector_store %arg6[%c0_16, %c0_17], %22 {strides = array<i32>} : memref<32x256xf32, #tpu.memory_space<vmem>>, vector<32x256xf32>,
    return
  }
  func.func @transform_0(%arg0: i32) -> (i32, i32) {
    %c0_i32 = arith.constant 0 : i32
    %c0_i32_0 = arith.constant 0 : i32
    %c0_i32_1 = arith.constant 0 : i32
    return %c0_i32, %c0_i32_0 : i32, i32
  }
  func.func @transform_1(%arg0: i32) -> (i32, i32) {
    %c0_i32 = arith.constant 0 : i32
    %c0_i32_0 = arith.constant 0 : i32
    %c0_i32_1 = arith.constant 0 : i32
    return %c0_i32, %c0_i32_0 : i32, i32
  }
  func.func @transform_2(%arg0: i32) -> (i32, i32) {
    %c0_i32 = arith.constant 0 : i32
    %c0_i32_0 = arith.constant 0 : i32
    %c0_i32_1 = arith.constant 0 : i32
    return %c0_i32, %c0_i32_0 : i32, i32
  }
  func.func @transform_3(%arg0: i32) -> (i32, i32) {
    %c0_i32 = arith.constant 0 : i32
    %c0_i32_0 = arith.constant 0 : i32
    %c0_i32_1 = arith.constant 0 : i32
    return %c0_i32, %c0_i32_0 : i32, i32
  }
  func.func @transform_4(%arg0: i32) -> (i32, i32) {
    %c0_i32 = arith.constant 0 : i32
    %c0_i32_0 = arith.constant 0 : i32
    %c0_i32_1 = arith.constant 0 : i32
    return %c0_i32, %c0_i32_0 : i32, i32
  }
  func.func @transform_5(%arg0: i32) -> (i32, i32) {
    %c0_i32 = arith.constant 0 : i32
    %c0_i32_0 = arith.constant 0 : i32
    %c0_i32_1 = arith.constant 0 : i32
    return %c0_i32, %c0_i32_0 : i32, i32
  }
}

</mosaic_0001>

<bundles_post_ra>
// kernel: tpu_custom_call.1
= control target key start
LH: loop header
LB: loop body
LE: loop exit
PB: predicated region body
PF: predicated region fallthrough
CT: control target
= control target key end

     0   :  { %10 = vsyncpa [#allocation3], 0  ;;  %s7765_s0 = inlined_call_operand.hbm [shape: bf16[288,384], index: 0, kind: input, shape index: {}]   ;;  %s7766_s1 = inlined_call_operand.hbm [shape: bf16[32,288], index: 1, kind: input, shape index: {}]   ;;  %s7767_s2 = inlined_call_operand.vmem [shape: f32[32,1], index: 2, kind: input, shape index: {}]   ;;  %s7768_s3 = inlined_call_operand.hbm [shape: bf16[384,1792], index: 3, kind: input, shape index: {}]   ;;  %s7769_s4 = inlined_call_operand.hbm [shape: bf16[1792,256], index: 4, kind: input, shape index: {}]   ;;  %s7770_s5 = inlined_call_operand.hbm [shape: f32[32,256], index: 5, kind: output, shape index: {}]  }
   0x1   :  { %11 = vsyncpa [#allocation6], 0 }
   0x2   :  { %12 = vsyncpa [#allocation9], 0 }
   0x3   :  { %13 = vsyncpa [#allocation4], 0  ;;  %s7474_s18 = smov [#allocation5]   ;;  %s7475_s20 = smov [#allocation2]  }
   0x4   :  { %s31_s19 = sshll.u32 %s7474_s18, 4  ;;  %s19_s21 = sshll.u32 %s7475_s20, 4  ;;  %s32_s19 = int_to_ptr.vmem [resolvable:$true] %s31_s19  ;;  %s7518_s21 = int_to_ptr.vmem [resolvable:$true] %s19_s21 }
   0x5   :  { %s7356_s24 = scalar_lea.hbm %s7766_s1, 768 }
   0x6   :  { %p7357_p0 = scmp.ne.s32.totalorder %s7766_s1, %s7356_s24  ;;  %p7360_p1 = scmp.lt.u32.totalorder %s7356_s24, %s7766_s1 }
   0x8   :  { %p7362_p2 = pnand %p7360_p1, %p7357_p0 }
   0xa   :  { %7365 = shalt.err (!%p7362_p2)
}
   0xb   :  { %s7366_s29 = scalar_lea.vmem %s32_s19, 768  ;;  %p7371_p4 = scmp.lt.s32.totalorder %s32_s19, %s32_s19 }
   0xc   :  { %p7367_p3 = scmp.ne.s32.totalorder %s32_s19, %s7366_s29  ;;  %p7372_p5 = scmp.lt.s32.totalorder %s7366_s29, %s7366_s29 }
   0xe   :  { %p7373_p6 = por %p7372_p5, %p7371_p4 }
  0x10   :  { %p7374_p7 = pnand %p7373_p6, %p7367_p3 }
  0x12   :  { %7377 = shalt.err (!%p7374_p7)
}
  0x13   :  { %s7476_s30 = smov 192   ;;  %s7477_s6 = smov 12  }
  0x14   :  { %37 = dma.hbm_to_vmem [thread:$0]  %s7766_s1, 768, %s32_s19, [#allocation6], %s7476_s30, %s7476_s30, %s7477_s6  }
  0x15   :  { %s7378_s11 = scalar_lea.hbm %s7765_s0, 6912 }
  0x16   :  { %p7379_p8 = scmp.ne.s32.totalorder %s7765_s0, %s7378_s11  ;;  %p7382_p9 = scmp.lt.u32.totalorder %s7378_s11, %s7765_s0 }
  0x18   :  { %p7384_p10 = pnand %p7382_p9, %p7379_p8 }
  0x1a   :  { %7387 = shalt.err (!%p7384_p10)
}
  0x1b   :  { %s7388_s16 = scalar_lea.vmem %s7518_s21, 6912  ;;  %p7393_p12 = scmp.lt.s32.totalorder %s7518_s21, %s7518_s21 }
  0x1c   :  { %p7389_p11 = scmp.ne.s32.totalorder %s7518_s21, %s7388_s16  ;;  %p7394_p13 = scmp.lt.s32.totalorder %s7388_s16, %s7388_s16 }
  0x1e   :  { %p7395_p0 = por %p7394_p13, %p7393_p12 }
  0x20   :  { %p7396_p1 = pnand %p7395_p0, %p7389_p11 }
  0x22   :  { %7399 = shalt.err (!%p7396_p1)
}
  0x23   :  { %25 = dma.hbm_to_vmem [thread:$0]  %s7765_s0, 6912, %s7518_s21, [#allocation3], %s7476_s30, %s7476_s30, %s7477_s6  }
  0x24   :  { %s7478_s18 = smov [#allocation7]   ;;  %s7400_s23 = scalar_lea.hbm %s7768_s3, 43008 }
  0x25   :  { %s45_s19 = sshll.u32 %s7478_s18, 4  ;;  %p7401_p2 = scmp.ne.s32.totalorder %s7768_s3, %s7400_s23  ;;  %s46_s19 = int_to_ptr.vmem [resolvable:$true] %s45_s19 }
  0x26   :  { %p7404_p3 = scmp.lt.u32.totalorder %s7400_s23, %s7768_s3 }
  0x28   :  { %p7406_p4 = pnand %p7404_p3, %p7401_p2 }
  0x2a   :  { %7409 = shalt.err (!%p7406_p4)
}
  0x2b   :  { %s7410_s28 = scalar_lea.vmem %s46_s19, 43008  ;;  %p7415_p6 = scmp.lt.s32.totalorder %s46_s19, %s46_s19 }
  0x2c   :  { %p7411_p5 = scmp.ne.s32.totalorder %s46_s19, %s7410_s28  ;;  %p7416_p7 = scmp.lt.s32.totalorder %s7410_s28, %s7410_s28 }
  0x2e   :  { %p7417_p8 = por %p7416_p7, %p7415_p6 }
  0x30   :  { %p7418_p9 = pnand %p7417_p8, %p7411_p5 }
  0x32   :  { %7421 = shalt.err (!%p7418_p9)
}
  0x33   :  { %s7479_s0 = smov 896   ;;  %s7480_s21 = smov 56  }
  0x34   :  { %51 = dma.hbm_to_vmem [thread:$0]  %s7768_s3, 43008, %s46_s19, [#allocation6], %s7479_s0, %s7479_s0, %s7480_s21  }
  0x35   :  { %s7481_s6 = smov [#allocation8]   ;;  %s7422_s10 = scalar_lea.hbm %s7769_s4, 28672 }
  0x36   :  { %s57_s7 = sshll.u32 %s7481_s6, 4  ;;  %p7423_p10 = scmp.ne.s32.totalorder %s7769_s4, %s7422_s10  ;;  %s58_s7 = int_to_ptr.vmem [resolvable:$true] %s57_s7 }
  0x37   :  { %p7426_p11 = scmp.lt.u32.totalorder %s7422_s10, %s7769_s4 }
  0x39   :  { %p7428_p12 = pnand %p7426_p11, %p7423_p10 }
  0x3b   :  { %7431 = shalt.err (!%p7428_p12)
}
  0x3c   :  { %s7432_s15 = scalar_lea.vmem %s58_s7, 28672  ;;  %p7437_p0 = scmp.lt.s32.totalorder %s58_s7, %s58_s7 }
  0x3d   :  { %p7433_p13 = scmp.ne.s32.totalorder %s58_s7, %s7432_s15  ;;  %p7438_p1 = scmp.lt.s32.totalorder %s7432_s15, %s7432_s15 }
  0x3f   :  { %p7439_p2 = por %p7438_p1, %p7437_p0 }
  0x41   :  { %p7440_p3 = pnand %p7439_p2, %p7433_p13 }
  0x43   :  { %7443 = shalt.err (!%p7440_p3)
}
  0x44   :  { %s7482_s3 = smov 128   ;;  %s7483_s16 = smov 8  }
  0x45   :  { %63 = dma.hbm_to_vmem [thread:$0]  %s7769_s4, 28672, %s58_s7, [#allocation9], %s7482_s3, %s7482_s3, %s7483_s16  }
  0x46   :  { %7466 = dma.done.wait [#allocation3], 6912  }
  0x47   :  { %7467 = vsyncadd [#allocation3], 4294960384 }
  0x48   :  { %7468 = dma.done.wait [#allocation6], 43776  }
  0x49   :  { %7469 = vsyncadd [#allocation6], 4294923520 }
  0x4a   :  { %7470 = dma.done.wait [#allocation9], 28672  }
  0x4b   :  { %7471 = vsyncadd [#allocation9], 4294938624  ;;  %v7484_v0 = vmov 0   ;;  %v6436_v1 = vld [vmem:[#allocation2 + $0x4] ss:$12 sps:$4 sm:$0xff]   ;;  %vm499_vm0 = vcmask 261120  }
  0x4c   :  { %591 = vmatprep.mubr.bf16.mxu0 %v7484_v0  ;;  %6434 = vset.pattern.permute.xlu0 %v7484_v0  ;;  %v6438_v2 = vld [vmem:[#allocation2] ss:$12 sps:$4 sm:$0xff]   ;;  %v6439_v3 = vld [vmem:[#allocation2 + $0x1c] ss:$12 sps:$4 sm:$0xff]   ;;  %v6441_v4 = vld [vmem:[#allocation2 + $0x18] ss:$12 sps:$4 sm:$0xff]  }
  0x4d   :  { %6435 = vset.pattern.permute.xlu1 %v7484_v0  ;;  %506 = vmatprep.subr.bf16.mxu1 %v6436_v1  ;;  %v6442_v5 = vld [vmem:[#allocation2 + $0x34] ss:$12 sps:$4 sm:$0xff]   ;;  %v6444_v6 = vld [vmem:[#allocation2 + $0x30] ss:$12 sps:$4 sm:$0xff]   ;;  %v6445_v7 = vld [vmem:[#allocation2 + $0x4c] ss:$12 sps:$4 sm:$0xff]  }
  0x4e   :  { %507 = vmatpush1.bf16.msra.mxu1 %v6438_v2  ;;  %v6447_v8 = vld [vmem:[#allocation2 + $0x48] ss:$12 sps:$4 sm:$0xff]   ;;  %v6448_v9 = vld [vmem:[#allocation2 + $0x64] ss:$12 sps:$4 sm:$0xff]   ;;  %v6450_v10 = vld [vmem:[#allocation2 + $0x60] ss:$12 sps:$4 sm:$0xff]  }
  0x4f   :  { %508 = vmatprep.subr.bf16.mxu1 %v6439_v3  ;;  %v6451_v11 = vld [vmem:[#allocation2 + $0x7c] ss:$12 sps:$4 sm:$0xff]   ;;  %v6453_v12 = vld [vmem:[#allocation2 + $0x78] ss:$12 sps:$4 sm:$0xff]   ;;  %v6454_v13 = vld [vmem:[#allocation2 + $0x94] ss:$12 sps:$4 sm:$0xff]  }
  0x50   :  { %v6481_v14 = vld [vmem:[#allocation2 + $0x184] ss:$12 sps:$4 sm:$0xff]   ;;  %v6483_v15 = vld [vmem:[#allocation2 + $0x180] ss:$12 sps:$4 sm:$0xff]   ;;  %v6487_v17 = vld [vmem:[#allocation2 + $0x19c] ss:$12 sps:$4 sm:$0xff]  }
  0x51   :  { %v6456_v16 = vld [vmem:[#allocation2 + $0x90] ss:$12 sps:$4 sm:$0xff]   ;;  %559 = vmatprep.subr.bf16.mxu0 %v6481_v14  ;;  %v6457_v18 = vld [vmem:[#allocation2 + $0xac] ss:$12 sps:$4 sm:$0xff]   ;;  %v7576_v19 = vld [vmem:[#allocation5 + $0x4] ss:$12 sps:$4 sm:$0xff]  }
  0x52   :  { %509 = vmatpush1.bf16.msra.mxu1 %v6441_v4  ;;  %560 = vmatpush1.bf16.msra.mxu0 %v6483_v15  ;;  %v6492_v20 = vld [vmem:[#allocation2 + $0x198] ss:$12 sps:$4 sm:$0xff]   ;;  %v6459_v21 = vld [vmem:[#allocation2 + $0xa8] ss:$12 sps:$4 sm:$0xff]   ;;  %v6462_v24 = vld [vmem:[#allocation2 + $0xc0] ss:$12 sps:$4 sm:$0xff]  }
  0x53   :  { %510 = vmatprep.subr.bf16.mxu1 %v6442_v5  ;;  %561 = vmatprep.subr.bf16.mxu0 %v6487_v17  ;;  %v6460_v22 = vld [vmem:[#allocation2 + $0xc4] ss:$12 sps:$4 sm:$0xff]   ;;  %v6463_v25 = vld [vmem:[#allocation2 + $0xdc] ss:$12 sps:$4 sm:$0xff]   ;;  %v6466_v27 = vld [vmem:[#allocation2 + $0xf4] ss:$12 sps:$4 sm:$0xff]  }
  0x54   :  { %538 = vmatprep.mubr.bf16.mxu1 %v7576_v19  ;;  %v7579_v23 = vld [vmem:[#allocation5 + $0x8] ss:$12 sps:$4 sm:$0xff]   ;;  %v6468_v28 = vld [vmem:[#allocation2 + $0xf0] ss:$12 sps:$4 sm:$0xff]   ;;  %v6471_v31 = vld [vmem:[#allocation2 + $0x108] ss:$12 sps:$4 sm:$0xff]  }
  0x55   :  { %v6465_v26 = vld [vmem:[#allocation2 + $0xd8] ss:$12 sps:$4 sm:$0xff]   ;;  %v7584_v30 = vld [vmem:[#allocation5 + $0x20] ss:$12 sps:$4 sm:$0xff]   ;;  %v6474_v34 = vld [vmem:[#allocation2 + $0x120] ss:$12 sps:$4 sm:$0xff]  }
  0x56   :  { %511 = vmatpush1.bf16.msra.mxu1 %v6444_v6  ;;  %562 = vmatpush1.bf16.msra.mxu0 %v6492_v20  ;;  %v6469_v29 = vld [vmem:[#allocation2 + $0x10c] ss:$12 sps:$4 sm:$0xff]   ;;  %v6472_v32 = vld [vmem:[#allocation2 + $0x124] ss:$12 sps:$4 sm:$0xff]   ;;  %v6475_v35 = vld [vmem:[#allocation2 + $0x13c] ss:$12 sps:$4 sm:$0xff]  }
  0x57   :  { %512 = vmatprep.subr.bf16.mxu1 %v6445_v7  ;;  %v157_v33 = vld [vmem:[%s7767_s2] sm:$0xff]  ;;  %v159_v36 = vld [vmem:[%s7767_s2 + $0x10] sm:$0xff]  ;;  %v158_v37 = vld [vmem:[%s7767_s2 + $0x8] sm:$0xff] }
  0x58   :  { %163 = vperm.xlu0 %6434, %v157_v33   ;;  %173 = vperm.xlu1 %6435, %v159_v36   ;;  %v160_v38 = vld [vmem:[%s7767_s2 + $0x18] sm:$0xff]  ;;  %v6478_v40 = vld [vmem:[#allocation2 + $0x154] ss:$12 sps:$4 sm:$0xff]   ;;  %v6519_v5 = vld [vmem:[#allocation7 + $0x70] ss:$56 sps:$4 sm:$0xff]   ;;  %s7485_s2 = smov [#allocation10]  }
  0x59   :  { %5640 = vmatmul.mubr.msk.bf16.vlgmr.msra.gmra.mrb[0].mxu0 %vm499_vm0, %v7579_v23  ;;  %v6477_v39 = vld [vmem:[#allocation2 + $0x138] ss:$12 sps:$4 sm:$0xff]   ;;  %v6480_v41 = vld [vmem:[#allocation2 + $0x150] ss:$12 sps:$4 sm:$0xff]   ;;  %v6486_v43 = vld [vmem:[#allocation2 + $0x168] ss:$12 sps:$4 sm:$0xff]  }
  0x5a   :  { %513 = vmatpush1.bf16.msra.mxu1 %v6447_v8  ;;  %601 = vmatprep.mubr.bf16.mxu0 %v7484_v0  ;;  %v6484_v42 = vld [vmem:[#allocation2 + $0x16c] ss:$12 sps:$4 sm:$0xff]   ;;  %v6493_v44 = vld [vmem:[#allocation2 + $0xc8] ss:$12 sps:$4 sm:$0xff]   ;;  %v6489_v45 = vld [vmem:[#allocation5] ss:$12 sps:$4 sm:$0xff]  }
  0x5b   :  { %514 = vmatprep.subr.bf16.mxu1 %v6448_v9  ;;  %v6494_v46 = vld [vmem:[#allocation2 + $0x8] ss:$12 sps:$4 sm:$0xff]   ;;  %v6504_v47 = vld [vmem:[#allocation5 + $0x1c] ss:$12 sps:$4 sm:$0xff]   ;;  %v6500_v53 = vld [vmem:[#allocation2 + $0x110] ss:$12 sps:$4 sm:$0xff]  }
  0x5c   :  { %168 = vperm.xlu0 %6434, %v158_v37   ;;  %178 = vperm.xlu1 %6435, %v160_v38   ;;  %v6496_v48 = vld [vmem:[#allocation2 + $0xe0] ss:$12 sps:$4 sm:$0xff]   ;;  %v6498_v50 = vld [vmem:[#allocation2 + $0xf8] ss:$12 sps:$4 sm:$0xff]   ;;  %v6507_v51 = vld [vmem:[#allocation5 + $0x18] ss:$12 sps:$4 sm:$0xff]  }
  0x5d   :  { %v6497_v49 = vld [vmem:[#allocation2 + $0x20] ss:$12 sps:$4 sm:$0xff]   ;;  %v6499_v52 = vld [vmem:[#allocation2 + $0x38] ss:$12 sps:$4 sm:$0xff]   ;;  %v6501_v54 = vld [vmem:[#allocation2 + $0x50] ss:$12 sps:$4 sm:$0xff]  }
  0x5e   :  { %515 = vmatpush1.bf16.msra.mxu1 %v6450_v10  ;;  %v6502_v55 = vld [vmem:[#allocation2 + $0x128] ss:$12 sps:$4 sm:$0xff]   ;;  %v6506_v57 = vld [vmem:[#allocation2 + $0x140] ss:$12 sps:$4 sm:$0xff]   ;;  %v6510_v59 = vld [vmem:[#allocation2 + $0x158] ss:$12 sps:$4 sm:$0xff]  }
  0x5f   :  { %516 = vmatprep.subr.bf16.mxu1 %v6451_v11  ;;  %v6503_v56 = vld [vmem:[#allocation2 + $0x68] ss:$12 sps:$4 sm:$0xff]   ;;  %v6508_v58 = vld [vmem:[#allocation2 + $0x80] ss:$12 sps:$4 sm:$0xff]   ;;  %v6511_v60 = vld [vmem:[#allocation2 + $0x98] ss:$12 sps:$4 sm:$0xff]  }
  0x60   :  { %v6512_v61 = vld [vmem:[#allocation2 + $0x170] ss:$12 sps:$4 sm:$0xff]   ;;  %v6514_v63 = vld [vmem:[#allocation2 + $0x188] ss:$12 sps:$4 sm:$0xff]   ;;  %v6515_v1 = vld [vmem:[#allocation2 + $0x1a0] ss:$12 sps:$4 sm:$0xff]  }
  0x61   :  { %5641 = vmatmul.mubr.msk.bf16.gmra.mrb[4].mxu0 %vm499_vm0, %v7584_v30  ;;  %v6513_v62 = vld [vmem:[#allocation2 + $0xb0] ss:$12 sps:$4 sm:$0xff]   ;;  %v6516_v3 = vld [vmem:[#allocation7] ss:$56 sps:$4 sm:$0xff]   ;;  %v6521_v4 = vld [vmem:[#allocation7 + $0x74] ss:$56 sps:$4 sm:$0xff]  }
  0x62   :  { %517 = vmatpush1.bf16.msra.mxu1 %v6453_v12  ;;  %2923 = vmatprep.mubr.bf16.mxu0 %v7484_v0  ;;  %v6518_v2 = vld [vmem:[#allocation7 + $0x4] ss:$56 sps:$4 sm:$0xff]   ;;  %v6522_v7 = vld [vmem:[#allocation7 + $0xe0] ss:$56 sps:$4 sm:$0xff]   ;;  %v6527_v8 = vld [vmem:[#allocation7 + $0x154] ss:$56 sps:$4 sm:$0xff]  }
  0x63   :  { %518 = vmatprep.subr.bf16.mxu1 %v6454_v13  ;;  %v6524_v6 = vld [vmem:[#allocation7 + $0xe4] ss:$56 sps:$4 sm:$0xff]   ;;  %v6525_v9 = vld [vmem:[#allocation7 + $0x150] ss:$56 sps:$4 sm:$0xff]   ;;  %v6528_v11 = vld [vmem:[#allocation7 + $0x1c0] ss:$56 sps:$4 sm:$0xff]  }
  0x64   :  { %v6530_v10 = vld [vmem:[#allocation7 + $0x1c4] ss:$56 sps:$4 sm:$0xff]   ;;  %v6533_v12 = vld [vmem:[#allocation7 + $0x234] ss:$56 sps:$4 sm:$0xff]   ;;  %v6531_v13 = vld [vmem:[#allocation7 + $0x230] ss:$56 sps:$4 sm:$0xff]  }
  0x65   :  { %v6536_v14 = vld [vmem:[#allocation7 + $0x2a4] ss:$56 sps:$4 sm:$0xff]   ;;  %v6534_v15 = vld [vmem:[#allocation7 + $0x2a0] ss:$56 sps:$4 sm:$0xff]   ;;  %v6537_v17 = vld [vmem:[#allocation7 + $0x310] ss:$56 sps:$4 sm:$0xff]  }
  0x66   :  { %519 = vmatpush1.bf16.msra.mxu1 %v6456_v16  ;;  %v6539_v16 = vld [vmem:[#allocation7 + $0x314] ss:$56 sps:$4 sm:$0xff]   ;;  %v6573_v33 = vld [vmem:[#allocation7 + $0x778] ss:$56 sps:$4 sm:$0xff]   ;;  %v6579_v37 = vld [vmem:[#allocation7 + $0x7e8] ss:$56 sps:$4 sm:$0xff]  }
  0x67   :  { %520 = vmatprep.subr.bf16.mxu1 %v6457_v18  ;;  %v6542_v18 = vld [vmem:[#allocation7 + $0x384] ss:$56 sps:$4 sm:$0xff]   ;;  %v6545_v20 = vld [vmem:[#allocation7 + $0x3f4] ss:$56 sps:$4 sm:$0xff]   ;;  %s5566_s26 = sshll.u32 %s7485_s2, 4  ;;  %s5567_s26 = int_to_ptr.vmem [resolvable:$true] %s5566_s26 }
  0x68   :  { %v6563_v36 = vld [vmem:[#allocation7 + $0x694] ss:$56 sps:$4 sm:$0xff]   ;;  %s7444_s27 = scalar_lea.vmem %s5567_s26, 1024  ;;  %p7449_p5 = scmp.lt.s32.totalorder %s5567_s26, %s5567_s26 }
  0x69   :  { %v6581_v38 = vld [vmem:[#allocation7 + $0x7ec] ss:$56 sps:$4 sm:$0xff]   ;;  %p7445_p4 = scmp.ne.s32.totalorder %s5567_s26, %s7444_s27  ;;  %p7450_p6 = scmp.lt.s32.totalorder %s7444_s27, %s7444_s27 }
  0x6a   :  { %521 = vmatpush1.bf16.msra.mxu1 %v6459_v21  ;;  %v6543_v21 = vld [vmem:[#allocation7 + $0x3f0] ss:$56 sps:$4 sm:$0xff]  }
  0x6b   :  { %522 = vmatprep.subr.bf16.mxu1 %v6460_v22  ;;  %v6548_v22 = vld [vmem:[#allocation7 + $0x464] ss:$56 sps:$4 sm:$0xff]   ;;  %p7451_p7 = por %p7450_p6, %p7449_p5 }
  0x6d   :  { %p7452_p8 = pnand %p7451_p7, %p7445_p4 }
  0x6e   :  { %523 = vmatpush1.bf16.msra.mxu1 %v6462_v24  ;;  %v6551_v24 = vld [vmem:[#allocation7 + $0x4d4] ss:$56 sps:$4 sm:$0xff]  }
  0x6f   :  { %524 = vmatprep.subr.bf16.mxu1 %v6463_v25  ;;  %v6549_v25 = vld [vmem:[#allocation7 + $0x4d0] ss:$56 sps:$4 sm:$0xff]  }
  0x72   :  { %525 = vmatpush1.bf16.msra.mxu1 %v6465_v26  ;;  %v6554_v26 = vld [vmem:[#allocation7 + $0x544] ss:$56 sps:$4 sm:$0xff]  }
  0x73   :  { %526 = vmatprep.subr.bf16.mxu1 %v6466_v27  ;;  %v6552_v27 = vld [vmem:[#allocation7 + $0x540] ss:$56 sps:$4 sm:$0xff]  }
  0x76   :  { %527 = vmatpush1.bf16.msra.mxu1 %v6468_v28  ;;  %v6557_v28 = vld [vmem:[#allocation7 + $0x5b4] ss:$56 sps:$4 sm:$0xff]  }
  0x77   :  { %528 = vmatprep.subr.bf16.mxu1 %v6469_v29  ;;  %v6567_v29 = vld [vmem:[#allocation7 + $0x708] ss:$56 sps:$4 sm:$0xff]  }
  0x7a   :  { %529 = vmatpush1.bf16.msra.mxu1 %v6471_v31  ;;  %v6569_v31 = vld [vmem:[#allocation7 + $0x70c] ss:$56 sps:$4 sm:$0xff]  }
  0x7b   :  { %530 = vmatprep.subr.bf16.mxu1 %v6472_v32  ;;  %v6560_v32 = vld [vmem:[#allocation7 + $0x624] ss:$56 sps:$4 sm:$0xff]   ;;  %2891 = vmatprep.subr.bf16.mxu0 %v6569_v31 }
  0x7c   :  { %2892 = vmatpush1.bf16.msra.mxu0 %v6567_v29  ;;  %v6578_v29 = vld [vmem:[#allocation7 + $0x7e4] ss:$56 sps:$4 sm:$0xff]  }
  0x7e   :  { %531 = vmatpush1.bf16.msra.mxu1 %v6474_v34  ;;  %v6575_v34 = vld [vmem:[#allocation7 + $0x77c] ss:$56 sps:$4 sm:$0xff]  }
  0x7f   :  { %532 = vmatprep.subr.bf16.mxu1 %v6475_v35  ;;  %v6558_v35 = vld [vmem:[#allocation7 + $0x620] ss:$56 sps:$4 sm:$0xff]   ;;  %2893 = vmatprep.subr.bf16.mxu0 %v6575_v34  ;;  %v6584_v34 = vld [vmem:[#allocation7 + $0x854] ss:$56 sps:$4 sm:$0xff]  }
  0x80   :  { %2894 = vmatpush1.bf16.msra.mxu0 %v6573_v33  ;;  %v6576_v33 = vld [vmem:[#allocation7 + $0x7e0] ss:$56 sps:$4 sm:$0xff]  }
  0x81   :  { %2895 = vmatprep.subr.bf16.mxu0 %v6581_v38  ;;  %v6596_v38 = vld [vmem:[#allocation7 + $0x934] ss:$56 sps:$4 sm:$0xff]  }
  0x82   :  { %533 = vmatpush1.bf16.msra.mxu1 %v6477_v39  ;;  %v6561_v39 = vld [vmem:[#allocation7 + $0x690] ss:$56 sps:$4 sm:$0xff]  }
  0x83   :  { %534 = vmatprep.subr.bf16.mxu1 %v6478_v40  ;;  %v6566_v40 = vld [vmem:[#allocation7 + $0x704] ss:$56 sps:$4 sm:$0xff]  }
  0x84   :  { %2896 = vmatpush1.bf16.msra.mxu0 %v6579_v37  ;;  %v6588_v37 = vld [vmem:[#allocation7 + $0x8c0] ss:$56 sps:$4 sm:$0xff]  }
  0x86   :  { %535 = vmatpush1.bf16.msra.mxu1 %v6480_v41  ;;  %v6587_v41 = vld [vmem:[#allocation7 + $0x85c] ss:$56 sps:$4 sm:$0xff]  }
  0x87   :  { %536 = vmatprep.subr.bf16.mxu1 %v6484_v42  ;;  %v6585_v42 = vld [vmem:[#allocation7 + $0x858] ss:$56 sps:$4 sm:$0xff]   ;;  %2897 = vmatprep.subr.bf16.mxu0 %v6587_v41 }
  0x88   :  { %2898 = vmatpush1.bf16.msra.mxu0 %v6585_v42  ;;  %v6600_v42 = vld [vmem:[#allocation7 + $0x9a0] ss:$56 sps:$4 sm:$0xff]  }
  0x8a   :  { %537 = vmatpush1.bf16.msra.mxu1 %v6486_v43  ;;  %v6591_v43 = vld [vmem:[#allocation7 + $0x8c8] ss:$56 sps:$4 sm:$0xff]  }
  0x8b   :  { %6260 = vmatprep.subr.bf16.mxu1 %v6493_v44  ;;  %v6593_v44 = vld [vmem:[#allocation7 + $0x8cc] ss:$56 sps:$4 sm:$0xff]  }
  0x8c   :  { %2899 = vmatprep.subr.bf16.mxu0 %v6593_v44  ;;  %v6608_v44 = vld [vmem:[#allocation7 + $0xa14] ss:$56 sps:$4 sm:$0xff]  }
  0x8d   :  { %539 = vmatmul.mubr.bf16.vlgmr.msra.gmra.mrb[0].mxu1 %v6489_v45  ;;  %2900 = vmatpush1.bf16.msra.mxu0 %v6591_v43 }
  0x8e   :  { %6261 = vmatpush3.bf16.msra.mxu1 %v6494_v46  ;;  %548 = vmatprep.mubr.bf16.mxu1 %v6504_v47  ;;  %v6597_v46 = vld [vmem:[#allocation7 + $0x938] ss:$56 sps:$4 sm:$0xff]  }
  0x8f   :  { %6262 = vmatprep.subr.bf16.mxu1 %v6496_v48  ;;  %v6605_v48 = vld [vmem:[#allocation7 + $0x9ac] ss:$56 sps:$4 sm:$0xff]  }
  0x92   :  { %6263 = vmatpush3.bf16.msra.mxu1 %v6497_v49  ;;  %v6611_v49 = vld [vmem:[#allocation7 + $0xa1c] ss:$56 sps:$4 sm:$0xff]  }
  0x93   :  { %6264 = vmatprep.subr.bf16.mxu1 %v6498_v50  ;;  %v6609_v50 = vld [vmem:[#allocation7 + $0xa18] ss:$56 sps:$4 sm:$0xff]  }
  0x95   :  { %549 = vmatmul.mubr.bf16.gmra.mrb[4].mxu1 %v6507_v51 }
  0x96   :  { %6265 = vmatpush3.bf16.msra.mxu1 %v6499_v52  ;;  %644 = vmatprep.mubr.bf16.mxu1 %v7576_v19  ;;  %v6540_v19 = vld [vmem:[#allocation7 + $0x380] ss:$56 sps:$4 sm:$0xff]  }
  0x97   :  { %6266 = vmatprep.subr.bf16.mxu1 %v6500_v53 }
  0x9a   :  { %6267 = vmatpush3.bf16.msra.mxu1 %v6501_v54 }
  0x9b   :  { %6268 = vmatprep.subr.bf16.mxu1 %v6502_v55 }
  0x9e   :  { %6269 = vmatpush3.bf16.msra.mxu1 %v6503_v56 }
  0x9f   :  { %6270 = vmatprep.subr.bf16.mxu1 %v6506_v57 }
  0xa2   :  { %6271 = vmatpush3.bf16.msra.mxu1 %v6508_v58 }
  0xa3   :  { %6272 = vmatprep.subr.bf16.mxu1 %v6510_v59 }
  0xa6   :  { %6273 = vmatpush3.bf16.msra.mxu1 %v6511_v60 }
  0xa7   :  { %6274 = vmatprep.subr.bf16.mxu1 %v6512_v61 }
  0xaa   :  { %6275 = vmatpush3.bf16.msra.mxu1 %v6513_v62 }
  0xab   :  { %6292 = vmatprep.subr.bf16.mxu1 %v6514_v63 }
  0xad   :  { %645 = vmatmul.mubr.bf16.vlgmr.msra.gmra.mrb[8].mxu1 %v6489_v45  ;;  %v6599_v45 = vld [vmem:[#allocation7 + $0x93c] ss:$56 sps:$4 sm:$0xff]  }
  0xae   :  { %6293 = vmatpush3.bf16.msra.mxu1 %v6514_v63  ;;  %652 = vmatprep.mubr.bf16.mxu1 %v6504_v47  ;;  %v6603_v47 = vld [vmem:[#allocation7 + $0x9a8] ss:$56 sps:$4 sm:$0xff]  }
  0xaf   :  { %6294 = vmatprep.subr.bf16.mxu1 %v6515_v1  ;;  %2901 = vmatprep.subr.bf16.mxu0 %v6599_v45 }
  0xb0   :  { %2902 = vmatpush1.bf16.msra.mxu0 %v6597_v46 }
  0xb1   :  { %2903 = vmatprep.subr.bf16.mxu0 %v6605_v48 }
  0xb2   :  { %6295 = vmatpush3.bf16.msra.mxu1 %v6515_v1 }
  0xb3   :  { %2732 = vmatprep.subr.bf16.mxu1 %v6518_v2 }
  0xb4   :  { %2904 = vmatpush1.bf16.msra.mxu0 %v6603_v47 }
  0xb5   :  { %653 = vmatmul.mubr.bf16.gmra.mrb[12].mxu1 %v6507_v51  ;;  %2905 = vmatprep.subr.bf16.mxu0 %v6611_v49  ;;  %v6617_v51 = vld [vmem:[#allocation7 + $0x71c] ss:$56 sps:$4 sm:$0xff]   ;;  %v6606_v49 = vld [vmem:[#allocation7 + $0xa10] ss:$56 sps:$4 sm:$0xff]  }
  0xb6   :  { %6296 = vmatprep.mubr.msk.bf16.mxu1 %vm499_vm0, %v7579_v23  ;;  %v6546_v23 = vld [vmem:[#allocation7 + $0x460] ss:$56 sps:$4 sm:$0xff]  }
  0xb8   :  { %2906 = vmatpush1.bf16.msra.mxu0 %v6609_v50  ;;  %v6614_v50 = vld [vmem:[#allocation7 + $0xc] ss:$56 sps:$4 sm:$0xff]  }
  0xb9   :  { %3103 = vmatprep.subr.bf16.mxu0 %v6617_v51 }
  0xbd   :  { %6297 = vmatmul.mubr.msk.bf16.vlgmr.msra.gmra.mrb[16].mxu1 %vm499_vm0, %v7584_v30  ;;  %v6555_v30 = vld [vmem:[#allocation7 + $0x5b0] ss:$56 sps:$4 sm:$0xff]  }
  0xbe   :  { %2733 = vmatpush1.bf16.msra.mxu1 %v6516_v3 }
  0xbf   :  { %2734 = vmatprep.subr.bf16.mxu1 %v6521_v4 }
  0xc2   :  { %2735 = vmatpush1.bf16.msra.mxu1 %v6519_v5 }
  0xc3   :  { %2736 = vmatprep.subr.bf16.mxu1 %v6524_v6 }
  0xc6   :  { %2737 = vmatpush1.bf16.msra.mxu1 %v6522_v7 }
  0xc7   :  { %2738 = vmatprep.subr.bf16.mxu1 %v6527_v8 }
  0xca   :  { %2739 = vmatpush1.bf16.msra.mxu1 %v6525_v9 }
  0xcb   :  { %2740 = vmatprep.subr.bf16.mxu1 %v6530_v10 }
  0xce   :  { %2741 = vmatpush1.bf16.msra.mxu1 %v6528_v11 }
  0xcf   :  { %2742 = vmatprep.subr.bf16.mxu1 %v6533_v12 }
  0xd2   :  { %2743 = vmatpush1.bf16.msra.mxu1 %v6531_v13 }
  0xd3   :  { %2744 = vmatprep.subr.bf16.mxu1 %v6536_v14 }
  0xd6   :  { %2745 = vmatpush1.bf16.msra.mxu1 %v6534_v15  ;;  %v6564_v15 = vld [vmem:[#allocation7 + $0x700] ss:$56 sps:$4 sm:$0xff]  }
  0xd7   :  { %2746 = vmatprep.subr.bf16.mxu1 %v6539_v16  ;;  %v7606_v60 = vpop.permute.xlu0 %163  ;;  %v7612_v4 = vpop.permute.xlu1 %173 }
  0xda   :  { %2747 = vmatpush1.bf16.msra.mxu1 %v6537_v17 }
  0xdb   :  { %2748 = vmatprep.subr.bf16.mxu1 %v6542_v18  ;;  %v7608_v62 = vpop.permute.xlu0 %168  ;;  %v7620_v16 = vpop.permute.xlu1 %178 }
  0xde   :  { %2749 = vmatpush1.bf16.msra.mxu1 %v6540_v19  ;;  %v6572_v19 = vld [vmem:[#allocation7 + $0x774] ss:$56 sps:$4 sm:$0xff]  }
  0xdf   :  { %2750 = vmatprep.subr.bf16.mxu1 %v6545_v20 }
  0xe2   :  { %2751 = vmatpush1.bf16.msra.mxu1 %v6543_v21 }
  0xe3   :  { %2752 = vmatprep.subr.bf16.mxu1 %v6548_v22 }
  0xe6   :  { %2753 = vmatpush1.bf16.msra.mxu1 %v6546_v23 }
  0xe7   :  { %2754 = vmatprep.subr.bf16.mxu1 %v6551_v24 }
  0xea   :  { %2755 = vmatpush1.bf16.msra.mxu1 %v6549_v25 }
  0xeb   :  { %2756 = vmatprep.subr.bf16.mxu1 %v6554_v26 }
  0xee   :  { %2757 = vmatpush1.bf16.msra.mxu1 %v6552_v27  ;;  %v6570_v27 = vld [vmem:[#allocation7 + $0x770] ss:$56 sps:$4 sm:$0xff]  }
  0xef   :  { %2758 = vmatprep.subr.bf16.mxu1 %v6557_v28 }
  0xf2   :  { %2759 = vmatpush1.bf16.msra.mxu1 %v6555_v30 }
  0xf3   :  { %2760 = vmatprep.subr.bf16.mxu1 %v6560_v32 }
  0xf6   :  { %2761 = vmatpush1.bf16.msra.mxu1 %v6558_v35  ;;  %v6582_v35 = vld [vmem:[#allocation7 + $0x850] ss:$56 sps:$4 sm:$0xff]  }
  0xf7   :  { %2762 = vmatprep.subr.bf16.mxu1 %v6563_v36  ;;  %v6590_v36 = vld [vmem:[#allocation7 + $0x8c4] ss:$56 sps:$4 sm:$0xff]  }
  0xfa   :  { %2763 = vmatpush1.bf16.msra.mxu1 %v6561_v39  ;;  %v6594_v39 = vld [vmem:[#allocation7 + $0x930] ss:$56 sps:$4 sm:$0xff]  }
  0xfb   :  { %2785 = vmatprep.subr.bf16.mxu1 %v6566_v40  ;;  %v6602_v40 = vld [vmem:[#allocation7 + $0x9a4] ss:$56 sps:$4 sm:$0xff]  }
 0x12c   :  { %v593_v52 = vpop.f32.mrb[0].mxu0 }
 0x12d   :  { %v595_v53 = vpop.f32.mrb[1].mxu0 }
 0x12e   :  { %v597_v54 = vpop.f32.mrb[2].mxu0 }
 0x12f   :  { %v599_v55 = vpop.f32.mrb[3].mxu0 }
 0x134   :  { %v603_v56 = vpop.f32.mrb[4].mxu0 }
 0x135   :  { %v605_v57 = vpop.f32.mrb[5].mxu0 }
 0x136   :  { %v607_v58 = vpop.f32.mrb[6].mxu0 }
 0x137   :  { %v609_v59 = vpop.f32.mrb[7].mxu0 }
 0x160   :  { %v540_v61 = vpop.f32.mrb[0].mxu1 }
 0x161   :  { %v541_v63 = vadd.f32 %v540_v61, %v7606_v60  ;;  %v542_v1 = vpop.f32.mrb[1].mxu1 }
 0x162   :  { %v543_v2 = vadd.f32 %v542_v1, %v7606_v60  ;;  %v544_v3 = vpop.f32.mrb[2].mxu1 }
 0x163   :  { %v545_v5 = vadd.f32 %v544_v3, %v7608_v62  ;;  %v594_v6 = vadd.f32 %v593_v52, %v541_v63  ;;  %v546_v7 = vpop.f32.mrb[3].mxu1 }
 0x164   :  { %v547_v8 = vadd.f32 %v546_v7, %v7608_v62  ;;  %v596_v9 = vadd.f32 %v595_v53, %v543_v2 }
 0x165   :  { %v598_v10 = vadd.f32 %v597_v54, %v545_v5 }
 0x166   :  { %v600_v11 = vadd.f32 %v599_v55, %v547_v8 }
 0x167   :  { %v7616_v12 = vpack.c.bf16 %v598_v10, %v594_v6  ;;  %v6612_v10 = vld [vmem:[#allocation7 + $0x8] ss:$56 sps:$4 sm:$0xff]  }
 0x168   :  { %v7618_v13 = vpack.c.bf16 %v600_v11, %v596_v9  ;;  %v550_v14 = vpop.f32.mrb[4].mxu1  ;;  %v6615_v11 = vld [vmem:[#allocation7 + $0x718] ss:$56 sps:$4 sm:$0xff]  }
 0x169   :  { %v551_v17 = vadd.f32 %v550_v14, %v7612_v4  ;;  %v552_v18 = vpop.f32.mrb[5].mxu1 }
 0x16a   :  { %2764 = vmatprep.mubr.bf16.mxu1 %v7618_v13  ;;  %v553_v20 = vadd.f32 %v552_v18, %v7612_v4  ;;  %v554_v21 = vpop.f32.mrb[6].mxu1  ;;  %v6624_v18 = vld [vmem:[#allocation7 + $0xe8] ss:$56 sps:$4 sm:$0xff]  }
 0x16b   :  { %2765 = vmatmul.mubr.bf16.vlgmr.msra.gmra.mrb[20].mxu1 %v7616_v12  ;;  %v604_v22 = vadd.f32 %v603_v56, %v551_v17  ;;  %v555_v23 = vadd.f32 %v554_v21, %v7620_v16  ;;  %v556_v24 = vpop.f32.mrb[7].mxu1  ;;  %v6629_v17 = vld [vmem:[#allocation7 + $0x7fc] ss:$56 sps:$4 sm:$0xff]   ;;  %v6635_v21 = vld [vmem:[#allocation7 + $0x86c] ss:$56 sps:$4 sm:$0xff]  }
 0x16c   :  { %v557_v25 = vadd.f32 %v556_v24, %v7620_v16  ;;  %v606_v26 = vadd.f32 %v605_v57, %v553_v20  ;;  %2786 = vmatpush1.bf16.msra.mxu1 %v6564_v15  ;;  %v6623_v15 = vld [vmem:[#allocation7 + $0x78c] ss:$56 sps:$4 sm:$0xff]   ;;  %v6632_v20 = vld [vmem:[#allocation7 + $0x15c] ss:$56 sps:$4 sm:$0xff]  }
 0x16d   :  { %v608_v28 = vadd.f32 %v607_v58, %v555_v23  ;;  %2787 = vmatprep.subr.bf16.mxu1 %v6572_v19  ;;  %v6627_v19 = vld [vmem:[#allocation7 + $0x7f8] ss:$56 sps:$4 sm:$0xff]   ;;  %v6633_v23 = vld [vmem:[#allocation7 + $0x868] ss:$56 sps:$4 sm:$0xff]   ;;  %v6638_v24 = vld [vmem:[#allocation7 + $0x1cc] ss:$56 sps:$4 sm:$0xff]  }
 0x16e   :  { %v610_v30 = vadd.f32 %v609_v59, %v557_v25  ;;  %v6641_v25 = vld [vmem:[#allocation7 + $0x8dc] ss:$56 sps:$4 sm:$0xff]  }
 0x16f   :  { %v7628_v31 = vpack.c.bf16 %v608_v28, %v604_v22  ;;  %v6630_v22 = vld [vmem:[#allocation7 + $0x158] ss:$56 sps:$4 sm:$0xff]   ;;  %v6644_v28 = vld [vmem:[#allocation7 + $0x23c] ss:$56 sps:$4 sm:$0xff]  }
 0x170   :  { %v7630_v32 = vpack.c.bf16 %v610_v30, %v606_v26  ;;  %2788 = vmatpush1.bf16.msra.mxu1 %v6570_v27  ;;  %v6636_v26 = vld [vmem:[#allocation7 + $0x1c8] ss:$56 sps:$4 sm:$0xff]   ;;  %v6639_v27 = vld [vmem:[#allocation7 + $0x8d8] ss:$56 sps:$4 sm:$0xff]  }
 0x171   :  { %2789 = vmatprep.subr.bf16.mxu1 %v6578_v29  ;;  %v6647_v29 = vld [vmem:[#allocation7 + $0x94c] ss:$56 sps:$4 sm:$0xff]   ;;  %v6642_v30 = vld [vmem:[#allocation7 + $0x238] ss:$56 sps:$4 sm:$0xff]  }
 0x172   :  { %2774 = vmatprep.mubr.bf16.mxu1 %v7630_v32 }
 0x173   :  { %2775 = vmatmul.mubr.bf16.gmra.mrb[24].mxu1 %v7628_v31 }
 0x174   :  { %2790 = vmatpush1.bf16.msra.mxu1 %v6576_v33  ;;  %2817 = vmatprep.mubr.bf16.mxu1 %v7484_v0  ;;  %v6645_v33 = vld [vmem:[#allocation7 + $0x948] ss:$56 sps:$4 sm:$0xff]  }
 0x175   :  { %2791 = vmatprep.subr.bf16.mxu1 %v6584_v34  ;;  %v6650_v34 = vld [vmem:[#allocation7 + $0x2ac] ss:$56 sps:$4 sm:$0xff]  }
 0x178   :  { %2792 = vmatpush1.bf16.msra.mxu1 %v6582_v35  ;;  %v6653_v35 = vld [vmem:[#allocation7 + $0x9bc] ss:$56 sps:$4 sm:$0xff]  }
 0x179   :  { %2793 = vmatprep.subr.bf16.mxu1 %v6590_v36  ;;  %v6648_v36 = vld [vmem:[#allocation7 + $0x2a8] ss:$56 sps:$4 sm:$0xff]  }
 0x17c   :  { %2794 = vmatpush1.bf16.msra.mxu1 %v6588_v37  ;;  %v6651_v37 = vld [vmem:[#allocation7 + $0x9b8] ss:$56 sps:$4 sm:$0xff]  }
 0x17d   :  { %2795 = vmatprep.subr.bf16.mxu1 %v6596_v38  ;;  %v6656_v38 = vld [vmem:[#allocation7 + $0x31c] ss:$56 sps:$4 sm:$0xff]  }
 0x180   :  { %v6276_v41 = vpop.f32.mrb[8].mxu1  ;;  %2796 = vmatpush1.bf16.msra.mxu1 %v6594_v39  ;;  %v6659_v39 = vld [vmem:[#allocation7 + $0xa2c] ss:$56 sps:$4 sm:$0xff]  }
 0x181   :  { %v6277_v43 = vpop.f32.mrb[9].mxu1  ;;  %2797 = vmatprep.subr.bf16.mxu1 %v6602_v40  ;;  %v6654_v40 = vld [vmem:[#allocation7 + $0x318] ss:$56 sps:$4 sm:$0xff]  }
 0x182   :  { %v6278_v45 = vadd.f32 %v6277_v43, %v6276_v41  ;;  %v6279_v46 = vpop.f32.mrb[10].mxu1  ;;  %v6657_v41 = vld [vmem:[#allocation7 + $0xa28] ss:$56 sps:$4 sm:$0xff]   ;;  %v6665_v43 = vld [vmem:[#allocation7 + $0x2c] ss:$56 sps:$4 sm:$0xff]  }
 0x183   :  { %v6280_v47 = vpop.f32.mrb[11].mxu1 }
 0x184   :  { %v6281_v48 = vadd.f32 %v6280_v47, %v6279_v46  ;;  %2798 = vmatpush1.bf16.msra.mxu1 %v6600_v42  ;;  %v647_v59 = vadd.f32 %v6278_v45, %v7606_v60  ;;  %v6618_v60 = vld [vmem:[#allocation7 + $0x78] ss:$56 sps:$4 sm:$0xff]   ;;  %v6662_v42 = vld [vmem:[#allocation7 + $0x38c] ss:$56 sps:$4 sm:$0xff]   ;;  %v6663_v45 = vld [vmem:[#allocation7 + $0x28] ss:$56 sps:$4 sm:$0xff]  }
 0x185   :  { %2799 = vmatprep.subr.bf16.mxu1 %v6608_v44  ;;  %v6660_v44 = vld [vmem:[#allocation7 + $0x388] ss:$56 sps:$4 sm:$0xff]   ;;  %v6668_v46 = vld [vmem:[#allocation7 + $0x3fc] ss:$56 sps:$4 sm:$0xff]  }
 0x186   :  { %v650_v5 = vadd.f32 %v6281_v48, %v7608_v62  ;;  %v6626_v62 = vld [vmem:[#allocation7 + $0xec] ss:$56 sps:$4 sm:$0xff]   ;;  %v6671_v47 = vld [vmem:[#allocation7 + $0x9c] ss:$56 sps:$4 sm:$0xff]   ;;  %v6666_v48 = vld [vmem:[#allocation7 + $0x3f8] ss:$56 sps:$4 sm:$0xff]  }
 0x188   :  { %v6282_v51 = vpop.f32.mrb[12].mxu1  ;;  %2800 = vmatpush1.bf16.msra.mxu1 %v6606_v49  ;;  %v6669_v49 = vld [vmem:[#allocation7 + $0x98] ss:$56 sps:$4 sm:$0xff]  }
 0x189   :  { %v6283_v52 = vpop.f32.mrb[13].mxu1  ;;  %2838 = vmatprep.subr.bf16.mxu1 %v6614_v50  ;;  %v6674_v50 = vld [vmem:[#allocation7 + $0x46c] ss:$56 sps:$4 sm:$0xff]  }
 0x18a   :  { %v6284_v53 = vadd.f32 %v6283_v52, %v6282_v51  ;;  %v6285_v54 = vpop.f32.mrb[14].mxu1  ;;  %v6677_v51 = vld [vmem:[#allocation7 + $0x10c] ss:$56 sps:$4 sm:$0xff]   ;;  %v6672_v52 = vld [vmem:[#allocation7 + $0x468] ss:$56 sps:$4 sm:$0xff]  }
 0x18b   :  { %v6286_v55 = vpop.f32.mrb[15].mxu1 }
 0x18c   :  { %v6287_v56 = vadd.f32 %v6286_v55, %v6285_v54  ;;  %v655_v57 = vadd.f32 %v6284_v53, %v7612_v4  ;;  %v6620_v4 = vld [vmem:[#allocation7 + $0x7c] ss:$56 sps:$4 sm:$0xff]   ;;  %v6675_v53 = vld [vmem:[#allocation7 + $0x108] ss:$56 sps:$4 sm:$0xff]  }
 0x18d   :  { %v6680_v54 = vld [vmem:[#allocation7 + $0x4dc] ss:$56 sps:$4 sm:$0xff]  }
 0x18e   :  { %v658_v1 = vadd.f32 %v6287_v56, %v7620_v16  ;;  %v6621_v16 = vld [vmem:[#allocation7 + $0x788] ss:$56 sps:$4 sm:$0xff]   ;;  %v6683_v55 = vld [vmem:[#allocation7 + $0x17c] ss:$56 sps:$4 sm:$0xff]   ;;  %v6678_v56 = vld [vmem:[#allocation7 + $0x4d8] ss:$56 sps:$4 sm:$0xff]  }
 0x190   :  { %v6298_v58 = vpop.f32.mrb[16].mxu1 }
 0x191   :  { %v704_v61 = vadd.f32 %v6298_v58, %v655_v57  ;;  %v695_v63 = vpop.f32.mrb[17].mxu1  ;;  %v6681_v57 = vld [vmem:[#allocation7 + $0x178] ss:$56 sps:$4 sm:$0xff]   ;;  %v6686_v58 = vld [vmem:[#allocation7 + $0x54c] ss:$56 sps:$4 sm:$0xff]  }
 0x192   :  { %v696_v2 = vadd.f32 %v695_v63, %v647_v59  ;;  %v6299_v3 = vpop.f32.mrb[18].mxu1  ;;  %v6689_v59 = vld [vmem:[#allocation7 + $0x1ec] ss:$56 sps:$4 sm:$0xff]   ;;  %v6687_v63 = vld [vmem:[#allocation7 + $0x1e8] ss:$56 sps:$4 sm:$0xff]  }
 0x193   :  { %v707_v6 = vadd.f32 %v6299_v3, %v658_v1  ;;  %v698_v7 = vpop.f32.mrb[19].mxu1  ;;  %v6692_v1 = vld [vmem:[#allocation7 + $0x5bc] ss:$56 sps:$4 sm:$0xff]   ;;  %v6690_v3 = vld [vmem:[#allocation7 + $0x5b8] ss:$56 sps:$4 sm:$0xff]  }
 0x194   :  { %v699_v8 = vadd.f32 %v698_v7, %v650_v5  ;;  %v6693_v5 = vld [vmem:[#allocation7 + $0x258] ss:$56 sps:$4 sm:$0xff]   ;;  %v6701_v7 = vld [vmem:[#allocation7 + $0x2cc] ss:$56 sps:$4 sm:$0xff]  }
 0x195   :  { %v7639_v9 = vpack.c.bf16 %v707_v6, %v704_v61  ;;  %v6684_v61 = vld [vmem:[#allocation7 + $0x548] ss:$56 sps:$4 sm:$0xff]   ;;  %v6698_v6 = vld [vmem:[#allocation7 + $0x62c] ss:$56 sps:$4 sm:$0xff]  }
 0x196   :  { %v7641_v14 = vpack.c.bf16 %v699_v8, %v696_v2  ;;  %v6695_v2 = vld [vmem:[#allocation7 + $0x25c] ss:$56 sps:$4 sm:$0xff]   ;;  %v6696_v8 = vld [vmem:[#allocation7 + $0x628] ss:$56 sps:$4 sm:$0xff]  }
 0x198   :  { %2818 = vmatmul.mubr.bf16.vlgmr.msra.gmra.mrb[20].mxu1 %v7641_v14  ;;  %2924 = vmatmul.mubr.bf16.vlgmr.msra.gmra.mrb[8].mxu0 %v7641_v14 }
 0x199   :  { %2839 = vmatpush1.bf16.msra.mxu1 %v6612_v10  ;;  %3104 = vmatpush1.bf16.msra.mxu0 %v6615_v11  ;;  %v6699_v10 = vld [vmem:[#allocation7 + $0x2c8] ss:$56 sps:$4 sm:$0xff]   ;;  %v6704_v11 = vld [vmem:[#allocation7 + $0x69c] ss:$56 sps:$4 sm:$0xff]  }
 0x19a   :  { %2840 = vmatprep.subr.bf16.mxu1 %v6620_v4  ;;  %3105 = vmatprep.subr.bf16.mxu0 %v6623_v15  ;;  %v6707_v4 = vld [vmem:[#allocation7 + $0x33c] ss:$56 sps:$4 sm:$0xff]   ;;  %v6702_v15 = vld [vmem:[#allocation7 + $0x698] ss:$56 sps:$4 sm:$0xff]  }
 0x19b   :  { %2827 = vmatprep.mubr.bf16.mxu1 %v7484_v0  ;;  %2933 = vmatprep.mubr.bf16.mxu0 %v7484_v0 }
 0x19d   :  { %2841 = vmatpush1.bf16.msra.mxu1 %v6618_v60  ;;  %3106 = vmatpush1.bf16.msra.mxu0 %v6621_v16  ;;  %v6705_v60 = vld [vmem:[#allocation7 + $0x338] ss:$56 sps:$4 sm:$0xff]   ;;  %v6710_v16 = vld [vmem:[#allocation7 + $0x14] ss:$56 sps:$4 sm:$0xff]  }
 0x19e   :  { %2842 = vmatprep.subr.bf16.mxu1 %v6626_v62  ;;  %3107 = vmatprep.subr.bf16.mxu0 %v6629_v17  ;;  %v6713_v62 = vld [vmem:[#allocation7 + $0x3ac] ss:$56 sps:$4 sm:$0xff]   ;;  %v6708_v17 = vld [vmem:[#allocation7 + $0x10] ss:$56 sps:$4 sm:$0xff]  }
 0x1a0   :  { %2828 = vmatmul.mubr.bf16.gmra.mrb[24].mxu1 %v7639_v9  ;;  %2934 = vmatmul.mubr.bf16.gmra.mrb[12].mxu0 %v7639_v9 }
 0x1a1   :  { %2843 = vmatpush1.bf16.msra.mxu1 %v6624_v18  ;;  %3108 = vmatpush1.bf16.msra.mxu0 %v6627_v19  ;;  %v6711_v18 = vld [vmem:[#allocation7 + $0x3a8] ss:$56 sps:$4 sm:$0xff]   ;;  %v6716_v19 = vld [vmem:[#allocation7 + $0x84] ss:$56 sps:$4 sm:$0xff]  }
 0x1a2   :  { %2870 = vmatprep.mubr.bf16.mxu1 %v7618_v13  ;;  %2844 = vmatprep.subr.bf16.mxu1 %v6632_v20  ;;  %v6719_v20 = vld [vmem:[#allocation7 + $0x41c] ss:$56 sps:$4 sm:$0xff]  }
 0x1a3   :  { %3109 = vmatprep.subr.bf16.mxu0 %v6635_v21  ;;  %3135 = vmatprep.mubr.bf16.mxu0 %v7484_v0  ;;  %v6714_v21 = vld [vmem:[#allocation7 + $0x80] ss:$56 sps:$4 sm:$0xff]  }
 0x1a5   :  { %2845 = vmatpush1.bf16.msra.mxu1 %v6630_v22  ;;  %3110 = vmatpush1.bf16.msra.mxu0 %v6633_v23  ;;  %v6717_v22 = vld [vmem:[#allocation7 + $0x418] ss:$56 sps:$4 sm:$0xff]   ;;  %v6722_v23 = vld [vmem:[#allocation7 + $0xf4] ss:$56 sps:$4 sm:$0xff]  }
 0x1a6   :  { %2846 = vmatprep.subr.bf16.mxu1 %v6638_v24  ;;  %3111 = vmatprep.subr.bf16.mxu0 %v6641_v25  ;;  %v6725_v24 = vld [vmem:[#allocation7 + $0x48c] ss:$56 sps:$4 sm:$0xff]   ;;  %v6720_v25 = vld [vmem:[#allocation7 + $0xf0] ss:$56 sps:$4 sm:$0xff]  }
 0x1a9   :  { %2847 = vmatpush1.bf16.msra.mxu1 %v6636_v26  ;;  %3112 = vmatpush1.bf16.msra.mxu0 %v6639_v27  ;;  %v6723_v26 = vld [vmem:[#allocation7 + $0x488] ss:$56 sps:$4 sm:$0xff]   ;;  %v6728_v27 = vld [vmem:[#allocation7 + $0x164] ss:$56 sps:$4 sm:$0xff]  }
 0x1aa   :  { %2848 = vmatprep.subr.bf16.mxu1 %v6644_v28  ;;  %3113 = vmatprep.subr.bf16.mxu0 %v6647_v29  ;;  %v6731_v28 = vld [vmem:[#allocation7 + $0x4fc] ss:$56 sps:$4 sm:$0xff]   ;;  %v6726_v29 = vld [vmem:[#allocation7 + $0x160] ss:$56 sps:$4 sm:$0xff]  }
 0x1ad   :  { %2849 = vmatpush1.bf16.msra.mxu1 %v6642_v30  ;;  %3114 = vmatpush1.bf16.msra.mxu0 %v6645_v33  ;;  %v6729_v30 = vld [vmem:[#allocation7 + $0x4f8] ss:$56 sps:$4 sm:$0xff]   ;;  %v6734_v33 = vld [vmem:[#allocation7 + $0x1d4] ss:$56 sps:$4 sm:$0xff]  }
 0x1ae   :  { %2850 = vmatprep.subr.bf16.mxu1 %v6650_v34  ;;  %3115 = vmatprep.subr.bf16.mxu0 %v6653_v35  ;;  %v6737_v34 = vld [vmem:[#allocation7 + $0x56c] ss:$56 sps:$4 sm:$0xff]   ;;  %v6732_v35 = vld [vmem:[#allocation7 + $0x1d0] ss:$56 sps:$4 sm:$0xff]  }
 0x1b1   :  { %2851 = vmatpush1.bf16.msra.mxu1 %v6648_v36  ;;  %3116 = vmatpush1.bf16.msra.mxu0 %v6651_v37  ;;  %v6735_v36 = vld [vmem:[#allocation7 + $0x568] ss:$56 sps:$4 sm:$0xff]   ;;  %v6740_v37 = vld [vmem:[#allocation7 + $0x244] ss:$56 sps:$4 sm:$0xff]  }
 0x1b2   :  { %2852 = vmatprep.subr.bf16.mxu1 %v6656_v38  ;;  %3117 = vmatprep.subr.bf16.mxu0 %v6659_v39  ;;  %v6743_v38 = vld [vmem:[#allocation7 + $0x5dc] ss:$56 sps:$4 sm:$0xff]   ;;  %v6738_v39 = vld [vmem:[#allocation7 + $0x240] ss:$56 sps:$4 sm:$0xff]  }
 0x1b5   :  { %2853 = vmatpush1.bf16.msra.mxu1 %v6654_v40  ;;  %3118 = vmatpush1.bf16.msra.mxu0 %v6657_v41  ;;  %v6741_v40 = vld [vmem:[#allocation7 + $0x5d8] ss:$56 sps:$4 sm:$0xff]   ;;  %v6746_v41 = vld [vmem:[#allocation7 + $0x2b4] ss:$56 sps:$4 sm:$0xff]  }
 0x1b6   :  { %2854 = vmatprep.subr.bf16.mxu1 %v6662_v42  ;;  %3262 = vmatprep.subr.bf16.mxu0 %v6665_v43  ;;  %v6749_v42 = vld [vmem:[#allocation7 + $0x64c] ss:$56 sps:$4 sm:$0xff]   ;;  %v6744_v43 = vld [vmem:[#allocation7 + $0x2b0] ss:$56 sps:$4 sm:$0xff]  }
 0x1b8   :  { %3136 = vmatmul.mubr.bf16.vlgmr.msra.gmra.mrb[16].mxu0 %v7641_v14 }
 0x1b9   :  { %2855 = vmatpush1.bf16.msra.mxu1 %v6660_v44  ;;  %3263 = vmatpush1.bf16.msra.mxu0 %v6663_v45  ;;  %v6747_v44 = vld [vmem:[#allocation7 + $0x648] ss:$56 sps:$4 sm:$0xff]   ;;  %v6752_v45 = vld [vmem:[#allocation7 + $0x324] ss:$56 sps:$4 sm:$0xff]  }
 0x1ba   :  { %2856 = vmatprep.subr.bf16.mxu1 %v6668_v46  ;;  %3264 = vmatprep.subr.bf16.mxu0 %v6671_v47  ;;  %v6755_v46 = vld [vmem:[#allocation7 + $0x6bc] ss:$56 sps:$4 sm:$0xff]   ;;  %v6750_v47 = vld [vmem:[#allocation7 + $0x320] ss:$56 sps:$4 sm:$0xff]  }
 0x1bb   :  { %3145 = vmatprep.mubr.bf16.mxu0 %v7484_v0 }
 0x1bd   :  { %2857 = vmatpush1.bf16.msra.mxu1 %v6666_v48  ;;  %3265 = vmatpush1.bf16.msra.mxu0 %v6669_v49  ;;  %v6753_v48 = vld [vmem:[#allocation7 + $0x6b8] ss:$56 sps:$4 sm:$0xff]   ;;  %v6758_v49 = vld [vmem:[#allocation7 + $0x394] ss:$56 sps:$4 sm:$0xff]  }
 0x1be   :  { %2858 = vmatprep.subr.bf16.mxu1 %v6674_v50  ;;  %3266 = vmatprep.subr.bf16.mxu0 %v6677_v51  ;;  %v6761_v50 = vld [vmem:[#allocation7 + $0x72c] ss:$56 sps:$4 sm:$0xff]   ;;  %v6756_v51 = vld [vmem:[#allocation7 + $0x390] ss:$56 sps:$4 sm:$0xff]  }
 0x1c0   :  { %3146 = vmatmul.mubr.bf16.gmra.mrb[20].mxu0 %v7639_v9 }
 0x1c1   :  { %2859 = vmatpush1.bf16.msra.mxu1 %v6672_v52  ;;  %3267 = vmatpush1.bf16.msra.mxu0 %v6675_v53  ;;  %v6759_v52 = vld [vmem:[#allocation7 + $0x728] ss:$56 sps:$4 sm:$0xff]   ;;  %v6764_v53 = vld [vmem:[#allocation7 + $0x404] ss:$56 sps:$4 sm:$0xff]  }
 0x1c2   :  { %3294 = vmatprep.mubr.bf16.mxu0 %v7618_v13  ;;  %2860 = vmatprep.subr.bf16.mxu1 %v6680_v54  ;;  %v6767_v54 = vld [vmem:[#allocation7 + $0x79c] ss:$56 sps:$4 sm:$0xff]  }
 0x1c3   :  { %3268 = vmatprep.subr.bf16.mxu0 %v6683_v55  ;;  %v6762_v55 = vld [vmem:[#allocation7 + $0x400] ss:$56 sps:$4 sm:$0xff]  }
 0x1c5   :  { %2861 = vmatpush1.bf16.msra.mxu1 %v6678_v56  ;;  %3269 = vmatpush1.bf16.msra.mxu0 %v6681_v57  ;;  %v6765_v56 = vld [vmem:[#allocation7 + $0x798] ss:$56 sps:$4 sm:$0xff]   ;;  %v6770_v57 = vld [vmem:[#allocation7 + $0x474] ss:$56 sps:$4 sm:$0xff]  }
 0x1c6   :  { %2862 = vmatprep.subr.bf16.mxu1 %v6686_v58  ;;  %3270 = vmatprep.subr.bf16.mxu0 %v6689_v59  ;;  %v6773_v58 = vld [vmem:[#allocation7 + $0x80c] ss:$56 sps:$4 sm:$0xff]   ;;  %v6768_v59 = vld [vmem:[#allocation7 + $0x470] ss:$56 sps:$4 sm:$0xff]  }
 0x1c9   :  { %2863 = vmatpush1.bf16.msra.mxu1 %v6684_v61  ;;  %3271 = vmatpush1.bf16.msra.mxu0 %v6687_v63  ;;  %v6771_v61 = vld [vmem:[#allocation7 + $0x808] ss:$56 sps:$4 sm:$0xff]   ;;  %v6776_v63 = vld [vmem:[#allocation7 + $0x4e4] ss:$56 sps:$4 sm:$0xff]  }
 0x1ca   :  { %2864 = vmatprep.subr.bf16.mxu1 %v6692_v1  ;;  %3272 = vmatprep.subr.bf16.mxu0 %v6695_v2  ;;  %v6779_v1 = vld [vmem:[#allocation7 + $0x87c] ss:$56 sps:$4 sm:$0xff]   ;;  %v6774_v2 = vld [vmem:[#allocation7 + $0x4e0] ss:$56 sps:$4 sm:$0xff]  }
 0x1cd   :  { %2865 = vmatpush1.bf16.msra.mxu1 %v6690_v3  ;;  %3273 = vmatpush1.bf16.msra.mxu0 %v6693_v5  ;;  %v6777_v3 = vld [vmem:[#allocation7 + $0x878] ss:$56 sps:$4 sm:$0xff]   ;;  %v6782_v5 = vld [vmem:[#allocation7 + $0x554] ss:$56 sps:$4 sm:$0xff]  }
 0x1ce   :  { %2866 = vmatprep.subr.bf16.mxu1 %v6698_v6  ;;  %3274 = vmatprep.subr.bf16.mxu0 %v6701_v7  ;;  %v6785_v6 = vld [vmem:[#allocation7 + $0x8ec] ss:$56 sps:$4 sm:$0xff]   ;;  %v6780_v7 = vld [vmem:[#allocation7 + $0x550] ss:$56 sps:$4 sm:$0xff]  }
 0x1d1   :  { %2867 = vmatpush1.bf16.msra.mxu1 %v6696_v8  ;;  %3275 = vmatpush1.bf16.msra.mxu0 %v6699_v10  ;;  %v6783_v8 = vld [vmem:[#allocation7 + $0x8e8] ss:$56 sps:$4 sm:$0xff]   ;;  %v6788_v10 = vld [vmem:[#allocation7 + $0x5c4] ss:$56 sps:$4 sm:$0xff]  }
 0x1d2   :  { %2868 = vmatprep.subr.bf16.mxu1 %v6704_v11  ;;  %3276 = vmatprep.subr.bf16.mxu0 %v6707_v4  ;;  %v6791_v11 = vld [vmem:[#allocation7 + $0x95c] ss:$56 sps:$4 sm:$0xff]   ;;  %v6786_v4 = vld [vmem:[#allocation7 + $0x5c0] ss:$56 sps:$4 sm:$0xff]  }
 0x1d5   :  { %2869 = vmatpush1.bf16.msra.mxu1 %v6702_v15  ;;  %3277 = vmatpush1.bf16.msra.mxu0 %v6705_v60  ;;  %v6789_v15 = vld [vmem:[#allocation7 + $0x958] ss:$56 sps:$4 sm:$0xff]   ;;  %v6794_v60 = vld [vmem:[#allocation7 + $0x634] ss:$56 sps:$4 sm:$0xff]  }
 0x1d6   :  { %2944 = vmatprep.subr.bf16.mxu1 %v6710_v16  ;;  %3278 = vmatprep.subr.bf16.mxu0 %v6713_v62  ;;  %v6797_v16 = vld [vmem:[#allocation7 + $0x9cc] ss:$56 sps:$4 sm:$0xff]   ;;  %v6792_v62 = vld [vmem:[#allocation7 + $0x630] ss:$56 sps:$4 sm:$0xff]  }
 0x1d8   :  { %2871 = vmatmul.mubr.bf16.vlgmr.msra.gmra.mrb[28].mxu1 %v7616_v12 }
 0x1d9   :  { %2880 = vmatprep.mubr.bf16.mxu1 %v7630_v32  ;;  %2945 = vmatpush1.bf16.msra.mxu1 %v6708_v17  ;;  %v6795_v17 = vld [vmem:[#allocation7 + $0x9c8] ss:$56 sps:$4 sm:$0xff]  }
 0x1da   :  { %3279 = vmatpush1.bf16.msra.mxu0 %v6711_v18  ;;  %2946 = vmatprep.subr.bf16.mxu1 %v6716_v19  ;;  %v6800_v18 = vld [vmem:[#allocation7 + $0x6a4] ss:$56 sps:$4 sm:$0xff]  }
 0x1db   :  { %3280 = vmatprep.subr.bf16.mxu0 %v6719_v20  ;;  %v6803_v19 = vld [vmem:[#allocation7 + $0xa3c] ss:$56 sps:$4 sm:$0xff]   ;;  %v6798_v20 = vld [vmem:[#allocation7 + $0x6a0] ss:$56 sps:$4 sm:$0xff]  }
 0x1dd   :  { %2947 = vmatpush1.bf16.msra.mxu1 %v6714_v21  ;;  %v6801_v21 = vld [vmem:[#allocation7 + $0xa38] ss:$56 sps:$4 sm:$0xff]  }
 0x1de   :  { %3281 = vmatpush1.bf16.msra.mxu0 %v6717_v22  ;;  %2948 = vmatprep.subr.bf16.mxu1 %v6722_v23  ;;  %v6806_v22 = vld [vmem:[#allocation7 + $0x714] ss:$56 sps:$4 sm:$0xff]  }
 0x1df   :  { %3282 = vmatprep.subr.bf16.mxu0 %v6725_v24  ;;  %v6833_v23 = vld [vmem:[#allocation8 + $0x4] ss:$8 sps:$4 sm:$0xff]   ;;  %v6804_v24 = vld [vmem:[#allocation7 + $0x710] ss:$56 sps:$4 sm:$0xff]  }
 0x1e0   :  { %2881 = vmatmul.mubr.bf16.gmra.mrb[32].mxu1 %v7628_v31 }
 0x1e1   :  { %2949 = vmatpush1.bf16.msra.mxu1 %v6720_v25  ;;  %2976 = vmatprep.mubr.bf16.mxu1 %v7618_v13  ;;  %v6809_v25 = vld [vmem:[#allocation7 + $0x784] ss:$56 sps:$4 sm:$0xff]  }
 0x1e2   :  { %3283 = vmatpush1.bf16.msra.mxu0 %v6723_v26  ;;  %2950 = vmatprep.subr.bf16.mxu1 %v6728_v27  ;;  %v6831_v26 = vld [vmem:[#allocation8] ss:$8 sps:$4 sm:$0xff]   ;;  %v6839_v27 = vld [vmem:[#allocation8 + $0x14] ss:$8 sps:$4 sm:$0xff]  }
 0x1e3   :  { %3284 = vmatprep.subr.bf16.mxu0 %v6731_v28  ;;  %v6807_v28 = vld [vmem:[#allocation7 + $0x780] ss:$56 sps:$4 sm:$0xff]  }
 0x1e5   :  { %2951 = vmatpush1.bf16.msra.mxu1 %v6726_v29  ;;  %v6812_v29 = vld [vmem:[#allocation7 + $0x7f4] ss:$56 sps:$4 sm:$0xff]  }
 0x1e6   :  { %3285 = vmatpush1.bf16.msra.mxu0 %v6729_v30  ;;  %2952 = vmatprep.subr.bf16.mxu1 %v6734_v33  ;;  %v6837_v30 = vld [vmem:[#allocation8 + $0x10] ss:$8 sps:$4 sm:$0xff]   ;;  %v6845_v33 = vld [vmem:[#allocation8 + $0x24] ss:$8 sps:$4 sm:$0xff]  }
 0x1e7   :  { %3286 = vmatprep.subr.bf16.mxu0 %v6737_v34  ;;  %v6810_v34 = vld [vmem:[#allocation7 + $0x7f0] ss:$56 sps:$4 sm:$0xff]  }
 0x1e9   :  { %2953 = vmatpush1.bf16.msra.mxu1 %v6732_v35  ;;  %v6815_v35 = vld [vmem:[#allocation7 + $0x864] ss:$56 sps:$4 sm:$0xff]  }
 0x1ea   :  { %3287 = vmatpush1.bf16.msra.mxu0 %v6735_v36  ;;  %2954 = vmatprep.subr.bf16.mxu1 %v6740_v37  ;;  %v6843_v36 = vld [vmem:[#allocation8 + $0x20] ss:$8 sps:$4 sm:$0xff]   ;;  %v6851_v37 = vld [vmem:[#allocation8 + $0x34] ss:$8 sps:$4 sm:$0xff]  }
 0x1eb   :  { %3288 = vmatprep.subr.bf16.mxu0 %v6743_v38  ;;  %v6813_v38 = vld [vmem:[#allocation7 + $0x860] ss:$56 sps:$4 sm:$0xff]  }
 0x1ed   :  { %2955 = vmatpush1.bf16.msra.mxu1 %v6738_v39  ;;  %v6818_v39 = vld [vmem:[#allocation7 + $0x8d4] ss:$56 sps:$4 sm:$0xff]  }
 0x1ee   :  { %3289 = vmatpush1.bf16.msra.mxu0 %v6741_v40  ;;  %2956 = vmatprep.subr.bf16.mxu1 %v6746_v41  ;;  %v6849_v40 = vld [vmem:[#allocation8 + $0x30] ss:$8 sps:$4 sm:$0xff]   ;;  %v6857_v41 = vld [vmem:[#allocation8 + $0x44] ss:$8 sps:$4 sm:$0xff]  }
 0x1ef   :  { %3290 = vmatprep.subr.bf16.mxu0 %v6749_v42  ;;  %v6816_v42 = vld [vmem:[#allocation7 + $0x8d0] ss:$56 sps:$4 sm:$0xff]  }
 0x1f1   :  { %2957 = vmatpush1.bf16.msra.mxu1 %v6744_v43  ;;  %v6821_v43 = vld [vmem:[#allocation7 + $0x944] ss:$56 sps:$4 sm:$0xff]  }
 0x1f2   :  { %3291 = vmatpush1.bf16.msra.mxu0 %v6747_v44  ;;  %2958 = vmatprep.subr.bf16.mxu1 %v6752_v45  ;;  %v6855_v44 = vld [vmem:[#allocation8 + $0x40] ss:$8 sps:$4 sm:$0xff]   ;;  %v6863_v45 = vld [vmem:[#allocation8 + $0x54] ss:$8 sps:$4 sm:$0xff]  }
 0x1f3   :  { %3292 = vmatprep.subr.bf16.mxu0 %v6755_v46  ;;  %v6819_v46 = vld [vmem:[#allocation7 + $0x940] ss:$56 sps:$4 sm:$0xff]  }
 0x1f5   :  { %2959 = vmatpush1.bf16.msra.mxu1 %v6750_v47  ;;  %v6824_v47 = vld [vmem:[#allocation7 + $0x9b4] ss:$56 sps:$4 sm:$0xff]  }
 0x1f6   :  { %3293 = vmatpush1.bf16.msra.mxu0 %v6753_v48  ;;  %2960 = vmatprep.subr.bf16.mxu1 %v6758_v49  ;;  %v6861_v48 = vld [vmem:[#allocation8 + $0x50] ss:$8 sps:$4 sm:$0xff]   ;;  %v6869_v49 = vld [vmem:[#allocation8 + $0x64] ss:$8 sps:$4 sm:$0xff]  }
 0x1f7   :  { %3315 = vmatprep.subr.bf16.mxu0 %v6761_v50  ;;  %v6822_v50 = vld [vmem:[#allocation7 + $0x9b0] ss:$56 sps:$4 sm:$0xff]  }
 0x1f9   :  { %3295 = vmatmul.mubr.bf16.vlgmr.msra.gmra.mrb[24].mxu0 %v7616_v12  ;;  %2961 = vmatpush1.bf16.msra.mxu1 %v6756_v51  ;;  %v6827_v51 = vld [vmem:[#allocation7 + $0xa24] ss:$56 sps:$4 sm:$0xff]  }
 0x1fa   :  { %3304 = vmatprep.mubr.bf16.mxu0 %v7630_v32  ;;  %3316 = vmatpush1.bf16.msra.mxu0 %v6759_v52  ;;  %v6867_v52 = vld [vmem:[#allocation8 + $0x60] ss:$8 sps:$4 sm:$0xff]  }
 0x1fb   :  { %2962 = vmatprep.subr.bf16.mxu1 %v6764_v53  ;;  %3317 = vmatprep.subr.bf16.mxu0 %v6767_v54  ;;  %v6875_v53 = vld [vmem:[#allocation8 + $0x74] ss:$8 sps:$4 sm:$0xff]   ;;  %v6825_v54 = vld [vmem:[#allocation7 + $0xa20] ss:$56 sps:$4 sm:$0xff]  }
 0x1fd   :  { %2963 = vmatpush1.bf16.msra.mxu1 %v6762_v55  ;;  %v6830_v55 = vld [vmem:[#allocation7 + $0x1c] ss:$56 sps:$4 sm:$0xff]  }
 0x1fe   :  { %3318 = vmatpush1.bf16.msra.mxu0 %v6765_v56  ;;  %2964 = vmatprep.subr.bf16.mxu1 %v6770_v57  ;;  %v6873_v56 = vld [vmem:[#allocation8 + $0x70] ss:$8 sps:$4 sm:$0xff]   ;;  %v6881_v57 = vld [vmem:[#allocation8 + $0x84] ss:$8 sps:$4 sm:$0xff]  }
 0x1ff   :  { %3319 = vmatprep.subr.bf16.mxu0 %v6773_v58  ;;  %v6828_v58 = vld [vmem:[#allocation7 + $0x18] ss:$56 sps:$4 sm:$0xff]  }
 0x201   :  { %3305 = vmatmul.mubr.bf16.gmra.mrb[28].mxu0 %v7628_v31  ;;  %2965 = vmatpush1.bf16.msra.mxu1 %v6768_v59  ;;  %v6836_v59 = vld [vmem:[#allocation7 + $0x8c] ss:$56 sps:$4 sm:$0xff]  }
 0x202   :  { %3320 = vmatpush1.bf16.msra.mxu0 %v6771_v61  ;;  %2966 = vmatprep.subr.bf16.mxu1 %v6776_v63  ;;  %v6879_v61 = vld [vmem:[#allocation8 + $0x80] ss:$8 sps:$4 sm:$0xff]   ;;  %v6887_v63 = vld [vmem:[#allocation8 + $0x94] ss:$8 sps:$4 sm:$0xff]  }
 0x203   :  { %3321 = vmatprep.subr.bf16.mxu0 %v6779_v1  ;;  %3347 = vmatprep.mubr.bf16.mxu0 %v7484_v0  ;;  %v6834_v1 = vld [vmem:[#allocation7 + $0x88] ss:$56 sps:$4 sm:$0xff]  }
 0x205   :  { %2967 = vmatpush1.bf16.msra.mxu1 %v6774_v2  ;;  %v6842_v2 = vld [vmem:[#allocation7 + $0xfc] ss:$56 sps:$4 sm:$0xff]  }
 0x206   :  { %3322 = vmatpush1.bf16.msra.mxu0 %v6777_v3  ;;  %2968 = vmatprep.subr.bf16.mxu1 %v6782_v5  ;;  %v6885_v3 = vld [vmem:[#allocation8 + $0x90] ss:$8 sps:$4 sm:$0xff]   ;;  %v6893_v5 = vld [vmem:[#allocation8 + $0xa4] ss:$8 sps:$4 sm:$0xff]  }
 0x207   :  { %3323 = vmatprep.subr.bf16.mxu0 %v6785_v6  ;;  %v6840_v6 = vld [vmem:[#allocation7 + $0xf8] ss:$56 sps:$4 sm:$0xff]  }
 0x209   :  { %2969 = vmatpush1.bf16.msra.mxu1 %v6780_v7  ;;  %v6848_v7 = vld [vmem:[#allocation7 + $0x16c] ss:$56 sps:$4 sm:$0xff]  }
 0x20a   :  { %3324 = vmatpush1.bf16.msra.mxu0 %v6783_v8  ;;  %2970 = vmatprep.subr.bf16.mxu1 %v6788_v10  ;;  %v6891_v8 = vld [vmem:[#allocation8 + $0xa0] ss:$8 sps:$4 sm:$0xff]   ;;  %v6899_v10 = vld [vmem:[#allocation8 + $0xb4] ss:$8 sps:$4 sm:$0xff]  }
 0x20b   :  { %3325 = vmatprep.subr.bf16.mxu0 %v6791_v11  ;;  %v6846_v11 = vld [vmem:[#allocation7 + $0x168] ss:$56 sps:$4 sm:$0xff]  }
 0x20d   :  { %2971 = vmatpush1.bf16.msra.mxu1 %v6786_v4  ;;  %v6854_v4 = vld [vmem:[#allocation7 + $0x1dc] ss:$56 sps:$4 sm:$0xff]  }
 0x20e   :  { %3326 = vmatpush1.bf16.msra.mxu0 %v6789_v15  ;;  %2972 = vmatprep.subr.bf16.mxu1 %v6794_v60  ;;  %v6897_v15 = vld [vmem:[#allocation8 + $0xb0] ss:$8 sps:$4 sm:$0xff]   ;;  %v6905_v60 = vld [vmem:[#allocation8 + $0xc4] ss:$8 sps:$4 sm:$0xff]  }
 0x20f   :  { %3327 = vmatprep.subr.bf16.mxu0 %v6797_v16  ;;  %v6852_v16 = vld [vmem:[#allocation7 + $0x1d8] ss:$56 sps:$4 sm:$0xff]  }
 0x211   :  { %2973 = vmatpush1.bf16.msra.mxu1 %v6792_v62  ;;  %v6860_v62 = vld [vmem:[#allocation7 + $0x24c] ss:$56 sps:$4 sm:$0xff]  }
 0x212   :  { %3328 = vmatpush1.bf16.msra.mxu0 %v6795_v17  ;;  %2974 = vmatprep.subr.bf16.mxu1 %v6800_v18  ;;  %v6903_v17 = vld [vmem:[#allocation8 + $0xc0] ss:$8 sps:$4 sm:$0xff]   ;;  %v6911_v18 = vld [vmem:[#allocation8 + $0xd4] ss:$8 sps:$4 sm:$0xff]  }
 0x213   :  { %3329 = vmatprep.subr.bf16.mxu0 %v6803_v19  ;;  %v6858_v19 = vld [vmem:[#allocation7 + $0x248] ss:$56 sps:$4 sm:$0xff]  }
 0x215   :  { %2975 = vmatpush1.bf16.msra.mxu1 %v6798_v20  ;;  %v6866_v20 = vld [vmem:[#allocation7 + $0x2bc] ss:$56 sps:$4 sm:$0xff]  }
 0x216   :  { %3330 = vmatpush1.bf16.msra.mxu0 %v6801_v21  ;;  %2997 = vmatprep.subr.bf16.mxu1 %v6806_v22  ;;  %v6909_v21 = vld [vmem:[#allocation8 + $0xd0] ss:$8 sps:$4 sm:$0xff]   ;;  %v6917_v22 = vld [vmem:[#allocation8 + $0xe4] ss:$8 sps:$4 sm:$0xff]  }
 0x217   :  { %5182 = vmatprep.subr.bf16.mxu0 %v6833_v23  ;;  %v6864_v23 = vld [vmem:[#allocation7 + $0x2b8] ss:$56 sps:$4 sm:$0xff]  }
 0x218   :  { %2977 = vmatmul.mubr.bf16.vlgmr.msra.gmra.mrb[36].mxu1 %v7616_v12 }
 0x219   :  { %3348 = vmatmul.mubr.bf16.vlgmr.msra.gmra.mrb[24].mxu0 %v7641_v14  ;;  %2986 = vmatprep.mubr.bf16.mxu1 %v7630_v32 }
 0x21a   :  { %2998 = vmatpush1.bf16.msra.mxu1 %v6804_v24  ;;  %3357 = vmatprep.mubr.bf16.mxu0 %v7484_v0  ;;  %v6872_v24 = vld [vmem:[#allocation7 + $0x32c] ss:$56 sps:$4 sm:$0xff]  }
 0x21b   :  { %2999 = vmatprep.subr.bf16.mxu1 %v6809_v25  ;;  %5183 = vmatpush1.bf16.msra.mxu0 %v6831_v26  ;;  %v6915_v25 = vld [vmem:[#allocation8 + $0xe0] ss:$8 sps:$4 sm:$0xff]   ;;  %v6923_v26 = vld [vmem:[#allocation8 + $0xf4] ss:$8 sps:$4 sm:$0xff]  }
 0x21c   :  { %5184 = vmatprep.subr.bf16.mxu0 %v6839_v27  ;;  %v6870_v27 = vld [vmem:[#allocation7 + $0x328] ss:$56 sps:$4 sm:$0xff]  }
 0x21e   :  { %3000 = vmatpush1.bf16.msra.mxu1 %v6807_v28  ;;  %v6878_v28 = vld [vmem:[#allocation7 + $0x39c] ss:$56 sps:$4 sm:$0xff]  }
 0x21f   :  { %3001 = vmatprep.subr.bf16.mxu1 %v6812_v29  ;;  %5185 = vmatpush1.bf16.msra.mxu0 %v6837_v30  ;;  %v6921_v29 = vld [vmem:[#allocation8 + $0xf0] ss:$8 sps:$4 sm:$0xff]   ;;  %v6929_v30 = vld [vmem:[#allocation8 + $0x104] ss:$8 sps:$4 sm:$0xff]  }
 0x220   :  { %2987 = vmatmul.mubr.bf16.gmra.mrb[40].mxu1 %v7628_v31  ;;  %5186 = vmatprep.subr.bf16.mxu0 %v6845_v33  ;;  %v6876_v33 = vld [vmem:[#allocation7 + $0x398] ss:$56 sps:$4 sm:$0xff]  }
 0x221   :  { %3358 = vmatmul.mubr.bf16.gmra.mrb[28].mxu0 %v7639_v9  ;;  %3029 = vmatprep.mubr.bf16.mxu1 %v7484_v0 }
 0x222   :  { %3002 = vmatpush1.bf16.msra.mxu1 %v6810_v34  ;;  %v6884_v34 = vld [vmem:[#allocation7 + $0x40c] ss:$56 sps:$4 sm:$0xff]  }
 0x223   :  { %3003 = vmatprep.subr.bf16.mxu1 %v6815_v35  ;;  %5187 = vmatpush1.bf16.msra.mxu0 %v6843_v36  ;;  %v6882_v35 = vld [vmem:[#allocation7 + $0x408] ss:$56 sps:$4 sm:$0xff]   ;;  %v6890_v36 = vld [vmem:[#allocation7 + $0x47c] ss:$56 sps:$4 sm:$0xff]  }
 0x224   :  { %5188 = vmatprep.subr.bf16.mxu0 %v6851_v37  ;;  %v6888_v37 = vld [vmem:[#allocation7 + $0x478] ss:$56 sps:$4 sm:$0xff]  }
 0x226   :  { %3004 = vmatpush1.bf16.msra.mxu1 %v6813_v38  ;;  %v6896_v38 = vld [vmem:[#allocation7 + $0x4ec] ss:$56 sps:$4 sm:$0xff]  }
 0x227   :  { %3005 = vmatprep.subr.bf16.mxu1 %v6818_v39  ;;  %5189 = vmatpush1.bf16.msra.mxu0 %v6849_v40  ;;  %v6894_v39 = vld [vmem:[#allocation7 + $0x4e8] ss:$56 sps:$4 sm:$0xff]   ;;  %v6902_v40 = vld [vmem:[#allocation7 + $0x55c] ss:$56 sps:$4 sm:$0xff]  }
 0x228   :  { %5190 = vmatprep.subr.bf16.mxu0 %v6857_v41  ;;  %v6900_v41 = vld [vmem:[#allocation7 + $0x558] ss:$56 sps:$4 sm:$0xff]  }
 0x22a   :  { %3006 = vmatpush1.bf16.msra.mxu1 %v6816_v42  ;;  %v6908_v42 = vld [vmem:[#allocation7 + $0x5cc] ss:$56 sps:$4 sm:$0xff]  }
 0x22b   :  { %3007 = vmatprep.subr.bf16.mxu1 %v6821_v43  ;;  %5191 = vmatpush1.bf16.msra.mxu0 %v6855_v44  ;;  %v6906_v43 = vld [vmem:[#allocation7 + $0x5c8] ss:$56 sps:$4 sm:$0xff]  }
 0x22c   :  { %5192 = vmatprep.subr.bf16.mxu0 %v6863_v45 }
 0x22e   :  { %3008 = vmatpush1.bf16.msra.mxu1 %v6819_v46  ;;  %v6914_v46 = vld [vmem:[#allocation7 + $0x63c] ss:$56 sps:$4 sm:$0xff]  }
 0x22f   :  { %3009 = vmatprep.subr.bf16.mxu1 %v6824_v47  ;;  %5193 = vmatpush1.bf16.msra.mxu0 %v6861_v48 }
 0x230   :  { %5194 = vmatprep.subr.bf16.mxu0 %v6869_v49 }
 0x232   :  { %3010 = vmatpush1.bf16.msra.mxu1 %v6822_v50  ;;  %v6912_v50 = vld [vmem:[#allocation7 + $0x638] ss:$56 sps:$4 sm:$0xff]  }
 0x233   :  { %3011 = vmatprep.subr.bf16.mxu1 %v6827_v51  ;;  %5195 = vmatpush1.bf16.msra.mxu0 %v6867_v52 }
 0x234   :  { %5196 = vmatprep.subr.bf16.mxu0 %v6875_v53 }
 0x236   :  { %3012 = vmatpush1.bf16.msra.mxu1 %v6825_v54  ;;  %v6920_v54 = vld [vmem:[#allocation7 + $0x6ac] ss:$56 sps:$4 sm:$0xff]  }
 0x237   :  { %3050 = vmatprep.subr.bf16.mxu1 %v6830_v55  ;;  %5197 = vmatpush1.bf16.msra.mxu0 %v6873_v56 }
 0x238   :  { %5198 = vmatprep.subr.bf16.mxu0 %v6881_v57 }
 0x239   :  { %3030 = vmatmul.mubr.bf16.vlgmr.msra.gmra.mrb[36].mxu1 %v7641_v14 }
 0x23a   :  { %3051 = vmatpush1.bf16.msra.mxu1 %v6828_v58  ;;  %3039 = vmatprep.mubr.bf16.mxu1 %v7484_v0 }
 0x23b   :  { %3052 = vmatprep.subr.bf16.mxu1 %v6836_v59  ;;  %5199 = vmatpush1.bf16.msra.mxu0 %v6879_v61 }
 0x23c   :  { %5200 = vmatprep.subr.bf16.mxu0 %v6887_v63 }
 0x23e   :  { %3053 = vmatpush1.bf16.msra.mxu1 %v6834_v1 }
 0x23f   :  { %3054 = vmatprep.subr.bf16.mxu1 %v6842_v2  ;;  %5201 = vmatpush1.bf16.msra.mxu0 %v6885_v3 }
 0x240   :  { %5202 = vmatprep.subr.bf16.mxu0 %v6893_v5 }
 0x241   :  { %3040 = vmatmul.mubr.bf16.gmra.mrb[40].mxu1 %v7639_v9 }
 0x242   :  { %3055 = vmatpush1.bf16.msra.mxu1 %v6840_v6  ;;  %3082 = vmatprep.mubr.bf16.mxu1 %v7618_v13 }
 0x243   :  { %3056 = vmatprep.subr.bf16.mxu1 %v6848_v7  ;;  %5203 = vmatpush1.bf16.msra.mxu0 %v6891_v8  ;;  %v6918_v7 = vld [vmem:[#allocation7 + $0x6a8] ss:$56 sps:$4 sm:$0xff]   ;;  %v6926_v8 = vld [vmem:[#allocation7 + $0x24] ss:$56 sps:$4 sm:$0xff]  }
 0x244   :  { %5204 = vmatprep.subr.bf16.mxu0 %v6899_v10 }
 0x246   :  { %3057 = vmatpush1.bf16.msra.mxu1 %v6846_v11 }
 0x247   :  { %3058 = vmatprep.subr.bf16.mxu1 %v6854_v4  ;;  %5205 = vmatpush1.bf16.msra.mxu0 %v6897_v15 }
 0x248   :  { %5206 = vmatprep.subr.bf16.mxu0 %v6905_v60 }
 0x24a   :  { %3059 = vmatpush1.bf16.msra.mxu1 %v6852_v16 }
 0x24b   :  { %3060 = vmatprep.subr.bf16.mxu1 %v6860_v62  ;;  %5207 = vmatpush1.bf16.msra.mxu0 %v6903_v17 }
 0x24c   :  { %5208 = vmatprep.subr.bf16.mxu0 %v6911_v18 }
 0x24e   :  { %3061 = vmatpush1.bf16.msra.mxu1 %v6858_v19  ;;  %v6924_v19 = vld [vmem:[#allocation7 + $0x20] ss:$56 sps:$4 sm:$0xff]  }
 0x24f   :  { %3062 = vmatprep.subr.bf16.mxu1 %v6866_v20  ;;  %5209 = vmatpush1.bf16.msra.mxu0 %v6909_v21 }
 0x250   :  { %5210 = vmatprep.subr.bf16.mxu0 %v6917_v22 }
 0x252   :  { %3063 = vmatpush1.bf16.msra.mxu1 %v6864_v23 }
 0x253   :  { %3064 = vmatprep.subr.bf16.mxu1 %v6872_v24  ;;  %5211 = vmatpush1.bf16.msra.mxu0 %v6915_v25  ;;  %v6927_v24 = vld [vmem:[#allocation8 + $0x100] ss:$8 sps:$4 sm:$0xff]   ;;  %v6932_v25 = vld [vmem:[#allocation7 + $0x94] ss:$56 sps:$4 sm:$0xff]  }
 0x254   :  { %5212 = vmatprep.subr.bf16.mxu0 %v6923_v26 }
 0x256   :  { %3065 = vmatpush1.bf16.msra.mxu1 %v6870_v27 }
 0x257   :  { %3066 = vmatprep.subr.bf16.mxu1 %v6878_v28  ;;  %5213 = vmatpush1.bf16.msra.mxu0 %v6921_v29 }
 0x258   :  { %5235 = vmatprep.subr.bf16.mxu0 %v6929_v30 }
 0x25a   :  { %3067 = vmatpush1.bf16.msra.mxu1 %v6876_v33 }
 0x25b   :  { %3068 = vmatprep.subr.bf16.mxu1 %v6884_v34 }
 0x25e   :  { %3069 = vmatpush1.bf16.msra.mxu1 %v6882_v35 }
 0x25f   :  { %3070 = vmatprep.subr.bf16.mxu1 %v6890_v36 }
 0x262   :  { %3071 = vmatpush1.bf16.msra.mxu1 %v6888_v37 }
 0x263   :  { %3072 = vmatprep.subr.bf16.mxu1 %v6896_v38  ;;  %v6935_v38 = vld [vmem:[#allocation8 + $0x114] ss:$8 sps:$4 sm:$0xff]  }
 0x266   :  { %3073 = vmatpush1.bf16.msra.mxu1 %v6894_v39 }
 0x267   :  { %3074 = vmatprep.subr.bf16.mxu1 %v6902_v40 }
 0x26a   :  { %3075 = vmatpush1.bf16.msra.mxu1 %v6900_v41 }
 0x26b   :  { %v2819_v44 = vpop.f32.mrb[20].mxu1  ;;  %v7674_v45 = vpop.f32.mrb[8].mxu0  ;;  %3076 = vmatprep.subr.bf16.mxu1 %v6908_v42  ;;  %v6930_v42 = vld [vmem:[#allocation7 + $0x90] ss:$56 sps:$4 sm:$0xff]  }
 0x26c   :  { %vm3474_vm1 = vcmp.ge.f32.partialorder %v2819_v44, 0.0  ;;  %v3530_v47 = vmul.f32 0.2, %v2819_v44  ;;  %v2821_v48 = vpop.f32.mrb[21].mxu1  ;;  %v7676_v49 = vpop.f32.mrb[9].mxu0 }
 0x26d   :  { %vm3475_vm2 = vcmp.ge.f32.partialorder %v2821_v48, 0.0  ;;  %v3531_v51 = vmul.f32 0.2, %v2821_v48  ;;  %v2823_v52 = vpop.f32.mrb[22].mxu1  ;;  %v7678_v53 = vpop.f32.mrb[10].mxu0 }
 0x26e   :  { %v3586_v55 = vsel %vm3474_vm1, %v2819_v44, %v3530_v47  ;;  %3077 = vmatpush1.bf16.msra.mxu1 %v6906_v43  ;;  %vm3488_vm3 = vcmp.ge.f32.partialorder %v2823_v52, 0.0  ;;  %v3544_v56 = vmul.f32 0.2, %v2823_v52  ;;  %v2825_v57 = vpop.f32.mrb[23].mxu1  ;;  %v7680_v58 = vpop.f32.mrb[11].mxu0 }
 0x26f   :  { %v3642_v59 = vmul.f32 1.4142135, %v3586_v55  ;;  %v3587_v61 = vsel %vm3475_vm2, %v2821_v48, %v3531_v51  ;;  %vm3489_vm4 = vcmp.ge.f32.partialorder %v2825_v57, 0.0  ;;  %v3545_v63 = vmul.f32 0.2, %v2825_v57  ;;  %3078 = vmatprep.subr.bf16.mxu1 %v6914_v46 }
 0x270   :  { %v3643_v1 = vmul.f32 1.4142135, %v3587_v61  ;;  %v3600_v2 = vsel %vm3488_vm3, %v2823_v52, %v3544_v56  ;;  %v6933_v46 = vld [vmem:[#allocation8 + $0x110] ss:$8 sps:$4 sm:$0xff]   ;;  %v6938_v47 = vld [vmem:[#allocation7 + $0x104] ss:$56 sps:$4 sm:$0xff]  }
 0x271   :  { %v3656_v3 = vmul.f32 1.4142135, %v3600_v2  ;;  %v3601_v5 = vsel %vm3489_vm4, %v2825_v57, %v3545_v63  ;;  %v5980_v10 = vclamps-f32 %v3642_v59, 256.0  ;;  %v6941_v51 = vld [vmem:[#allocation8 + $0x124] ss:$8 sps:$4 sm:$0xff]  }
 0x272   :  { %v3657_v6 = vmul.f32 1.4142135, %v3601_v5  ;;  %3079 = vmatpush1.bf16.msra.mxu1 %v6912_v50  ;;  %v5981_v11 = vclamps-f32 %v3643_v1, 256.0  ;;  %v6939_v56 = vld [vmem:[#allocation8 + $0x120] ss:$8 sps:$4 sm:$0xff]  }
 0x273   :  { %v5994_v4 = vclamps-f32 %v3656_v3, 256.0  ;;  %v2829_v15 = vpop.f32.mrb[24].mxu1  ;;  %v7682_v60 = vpop.f32.mrb[12].mxu0  ;;  %3080 = vmatprep.subr.bf16.mxu1 %v6920_v54  ;;  %v6936_v54 = vld [vmem:[#allocation7 + $0x100] ss:$56 sps:$4 sm:$0xff]  }
 0x274   :  { %v5995_v16 = vclamps-f32 %v3657_v6, 256.0  ;;  %vm3502_vm5 = vcmp.ge.f32.partialorder %v2829_v15, 0.0  ;;  %v3558_v62 = vmul.f32 0.2, %v2829_v15  ;;  %v2831_v17 = vpop.f32.mrb[25].mxu1  ;;  %v7684_v18 = vpop.f32.mrb[13].mxu0 }
 0x275   :  { %v3810_v20 = vpack.c.bf16 %v5994_v4, %v5980_v10  ;;  %vm3503_vm6 = vcmp.ge.f32.partialorder %v2831_v17, 0.0  ;;  %v3559_v21 = vmul.f32 0.2, %v2831_v17  ;;  %v2833_v22 = vpop.f32.mrb[26].mxu1  ;;  %v7686_v23 = vpop.f32.mrb[14].mxu0 }
 0x276   :  { %v3614_v26 = vsel %vm3502_vm5, %v2829_v15, %v3558_v62  ;;  %3081 = vmatpush1.bf16.msra.mxu1 %v6918_v7  ;;  %vm3516_vm7 = vcmp.ge.f32.partialorder %v2833_v22, 0.0  ;;  %v3572_v27 = vmul.f32 0.2, %v2833_v22  ;;  %v2835_v28 = vpop.f32.mrb[27].mxu1  ;;  %v7688_v29 = vpop.f32.mrb[15].mxu0  ;;  %v3811_v30 = vpack.c.bf16 %v5995_v16, %v5981_v11 }
 0x277   :  { %v3670_v33 = vmul.f32 1.4142135, %v3614_v26  ;;  %v3615_v34 = vsel %vm3503_vm6, %v2831_v17, %v3559_v21  ;;  %vm3517_vm8 = vcmp.ge.f32.partialorder %v2835_v28, 0.0  ;;  %v3573_v35 = vmul.f32 0.2, %v2835_v28  ;;  %3156 = vmatprep.subr.bf16.mxu1 %v6926_v8 }
 0x278   :  { %v3671_v36 = vmul.f32 1.4142135, %v3615_v34  ;;  %v3628_v37 = vsel %vm3516_vm7, %v2833_v22, %v3572_v27  ;;  %5214 = vmatprep.mubr.bf16.mxu0 %v3811_v30  ;;  %v6944_v57 = vld [vmem:[#allocation7 + $0x174] ss:$56 sps:$4 sm:$0xff]   ;;  %v6942_v61 = vld [vmem:[#allocation7 + $0x170] ss:$56 sps:$4 sm:$0xff]  }
 0x279   :  { %v3684_v39 = vmul.f32 1.4142135, %v3628_v37  ;;  %v3629_v40 = vsel %vm3517_vm8, %v2835_v28, %v3573_v35  ;;  %3083 = vmatmul.mubr.bf16.vlgmr.msra.gmra.mrb[44].mxu1 %v7616_v12  ;;  %5215 = vmatmul.mubr.bf16.vlgmr.msra.gmra.mrb[32].mxu0 %v3810_v20  ;;  %v6008_v43 = vclamps-f32 %v3670_v33, 256.0  ;;  %v6947_v59 = vld [vmem:[#allocation8 + $0x134] ss:$8 sps:$4 sm:$0xff]  }
 0x27a   :  { %v3685_v41 = vmul.f32 1.4142135, %v3629_v40  ;;  %3092 = vmatprep.mubr.bf16.mxu1 %v7630_v32  ;;  %3157 = vmatpush1.bf16.msra.mxu1 %v6924_v19  ;;  %v6009_v48 = vclamps-f32 %v3671_v36, 256.0  ;;  %v6945_v63 = vld [vmem:[#allocation8 + $0x130] ss:$8 sps:$4 sm:$0xff]  }
 0x27b   :  { %v6022_v44 = vclamps-f32 %v3684_v39, 256.0  ;;  %3158 = vmatprep.subr.bf16.mxu1 %v6932_v25  ;;  %5236 = vmatpush1.bf16.msra.mxu0 %v6927_v24  ;;  %v6950_v1 = vld [vmem:[#allocation7 + $0x1e4] ss:$56 sps:$4 sm:$0xff]   ;;  %v6948_v3 = vld [vmem:[#allocation7 + $0x1e0] ss:$56 sps:$4 sm:$0xff]  }
 0x27c   :  { %v6023_v50 = vclamps-f32 %v3685_v41, 256.0  ;;  %5237 = vmatprep.subr.bf16.mxu0 %v6935_v38  ;;  %v6953_v2 = vld [vmem:[#allocation8 + $0x144] ss:$8 sps:$4 sm:$0xff]   ;;  %v6951_v5 = vld [vmem:[#allocation8 + $0x140] ss:$8 sps:$4 sm:$0xff]  }
 0x27d   :  { %v3824_v52 = vpack.c.bf16 %v6022_v44, %v6008_v43  ;;  %v6956_v6 = vld [vmem:[#allocation7 + $0x254] ss:$56 sps:$4 sm:$0xff]   ;;  %v6954_v8 = vld [vmem:[#allocation7 + $0x250] ss:$56 sps:$4 sm:$0xff]   ;;  %v6962_v4 = vld [vmem:[#allocation7 + $0x2c4] ss:$56 sps:$4 sm:$0xff]  }
 0x27e   :  { %3159 = vmatpush1.bf16.msra.mxu1 %v6930_v42  ;;  %v3825_v55 = vpack.c.bf16 %v6023_v50, %v6009_v48  ;;  %v6959_v7 = vld [vmem:[#allocation8 + $0x154] ss:$8 sps:$4 sm:$0xff]   ;;  %v6957_v11 = vld [vmem:[#allocation8 + $0x150] ss:$8 sps:$4 sm:$0xff]   ;;  %v6965_v16 = vld [vmem:[#allocation8 + $0x164] ss:$8 sps:$4 sm:$0xff]  }
 0x27f   :  { %3160 = vmatprep.subr.bf16.mxu1 %v6938_v47  ;;  %5238 = vmatpush1.bf16.msra.mxu0 %v6933_v46  ;;  %v6960_v19 = vld [vmem:[#allocation7 + $0x2c0] ss:$56 sps:$4 sm:$0xff]   ;;  %v6968_v21 = vld [vmem:[#allocation7 + $0x334] ss:$56 sps:$4 sm:$0xff]   ;;  %v6966_v24 = vld [vmem:[#allocation7 + $0x330] ss:$56 sps:$4 sm:$0xff]  }
 0x280   :  { %5224 = vmatprep.mubr.bf16.mxu0 %v3825_v55  ;;  %5239 = vmatprep.subr.bf16.mxu0 %v6941_v51  ;;  %v6963_v20 = vld [vmem:[#allocation8 + $0x160] ss:$8 sps:$4 sm:$0xff]   ;;  %v6971_v22 = vld [vmem:[#allocation8 + $0x174] ss:$8 sps:$4 sm:$0xff]   ;;  %v6969_v26 = vld [vmem:[#allocation8 + $0x170] ss:$8 sps:$4 sm:$0xff]  }
 0x281   :  { %3093 = vmatmul.mubr.bf16.gmra.mrb[48].mxu1 %v7628_v31  ;;  %5225 = vmatmul.mubr.bf16.gmra.mrb[36].mxu0 %v3824_v52  ;;  %v6974_v27 = vld [vmem:[#allocation7 + $0x3a4] ss:$56 sps:$4 sm:$0xff]   ;;  %v6972_v35 = vld [vmem:[#allocation7 + $0x3a0] ss:$56 sps:$4 sm:$0xff]   ;;  %v6980_v37 = vld [vmem:[#allocation7 + $0x414] ss:$56 sps:$4 sm:$0xff]  }
 0x282   :  { %3161 = vmatpush1.bf16.msra.mxu1 %v6936_v54  ;;  %3188 = vmatprep.mubr.bf16.mxu1 %v7618_v13  ;;  %v6977_v30 = vld [vmem:[#allocation8 + $0x184] ss:$8 sps:$4 sm:$0xff]   ;;  %v6975_v36 = vld [vmem:[#allocation8 + $0x180] ss:$8 sps:$4 sm:$0xff]   ;;  %v6983_v38 = vld [vmem:[#allocation8 + $0x194] ss:$8 sps:$4 sm:$0xff]  }
 0x283   :  { %3162 = vmatprep.subr.bf16.mxu1 %v6944_v57  ;;  %5240 = vmatpush1.bf16.msra.mxu0 %v6939_v56  ;;  %v6978_v39 = vld [vmem:[#allocation7 + $0x410] ss:$56 sps:$4 sm:$0xff]   ;;  %v6986_v41 = vld [vmem:[#allocation7 + $0x484] ss:$56 sps:$4 sm:$0xff]   ;;  %v6984_v43 = vld [vmem:[#allocation7 + $0x480] ss:$56 sps:$4 sm:$0xff]  }
 0x284   :  { %5241 = vmatprep.subr.bf16.mxu0 %v6947_v59  ;;  %v6981_v40 = vld [vmem:[#allocation8 + $0x190] ss:$8 sps:$4 sm:$0xff]   ;;  %v6989_v42 = vld [vmem:[#allocation8 + $0x1a4] ss:$8 sps:$4 sm:$0xff]   ;;  %v6987_v44 = vld [vmem:[#allocation8 + $0x1a0] ss:$8 sps:$4 sm:$0xff]  }
 0x285   :  { %v6992_v46 = vld [vmem:[#allocation7 + $0x4f4] ss:$56 sps:$4 sm:$0xff]   ;;  %v6990_v48 = vld [vmem:[#allocation7 + $0x4f0] ss:$56 sps:$4 sm:$0xff]   ;;  %v6998_v51 = vld [vmem:[#allocation7 + $0x564] ss:$56 sps:$4 sm:$0xff]  }
 0x286   :  { %3163 = vmatpush1.bf16.msra.mxu1 %v6942_v61  ;;  %v6995_v47 = vld [vmem:[#allocation8 + $0x1b4] ss:$8 sps:$4 sm:$0xff]   ;;  %v6993_v50 = vld [vmem:[#allocation8 + $0x1b0] ss:$8 sps:$4 sm:$0xff]   ;;  %v7001_v52 = vld [vmem:[#allocation8 + $0x1c4] ss:$8 sps:$4 sm:$0xff]  }
 0x287   :  { %3164 = vmatprep.subr.bf16.mxu1 %v6950_v1  ;;  %5242 = vmatpush1.bf16.msra.mxu0 %v6945_v63  ;;  %v6996_v54 = vld [vmem:[#allocation7 + $0x560] ss:$56 sps:$4 sm:$0xff]   ;;  %v7004_v56 = vld [vmem:[#allocation7 + $0x5d4] ss:$56 sps:$4 sm:$0xff]   ;;  %v7002_v59 = vld [vmem:[#allocation7 + $0x5d0] ss:$56 sps:$4 sm:$0xff]  }
 0x288   :  { %5243 = vmatprep.subr.bf16.mxu0 %v6953_v2  ;;  %v6999_v55 = vld [vmem:[#allocation8 + $0x1c0] ss:$8 sps:$4 sm:$0xff]   ;;  %v7007_v57 = vld [vmem:[#allocation8 + $0x1d4] ss:$8 sps:$4 sm:$0xff]   ;;  %v7005_v63 = vld [vmem:[#allocation8 + $0x1d0] ss:$8 sps:$4 sm:$0xff]  }
 0x289   :  { %v7010_v1 = vld [vmem:[#allocation7 + $0x644] ss:$56 sps:$4 sm:$0xff]  }
 0x28a   :  { %3165 = vmatpush1.bf16.msra.mxu1 %v6948_v3 }
 0x28b   :  { %v7694_v10 = vpop.f32.mrb[16].mxu0  ;;  %3166 = vmatprep.subr.bf16.mxu1 %v6956_v6  ;;  %5244 = vmatpush1.bf16.msra.mxu0 %v6951_v5  ;;  %v7013_v5 = vld [vmem:[#allocation8 + $0x1e4] ss:$8 sps:$4 sm:$0xff]  }
 0x28c   :  { %v7696_v15 = vpop.f32.mrb[17].mxu0  ;;  %5245 = vmatprep.subr.bf16.mxu0 %v6959_v7 }
 0x28d   :  { %v7698_v62 = vpop.f32.mrb[18].mxu0 }
 0x28e   :  { %3167 = vmatpush1.bf16.msra.mxu1 %v6954_v8  ;;  %v7700_v17 = vpop.f32.mrb[19].mxu0  ;;  %v7008_v8 = vld [vmem:[#allocation7 + $0x640] ss:$56 sps:$4 sm:$0xff]  }
 0x28f   :  { %3168 = vmatprep.subr.bf16.mxu1 %v6962_v4  ;;  %5246 = vmatpush1.bf16.msra.mxu0 %v6957_v11 }
 0x290   :  { %5247 = vmatprep.subr.bf16.mxu0 %v6965_v16 }
 0x292   :  { %3169 = vmatpush1.bf16.msra.mxu1 %v6960_v19  ;;  %v7011_v19 = vld [vmem:[#allocation8 + $0x1e0] ss:$8 sps:$4 sm:$0xff]  }
 0x293   :  { %v7702_v25 = vpop.f32.mrb[20].mxu0  ;;  %3170 = vmatprep.subr.bf16.mxu1 %v6968_v21  ;;  %5248 = vmatpush1.bf16.msra.mxu0 %v6963_v20 }
 0x294   :  { %v7704_v28 = vpop.f32.mrb[21].mxu0  ;;  %5249 = vmatprep.subr.bf16.mxu0 %v6971_v22 }
 0x295   :  { %v7706_v33 = vpop.f32.mrb[22].mxu0 }
 0x296   :  { %3171 = vmatpush1.bf16.msra.mxu1 %v6966_v24  ;;  %v7708_v34 = vpop.f32.mrb[23].mxu0 }
 0x297   :  { %3172 = vmatprep.subr.bf16.mxu1 %v6974_v27  ;;  %5250 = vmatpush1.bf16.msra.mxu0 %v6969_v26 }
 0x298   :  { %5251 = vmatprep.subr.bf16.mxu0 %v6977_v30 }
 0x29a   :  { %3173 = vmatpush1.bf16.msra.mxu1 %v6972_v35 }
 0x29b   :  { %3174 = vmatprep.subr.bf16.mxu1 %v6980_v37  ;;  %5252 = vmatpush1.bf16.msra.mxu0 %v6975_v36  ;;  %v7014_v36 = vld [vmem:[#allocation7 + $0x6b0] ss:$56 sps:$4 sm:$0xff]  }
 0x29c   :  { %5253 = vmatprep.subr.bf16.mxu0 %v6983_v38  ;;  %v7017_v37 = vld [vmem:[#allocation8 + $0x1f0] ss:$8 sps:$4 sm:$0xff]  }
 0x29e   :  { %3175 = vmatpush1.bf16.msra.mxu1 %v6978_v39 }
 0x29f   :  { %3176 = vmatprep.subr.bf16.mxu1 %v6986_v41  ;;  %5254 = vmatpush1.bf16.msra.mxu0 %v6981_v40  ;;  %v7022_v40 = vld [vmem:[#allocation7 + $0x724] ss:$56 sps:$4 sm:$0xff]  }
 0x2a0   :  { %5255 = vmatprep.subr.bf16.mxu0 %v6989_v42 }
 0x2a2   :  { %3177 = vmatpush1.bf16.msra.mxu1 %v6984_v43 }
 0x2a3   :  { %3178 = vmatprep.subr.bf16.mxu1 %v6992_v46  ;;  %5256 = vmatpush1.bf16.msra.mxu0 %v6987_v44  ;;  %v7049_v44 = vld [vmem:[#allocation8 + $0x204] ss:$8 sps:$4 sm:$0xff]  }
 0x2a4   :  { %5257 = vmatprep.subr.bf16.mxu0 %v6995_v47 }
 0x2a6   :  { %3179 = vmatpush1.bf16.msra.mxu1 %v6990_v48 }
 0x2a7   :  { %3180 = vmatprep.subr.bf16.mxu1 %v6998_v51  ;;  %5258 = vmatpush1.bf16.msra.mxu0 %v6993_v50 }
 0x2a8   :  { %5259 = vmatprep.subr.bf16.mxu0 %v7001_v52  ;;  %v7020_v52 = vld [vmem:[#allocation7 + $0x720] ss:$56 sps:$4 sm:$0xff]  }
 0x2aa   :  { %3181 = vmatpush1.bf16.msra.mxu1 %v6996_v54 }
 0x2ab   :  { %v2872_v61 = vpop.f32.mrb[28].mxu1  ;;  %3182 = vmatprep.subr.bf16.mxu1 %v7004_v56  ;;  %5260 = vmatpush1.bf16.msra.mxu0 %v6999_v55 }
 0x2ac   :  { %v2926_v2 = vadd.f32 %v7674_v45, %v2872_v61  ;;  %v2874_v3 = vpop.f32.mrb[29].mxu1  ;;  %5261 = vmatprep.subr.bf16.mxu0 %v7007_v57  ;;  %v7016_v45 = vld [vmem:[#allocation7 + $0x6b4] ss:$56 sps:$4 sm:$0xff]  }
 0x2ad   :  { %v2928_v6 = vadd.f32 %v7676_v49, %v2874_v3  ;;  %v2876_v7 = vpop.f32.mrb[30].mxu1  ;;  %v7019_v49 = vld [vmem:[#allocation8 + $0x1f4] ss:$8 sps:$4 sm:$0xff]   ;;  %v7047_v3 = vld [vmem:[#allocation8 + $0x200] ss:$8 sps:$4 sm:$0xff]  }
 0x2ae   :  { %vm3476_vm9 = vcmp.ge.f32.partialorder %v2926_v2, 0.0  ;;  %v3532_v11 = vmul.f32 0.2, %v2926_v2  ;;  %v2930_v4 = vadd.f32 %v7678_v53, %v2876_v7  ;;  %3183 = vmatpush1.bf16.msra.mxu1 %v7002_v59  ;;  %v2878_v16 = vpop.f32.mrb[31].mxu1 }
 0x2af   :  { %vm3477_vm10 = vcmp.ge.f32.partialorder %v2928_v6, 0.0  ;;  %v3533_v20 = vmul.f32 0.2, %v2928_v6  ;;  %v2932_v21 = vadd.f32 %v7680_v58, %v2878_v16  ;;  %3184 = vmatprep.subr.bf16.mxu1 %v7010_v1  ;;  %5262 = vmatpush1.bf16.msra.mxu0 %v7005_v63  ;;  %v7025_v63 = vld [vmem:[#allocation7 + $0x794] ss:$56 sps:$4 sm:$0xff]  }
 0x2b0   :  { %v3588_v22 = vsel %vm3476_vm9, %v2926_v2, %v3532_v11  ;;  %vm3490_vm11 = vcmp.ge.f32.partialorder %v2930_v4, 0.0  ;;  %v3546_v24 = vmul.f32 0.2, %v2930_v4  ;;  %5263 = vmatprep.subr.bf16.mxu0 %v7013_v5  ;;  %v7055_v11 = vld [vmem:[#allocation8 + $0x214] ss:$8 sps:$4 sm:$0xff]  }
 0x2b1   :  { %v3644_v26 = vmul.f32 1.4142135, %v3588_v22  ;;  %v3589_v27 = vsel %vm3477_vm10, %v2928_v6, %v3533_v20  ;;  %vm3491_vm12 = vcmp.ge.f32.partialorder %v2932_v21, 0.0  ;;  %v3547_v30 = vmul.f32 0.2, %v2932_v21 }
 0x2b2   :  { %v3645_v53 = vmul.f32 1.4142135, %v3589_v27  ;;  %v3602_v35 = vsel %vm3490_vm11, %v2930_v4, %v3546_v24  ;;  %3185 = vmatpush1.bf16.msra.mxu1 %v7008_v8  ;;  %v7053_v22 = vld [vmem:[#allocation8 + $0x210] ss:$8 sps:$4 sm:$0xff]  }
 0x2b3   :  { %v3658_v38 = vmul.f32 1.4142135, %v3602_v35  ;;  %v3603_v39 = vsel %vm3491_vm12, %v2932_v21, %v3547_v30  ;;  %v2882_v58 = vpop.f32.mrb[32].mxu1  ;;  %3186 = vmatprep.subr.bf16.mxu1 %v7016_v45  ;;  %5264 = vmatpush1.bf16.msra.mxu0 %v7011_v19  ;;  %v5982_v46 = vclamps-f32 %v3644_v26, 256.0  ;;  %v7028_v19 = vld [vmem:[#allocation7 + $0x804] ss:$56 sps:$4 sm:$0xff]  }
 0x2b4   :  { %v3659_v41 = vmul.f32 1.4142135, %v3603_v39  ;;  %v2936_v42 = vadd.f32 %v7682_v60, %v2882_v58  ;;  %v2884_v43 = vpop.f32.mrb[33].mxu1  ;;  %5265 = vmatprep.subr.bf16.mxu0 %v7019_v49  ;;  %v5983_v47 = vclamps-f32 %v3645_v53, 256.0  ;;  %v7026_v26 = vld [vmem:[#allocation7 + $0x800] ss:$56 sps:$4 sm:$0xff]  }
 0x2b5   :  { %v5996_v48 = vclamps-f32 %v3658_v38, 256.0  ;;  %v2938_v50 = vadd.f32 %v7684_v18, %v2884_v43  ;;  %v2886_v51 = vpop.f32.mrb[34].mxu1  ;;  %v7031_v30 = vld [vmem:[#allocation7 + $0x874] ss:$56 sps:$4 sm:$0xff]   ;;  %v7034_v39 = vld [vmem:[#allocation7 + $0x8e4] ss:$56 sps:$4 sm:$0xff]  }
 0x2b6   :  { %v5997_v54 = vclamps-f32 %v3659_v41, 256.0  ;;  %vm3504_vm13 = vcmp.ge.f32.partialorder %v2936_v42, 0.0  ;;  %v3560_v55 = vmul.f32 0.2, %v2936_v42  ;;  %v2940_v56 = vadd.f32 %v7686_v23, %v2886_v51  ;;  %3187 = vmatpush1.bf16.msra.mxu1 %v7014_v36  ;;  %v2888_v57 = vpop.f32.mrb[35].mxu1 }
 0x2b7   :  { %v3812_v59 = vpack.c.bf16 %v5996_v48, %v5982_v46  ;;  %vm3505_vm14 = vcmp.ge.f32.partialorder %v2938_v50, 0.0  ;;  %v3561_v60 = vmul.f32 0.2, %v2938_v50  ;;  %v2942_v61 = vadd.f32 %v7688_v29, %v2888_v57  ;;  %3209 = vmatprep.subr.bf16.mxu1 %v7022_v40  ;;  %5266 = vmatpush1.bf16.msra.mxu0 %v7017_v37  ;;  %v7023_v29 = vld [vmem:[#allocation7 + $0x790] ss:$56 sps:$4 sm:$0xff]  }
 0x2b8   :  { %v3616_v1 = vsel %vm3504_vm13, %v2936_v42, %v3560_v55  ;;  %vm3518_vm15 = vcmp.ge.f32.partialorder %v2940_v56, 0.0  ;;  %v3574_v18 = vmul.f32 0.2, %v2940_v56  ;;  %v3813_v2 = vpack.c.bf16 %v5997_v54, %v5983_v47  ;;  %5288 = vmatprep.subr.bf16.mxu0 %v7049_v44  ;;  %v7061_v35 = vld [vmem:[#allocation8 + $0x224] ss:$8 sps:$4 sm:$0xff]  }
 0x2b9   :  { %v3672_v5 = vmul.f32 1.4142135, %v3616_v1  ;;  %v3617_v6 = vsel %vm3505_vm14, %v2938_v50, %v3561_v60  ;;  %vm3519_vm0 = vcmp.ge.f32.partialorder %v2942_v61, 0.0  ;;  %v3575_v23 = vmul.f32 0.2, %v2942_v61  ;;  %3189 = vmatmul.mubr.bf16.vlgmr.msra.gmra.mrb[52].mxu1 %v7616_v12 }
 0x2ba   :  { %v3673_v7 = vmul.f32 1.4142135, %v3617_v6  ;;  %v3630_v8 = vsel %vm3518_vm15, %v2940_v56, %v3574_v18  ;;  %3198 = vmatprep.mubr.bf16.mxu1 %v7630_v32  ;;  %3210 = vmatpush1.bf16.msra.mxu1 %v7020_v52  ;;  %v7059_v36 = vld [vmem:[#allocation8 + $0x220] ss:$8 sps:$4 sm:$0xff]   ;;  %v7067_v38 = vld [vmem:[#allocation8 + $0x234] ss:$8 sps:$4 sm:$0xff]  }
 0x2bb   :  { %v3686_v4 = vmul.f32 1.4142135, %v3630_v8  ;;  %v3631_v16 = vsel %vm3519_vm0, %v2942_v61, %v3575_v23  ;;  %5267 = vmatprep.mubr.bf16.mxu0 %v3813_v2  ;;  %3211 = vmatprep.subr.bf16.mxu1 %v7025_v63  ;;  %v6010_v21 = vclamps-f32 %v3672_v5, 256.0  ;;  %v7029_v37 = vld [vmem:[#allocation7 + $0x870] ss:$56 sps:$4 sm:$0xff]  }
 0x2bc   :  { %v3687_v20 = vmul.f32 1.4142135, %v3631_v16  ;;  %5268 = vmatmul.mubr.bf16.vlgmr.msra.gmra.mrb[32].mxu0 %v3812_v59  ;;  %v6011_v24 = vclamps-f32 %v3673_v7, 256.0  ;;  %v7065_v58 = vld [vmem:[#allocation8 + $0x230] ss:$8 sps:$4 sm:$0xff]  }
 0x2bd   :  { %v6024_v45 = vclamps-f32 %v3686_v4, 256.0  ;;  %5289 = vmatpush1.bf16.msra.mxu0 %v7047_v3  ;;  %v7032_v40 = vld [vmem:[#allocation7 + $0x8e0] ss:$56 sps:$4 sm:$0xff]   ;;  %v7073_v41 = vld [vmem:[#allocation8 + $0x244] ss:$8 sps:$4 sm:$0xff]  }
 0x2be   :  { %v6025_v49 = vclamps-f32 %v3687_v20, 256.0  ;;  %3212 = vmatpush1.bf16.msra.mxu1 %v7023_v29  ;;  %5290 = vmatprep.subr.bf16.mxu0 %v7055_v11  ;;  %v7037_v42 = vld [vmem:[#allocation7 + $0x954] ss:$56 sps:$4 sm:$0xff]   ;;  %v7071_v43 = vld [vmem:[#allocation8 + $0x240] ss:$8 sps:$4 sm:$0xff]  }
 0x2bf   :  { %3213 = vmatprep.subr.bf16.mxu1 %v7028_v19  ;;  %v3826_v27 = vpack.c.bf16 %v6024_v45, %v6010_v21  ;;  %v7035_v44 = vld [vmem:[#allocation7 + $0x950] ss:$56 sps:$4 sm:$0xff]   ;;  %v7079_v46 = vld [vmem:[#allocation8 + $0x254] ss:$8 sps:$4 sm:$0xff]   ;;  %v7038_v50 = vld [vmem:[#allocation7 + $0x9c0] ss:$56 sps:$4 sm:$0xff]  }
 0x2c0   :  { %v3827_v53 = vpack.c.bf16 %v6025_v49, %v6011_v24  ;;  %v7040_v47 = vld [vmem:[#allocation7 + $0x9c4] ss:$56 sps:$4 sm:$0xff]   ;;  %v7077_v48 = vld [vmem:[#allocation8 + $0x250] ss:$8 sps:$4 sm:$0xff]   ;;  %v7043_v52 = vld [vmem:[#allocation7 + $0xa34] ss:$56 sps:$4 sm:$0xff]  }
 0x2c1   :  { %3199 = vmatmul.mubr.bf16.gmra.mrb[56].mxu1 %v7628_v31  ;;  %5291 = vmatpush1.bf16.msra.mxu0 %v7053_v22  ;;  %v7085_v51 = vld [vmem:[#allocation8 + $0x264] ss:$8 sps:$4 sm:$0xff]   ;;  %v7083_v54 = vld [vmem:[#allocation8 + $0x260] ss:$8 sps:$4 sm:$0xff]   ;;  %v7091_v56 = vld [vmem:[#allocation8 + $0x274] ss:$8 sps:$4 sm:$0xff]  }
 0x2c2   :  { %3214 = vmatpush1.bf16.msra.mxu1 %v7026_v26  ;;  %5277 = vmatprep.mubr.bf16.mxu0 %v3827_v53  ;;  %v7041_v55 = vld [vmem:[#allocation7 + $0xa30] ss:$56 sps:$4 sm:$0xff]   ;;  %v7046_v57 = vld [vmem:[#allocation7 + $0x34] ss:$56 sps:$4 sm:$0xff]   ;;  %v7052_v61 = vld [vmem:[#allocation7 + $0xa4] ss:$56 sps:$4 sm:$0xff]  }
 0x2c3   :  { %3215 = vmatprep.subr.bf16.mxu1 %v7031_v30  ;;  %3241 = vmatprep.mubr.bf16.mxu1 %v7484_v0  ;;  %v7089_v59 = vld [vmem:[#allocation8 + $0x270] ss:$8 sps:$4 sm:$0xff]   ;;  %v7097_v63 = vld [vmem:[#allocation8 + $0x284] ss:$8 sps:$4 sm:$0xff]   ;;  %v7095_v1 = vld [vmem:[#allocation8 + $0x280] ss:$8 sps:$4 sm:$0xff]  }
 0x2c4   :  { %5278 = vmatmul.mubr.bf16.gmra.mrb[36].mxu0 %v3826_v27  ;;  %5292 = vmatprep.subr.bf16.mxu0 %v7061_v35  ;;  %v7044_v60 = vld [vmem:[#allocation7 + $0x30] ss:$56 sps:$4 sm:$0xff]   ;;  %v7050_v18 = vld [vmem:[#allocation7 + $0xa0] ss:$56 sps:$4 sm:$0xff]   ;;  %v7103_v2 = vld [vmem:[#allocation8 + $0x294] ss:$8 sps:$4 sm:$0xff]  }
 0x2c5   :  { %5293 = vmatpush1.bf16.msra.mxu0 %v7059_v36  ;;  %v7058_v3 = vld [vmem:[#allocation7 + $0x114] ss:$56 sps:$4 sm:$0xff]   ;;  %v7101_v5 = vld [vmem:[#allocation8 + $0x290] ss:$8 sps:$4 sm:$0xff]   ;;  %v7064_v23 = vld [vmem:[#allocation7 + $0x184] ss:$56 sps:$4 sm:$0xff]  }
 0x2c6   :  { %3216 = vmatpush1.bf16.msra.mxu1 %v7029_v37  ;;  %5294 = vmatprep.subr.bf16.mxu0 %v7067_v38  ;;  %v7056_v6 = vld [vmem:[#allocation7 + $0x110] ss:$56 sps:$4 sm:$0xff]   ;;  %v7109_v7 = vld [vmem:[#allocation8 + $0x2a4] ss:$8 sps:$4 sm:$0xff]   ;;  %v7062_v29 = vld [vmem:[#allocation7 + $0x180] ss:$56 sps:$4 sm:$0xff]  }
 0x2c7   :  { %3217 = vmatprep.subr.bf16.mxu1 %v7034_v39  ;;  %v7107_v8 = vld [vmem:[#allocation8 + $0x2a0] ss:$8 sps:$4 sm:$0xff]   ;;  %v7115_v11 = vld [vmem:[#allocation8 + $0x2b4] ss:$8 sps:$4 sm:$0xff]   ;;  %v7113_v16 = vld [vmem:[#allocation8 + $0x2b0] ss:$8 sps:$4 sm:$0xff]  }
 0x2c8   :  { %v7070_v4 = vld [vmem:[#allocation7 + $0x1f4] ss:$56 sps:$4 sm:$0xff]   ;;  %v7068_v19 = vld [vmem:[#allocation7 + $0x1f0] ss:$56 sps:$4 sm:$0xff]   ;;  %v7076_v21 = vld [vmem:[#allocation7 + $0x264] ss:$56 sps:$4 sm:$0xff]  }
 0x2c9   :  { %5295 = vmatpush1.bf16.msra.mxu0 %v7065_v58  ;;  %v7121_v20 = vld [vmem:[#allocation8 + $0x2c4] ss:$8 sps:$4 sm:$0xff]   ;;  %v7119_v45 = vld [vmem:[#allocation8 + $0x2c0] ss:$8 sps:$4 sm:$0xff]   ;;  %v7127_v24 = vld [vmem:[#allocation8 + $0x2d4] ss:$8 sps:$4 sm:$0xff]  }
 0x2ca   :  { %3218 = vmatpush1.bf16.msra.mxu1 %v7032_v40  ;;  %5296 = vmatprep.subr.bf16.mxu0 %v7073_v41  ;;  %v7074_v22 = vld [vmem:[#allocation7 + $0x260] ss:$56 sps:$4 sm:$0xff]   ;;  %v7080_v26 = vld [vmem:[#allocation7 + $0x2d0] ss:$56 sps:$4 sm:$0xff]   ;;  %v7133_v37 = vld [vmem:[#allocation8 + $0x2e4] ss:$8 sps:$4 sm:$0xff]  }
 0x2cb   :  { %3219 = vmatprep.subr.bf16.mxu1 %v7037_v42  ;;  %v7125_v53 = vld [vmem:[#allocation8 + $0x2d0] ss:$8 sps:$4 sm:$0xff]   ;;  %v7088_v40 = vld [vmem:[#allocation7 + $0x344] ss:$56 sps:$4 sm:$0xff]  }
 0x2cd   :  { %5297 = vmatpush1.bf16.msra.mxu0 %v7071_v43 }
 0x2ce   :  { %3220 = vmatpush1.bf16.msra.mxu1 %v7035_v44  ;;  %5298 = vmatprep.subr.bf16.mxu0 %v7079_v46 }
 0x2cf   :  { %3221 = vmatprep.subr.bf16.mxu1 %v7040_v47  ;;  %v7131_v47 = vld [vmem:[#allocation8 + $0x2e0] ss:$8 sps:$4 sm:$0xff]  }
 0x2d1   :  { %5299 = vmatpush1.bf16.msra.mxu0 %v7077_v48 }
 0x2d2   :  { %3222 = vmatpush1.bf16.msra.mxu1 %v7038_v50  ;;  %5300 = vmatprep.subr.bf16.mxu0 %v7085_v51  ;;  %v7086_v51 = vld [vmem:[#allocation7 + $0x340] ss:$56 sps:$4 sm:$0xff]  }
 0x2d3   :  { %3223 = vmatprep.subr.bf16.mxu1 %v7043_v52  ;;  %v7139_v52 = vld [vmem:[#allocation8 + $0x2f4] ss:$8 sps:$4 sm:$0xff]  }
 0x2d5   :  { %5301 = vmatpush1.bf16.msra.mxu0 %v7083_v54 }
 0x2d6   :  { %3224 = vmatpush1.bf16.msra.mxu1 %v7041_v55  ;;  %5302 = vmatprep.subr.bf16.mxu0 %v7091_v56  ;;  %v7094_v55 = vld [vmem:[#allocation7 + $0x3b4] ss:$56 sps:$4 sm:$0xff]  }
 0x2d7   :  { %3368 = vmatprep.subr.bf16.mxu1 %v7046_v57 }
 0x2d9   :  { %3242 = vmatmul.mubr.bf16.vlgmr.msra.gmra.mrb[52].mxu1 %v7641_v14  ;;  %5303 = vmatpush1.bf16.msra.mxu0 %v7089_v59 }
 0x2da   :  { %3369 = vmatpush1.bf16.msra.mxu1 %v7044_v60  ;;  %3251 = vmatprep.mubr.bf16.mxu1 %v7484_v0  ;;  %v7092_v60 = vld [vmem:[#allocation7 + $0x3b0] ss:$56 sps:$4 sm:$0xff]  }
 0x2db   :  { %3370 = vmatprep.subr.bf16.mxu1 %v7052_v61  ;;  %5304 = vmatprep.subr.bf16.mxu0 %v7097_v63  ;;  %v7137_v61 = vld [vmem:[#allocation8 + $0x2f0] ss:$8 sps:$4 sm:$0xff]  }
 0x2dd   :  { %5305 = vmatpush1.bf16.msra.mxu0 %v7095_v1 }
 0x2de   :  { %3371 = vmatpush1.bf16.msra.mxu1 %v7050_v18  ;;  %5306 = vmatprep.subr.bf16.mxu0 %v7103_v2 }
 0x2df   :  { %3372 = vmatprep.subr.bf16.mxu1 %v7058_v3 }
 0x2e1   :  { %3252 = vmatmul.mubr.bf16.gmra.mrb[56].mxu1 %v7639_v9  ;;  %5307 = vmatpush1.bf16.msra.mxu0 %v7101_v5 }
 0x2e2   :  { %3373 = vmatpush1.bf16.msra.mxu1 %v7056_v6  ;;  %3400 = vmatprep.mubr.bf16.mxu1 %v7618_v13  ;;  %v7082_v13 = vld [vmem:[#allocation7 + $0x2d4] ss:$56 sps:$4 sm:$0xff]  }
 0x2e3   :  { %3374 = vmatprep.subr.bf16.mxu1 %v7064_v23  ;;  %5308 = vmatprep.subr.bf16.mxu0 %v7109_v7  ;;  %v7145_v23 = vld [vmem:[#allocation8 + $0x304] ss:$8 sps:$4 sm:$0xff]  }
 0x2e5   :  { %5309 = vmatpush1.bf16.msra.mxu0 %v7107_v8 }
 0x2e6   :  { %3375 = vmatpush1.bf16.msra.mxu1 %v7062_v29  ;;  %5310 = vmatprep.subr.bf16.mxu0 %v7115_v11  ;;  %v7100_v11 = vld [vmem:[#allocation7 + $0x424] ss:$56 sps:$4 sm:$0xff]  }
 0x2e7   :  { %3376 = vmatprep.subr.bf16.mxu1 %v7070_v4 }
 0x2e9   :  { %5311 = vmatpush1.bf16.msra.mxu0 %v7113_v16 }
 0x2ea   :  { %3377 = vmatpush1.bf16.msra.mxu1 %v7068_v19  ;;  %5312 = vmatprep.subr.bf16.mxu0 %v7121_v20 }
 0x2eb   :  { %3378 = vmatprep.subr.bf16.mxu1 %v7076_v21 }
 0x2ec   :  { %v3349_v49 = vpop.f32.mrb[24].mxu0 }
 0x2ed   :  { %vm3484_vm1 = vcmp.ge.f32.partialorder %v3349_v49, 0.0  ;;  %v3540_v27 = vmul.f32 0.2, %v3349_v49  ;;  %v3351_v30 = vpop.f32.mrb[25].mxu0  ;;  %5313 = vmatpush1.bf16.msra.mxu0 %v7119_v45 }
 0x2ee   :  { %vm3485_vm2 = vcmp.ge.f32.partialorder %v3351_v30, 0.0  ;;  %v3541_v35 = vmul.f32 0.2, %v3351_v30  ;;  %v3353_v36 = vpop.f32.mrb[26].mxu0  ;;  %3379 = vmatpush1.bf16.msra.mxu1 %v7074_v22  ;;  %5314 = vmatprep.subr.bf16.mxu0 %v7127_v24 }
 0x2ef   :  { %v3596_v38 = vsel %vm3484_vm1, %v3349_v49, %v3540_v27  ;;  %vm3498_vm3 = vcmp.ge.f32.partialorder %v3353_v36, 0.0  ;;  %v3554_v39 = vmul.f32 0.2, %v3353_v36  ;;  %v3355_v58 = vpop.f32.mrb[27].mxu0  ;;  %3380 = vmatprep.subr.bf16.mxu1 %v7082_v13  ;;  %v7098_v13 = vld [vmem:[#allocation7 + $0x420] ss:$56 sps:$4 sm:$0xff]  }
 0x2f0   :  { %v3652_v41 = vmul.f32 1.4142135, %v3596_v38  ;;  %v3597_v42 = vsel %vm3485_vm2, %v3351_v30, %v3541_v35  ;;  %vm3499_vm4 = vcmp.ge.f32.partialorder %v3355_v58, 0.0  ;;  %v3555_v43 = vmul.f32 0.2, %v3355_v58 }
 0x2f1   :  { %v3653_v44 = vmul.f32 1.4142135, %v3597_v42  ;;  %v3610_v46 = vsel %vm3498_vm3, %v3353_v36, %v3554_v39  ;;  %5315 = vmatpush1.bf16.msra.mxu0 %v7125_v53  ;;  %v7104_v36 = vld [vmem:[#allocation7 + $0x490] ss:$56 sps:$4 sm:$0xff]   ;;  %v7112_v38 = vld [vmem:[#allocation7 + $0x504] ss:$56 sps:$4 sm:$0xff]  }
 0x2f2   :  { %v3666_v48 = vmul.f32 1.4142135, %v3610_v46  ;;  %v3611_v50 = vsel %vm3499_vm4, %v3355_v58, %v3555_v43  ;;  %3381 = vmatpush1.bf16.msra.mxu1 %v7080_v26  ;;  %5316 = vmatprep.subr.bf16.mxu0 %v7133_v37  ;;  %v5990_v56 = vclamps-f32 %v3652_v41, 256.0  ;;  %v7106_v26 = vld [vmem:[#allocation7 + $0x494] ss:$56 sps:$4 sm:$0xff]  }
 0x2f3   :  { %v3667_v54 = vmul.f32 1.4142135, %v3611_v50  ;;  %3382 = vmatprep.subr.bf16.mxu1 %v7088_v40  ;;  %v5991_v63 = vclamps-f32 %v3653_v44, 256.0  ;;  %v7110_v58 = vld [vmem:[#allocation7 + $0x500] ss:$56 sps:$4 sm:$0xff]  }
 0x2f4   :  { %v6004_v57 = vclamps-f32 %v3666_v48, 256.0  ;;  %v3359_v59 = vpop.f32.mrb[28].mxu0  ;;  %v7118_v40 = vld [vmem:[#allocation7 + $0x574] ss:$56 sps:$4 sm:$0xff]   ;;  %v7116_v41 = vld [vmem:[#allocation7 + $0x570] ss:$56 sps:$4 sm:$0xff]  }
 0x2f5   :  { %v6005_v1 = vclamps-f32 %v3667_v54, 256.0  ;;  %vm3512_vm5 = vcmp.ge.f32.partialorder %v3359_v59, 0.0  ;;  %v3568_v18 = vmul.f32 0.2, %v3359_v59  ;;  %v3361_v2 = vpop.f32.mrb[29].mxu0  ;;  %5317 = vmatpush1.bf16.msra.mxu0 %v7131_v47 }
 0x2f6   :  { %v7726_v3 = vpack.c.bf16 %v6004_v57, %v5990_v56  ;;  %vm3513_vm6 = vcmp.ge.f32.partialorder %v3361_v2, 0.0  ;;  %v3569_v5 = vmul.f32 0.2, %v3361_v2  ;;  %v3363_v6 = vpop.f32.mrb[30].mxu0  ;;  %3383 = vmatpush1.bf16.msra.mxu1 %v7086_v51  ;;  %5318 = vmatprep.subr.bf16.mxu0 %v7139_v52  ;;  %v7124_v42 = vld [vmem:[#allocation7 + $0x5e4] ss:$56 sps:$4 sm:$0xff]  }
 0x2f7   :  { %v3624_v7 = vsel %vm3512_vm5, %v3359_v59, %v3568_v18  ;;  %vm3526_vm7 = vcmp.ge.f32.partialorder %v3363_v6, 0.0  ;;  %v3582_v8 = vmul.f32 0.2, %v3363_v6  ;;  %v3365_v29 = vpop.f32.mrb[31].mxu0  ;;  %3384 = vmatprep.subr.bf16.mxu1 %v7094_v55  ;;  %v7728_v4 = vpack.c.bf16 %v6005_v1, %v5991_v63  ;;  %v7122_v43 = vld [vmem:[#allocation7 + $0x5e0] ss:$56 sps:$4 sm:$0xff]  }
 0x2f8   :  { %v3680_v16 = vmul.f32 1.4142135, %v3624_v7  ;;  %v3625_v19 = vsel %vm3513_vm6, %v3361_v2, %v3569_v5  ;;  %vm3527_vm8 = vcmp.ge.f32.partialorder %v3365_v29, 0.0  ;;  %v3583_v20 = vmul.f32 0.2, %v3365_v29 }
 0x2f9   :  { %v3681_v21 = vmul.f32 1.4142135, %v3625_v19  ;;  %v3638_v45 = vsel %vm3526_vm7, %v3363_v6, %v3582_v8  ;;  %5319 = vmatpush1.bf16.msra.mxu0 %v7137_v61  ;;  %v7130_v44 = vld [vmem:[#allocation7 + $0x654] ss:$56 sps:$4 sm:$0xff]   ;;  %v7128_v52 = vld [vmem:[#allocation7 + $0x650] ss:$56 sps:$4 sm:$0xff]  }
 0x2fa   :  { %v3694_v22 = vmul.f32 1.4142135, %v3638_v45  ;;  %v3639_v24 = vsel %vm3527_vm8, %v3365_v29, %v3583_v20  ;;  %3385 = vmatpush1.bf16.msra.mxu1 %v7092_v60  ;;  %5341 = vmatprep.subr.bf16.mxu0 %v7145_v23  ;;  %v6018_v27 = vclamps-f32 %v3680_v16, 256.0  ;;  %v7136_v57 = vld [vmem:[#allocation7 + $0x6c4] ss:$56 sps:$4 sm:$0xff]  }
 0x2fb   :  { %v3695_v49 = vmul.f32 1.4142135, %v3639_v24  ;;  %3386 = vmatprep.subr.bf16.mxu1 %v7100_v11  ;;  %v6019_v53 = vclamps-f32 %v3681_v21, 256.0  ;;  %v7134_v5 = vld [vmem:[#allocation7 + $0x6c0] ss:$56 sps:$4 sm:$0xff]  }
 0x2fc   :  { %v6032_v30 = vclamps-f32 %v3694_v22, 256.0  ;;  %v7142_v23 = vld [vmem:[#allocation7 + $0x734] ss:$56 sps:$4 sm:$0xff]   ;;  %v7140_v11 = vld [vmem:[#allocation7 + $0x730] ss:$56 sps:$4 sm:$0xff]  }
 0x2fd   :  { %v6033_v35 = vclamps-f32 %v3695_v49, 256.0 }
 0x2fe   :  { %3387 = vmatpush1.bf16.msra.mxu1 %v7098_v13  ;;  %v7730_v37 = vpack.c.bf16 %v6032_v30, %v6018_v27  ;;  %v7143_v13 = vld [vmem:[#allocation8 + $0x300] ss:$8 sps:$4 sm:$0xff]  }
 0x2ff   :  { %3388 = vmatprep.subr.bf16.mxu1 %v7106_v26  ;;  %v7732_v39 = vpack.c.bf16 %v6033_v35, %v6019_v53  ;;  %v7148_v53 = vld [vmem:[#allocation7 + $0x7a4] ss:$56 sps:$4 sm:$0xff]  }
 0x302   :  { %3389 = vmatpush1.bf16.msra.mxu1 %v7104_v36 }
 0x303   :  { %3390 = vmatprep.subr.bf16.mxu1 %v7112_v38 }
 0x306   :  { %3391 = vmatpush1.bf16.msra.mxu1 %v7110_v58 }
 0x307   :  { %3392 = vmatprep.subr.bf16.mxu1 %v7118_v40 }
 0x30a   :  { %3393 = vmatpush1.bf16.msra.mxu1 %v7116_v41  ;;  %v7151_v41 = vld [vmem:[#allocation8 + $0x314] ss:$8 sps:$4 sm:$0xff]  }
 0x30b   :  { %3394 = vmatprep.subr.bf16.mxu1 %v7124_v42 }
 0x30c   :  { %v3031_v46 = vpop.f32.mrb[36].mxu1 }
 0x30d   :  { %vm3478_vm9 = vcmp.ge.f32.partialorder %v3031_v46, 0.0  ;;  %v3534_v47 = vmul.f32 0.2, %v3031_v46  ;;  %v3033_v48 = vpop.f32.mrb[37].mxu1 }
 0x30e   :  { %vm3479_vm10 = vcmp.ge.f32.partialorder %v3033_v48, 0.0  ;;  %v3535_v50 = vmul.f32 0.2, %v3033_v48  ;;  %v3035_v51 = vpop.f32.mrb[38].mxu1  ;;  %3395 = vmatpush1.bf16.msra.mxu1 %v7122_v43 }
 0x30f   :  { %v3590_v54 = vsel %vm3478_vm9, %v3031_v46, %v3534_v47  ;;  %vm3492_vm11 = vcmp.ge.f32.partialorder %v3035_v51, 0.0  ;;  %v3548_v55 = vmul.f32 0.2, %v3035_v51  ;;  %v3037_v56 = vpop.f32.mrb[39].mxu1  ;;  %3396 = vmatprep.subr.bf16.mxu1 %v7130_v44  ;;  %v7146_v44 = vld [vmem:[#allocation7 + $0x7a0] ss:$56 sps:$4 sm:$0xff]  }
 0x310   :  { %v3646_v59 = vmul.f32 1.4142135, %v3590_v54  ;;  %v3591_v60 = vsel %vm3479_vm10, %v3033_v48, %v3535_v50  ;;  %vm3493_vm12 = vcmp.ge.f32.partialorder %v3037_v56, 0.0  ;;  %v3549_v61 = vmul.f32 0.2, %v3037_v56 }
 0x311   :  { %v3647_v63 = vmul.f32 1.4142135, %v3591_v60  ;;  %v3604_v1 = vsel %vm3492_vm11, %v3035_v51, %v3548_v55  ;;  %v7154_v47 = vld [vmem:[#allocation7 + $0x814] ss:$56 sps:$4 sm:$0xff]   ;;  %v7149_v51 = vld [vmem:[#allocation8 + $0x310] ss:$8 sps:$4 sm:$0xff]  }
 0x312   :  { %v3660_v18 = vmul.f32 1.4142135, %v3604_v1  ;;  %v3605_v2 = vsel %vm3493_vm12, %v3037_v56, %v3549_v61  ;;  %3397 = vmatpush1.bf16.msra.mxu1 %v7128_v52  ;;  %v5984_v7 = vclamps-f32 %v3646_v59, 256.0  ;;  %v7157_v56 = vld [vmem:[#allocation8 + $0x324] ss:$8 sps:$4 sm:$0xff]  }
 0x313   :  { %v3661_v6 = vmul.f32 1.4142135, %v3605_v2  ;;  %3398 = vmatprep.subr.bf16.mxu1 %v7136_v57  ;;  %v5985_v16 = vclamps-f32 %v3647_v63, 256.0  ;;  %v7155_v59 = vld [vmem:[#allocation8 + $0x320] ss:$8 sps:$4 sm:$0xff]  }
 0x314   :  { %v5998_v8 = vclamps-f32 %v3660_v18, 256.0  ;;  %v3041_v29 = vpop.f32.mrb[40].mxu1  ;;  %v7163_v60 = vld [vmem:[#allocation8 + $0x334] ss:$8 sps:$4 sm:$0xff]   ;;  %v7158_v61 = vld [vmem:[#allocation7 + $0x880] ss:$56 sps:$4 sm:$0xff]  }
 0x315   :  { %v5999_v19 = vclamps-f32 %v3661_v6, 256.0  ;;  %vm3506_vm13 = vcmp.ge.f32.partialorder %v3041_v29, 0.0  ;;  %v3562_v20 = vmul.f32 0.2, %v3041_v29  ;;  %v3043_v21 = vpop.f32.mrb[41].mxu1 }
 0x316   :  { %v3814_v45 = vpack.c.bf16 %v5998_v8, %v5984_v7  ;;  %vm3507_vm14 = vcmp.ge.f32.partialorder %v3043_v21, 0.0  ;;  %v3563_v22 = vmul.f32 0.2, %v3043_v21  ;;  %v3045_v24 = vpop.f32.mrb[42].mxu1  ;;  %3399 = vmatpush1.bf16.msra.mxu1 %v7134_v5  ;;  %v7166_v63 = vld [vmem:[#allocation7 + $0x8f4] ss:$56 sps:$4 sm:$0xff]  }
 0x317   :  { %v3618_v49 = vsel %vm3506_vm13, %v3041_v29, %v3562_v20  ;;  %vm3520_vm15 = vcmp.ge.f32.partialorder %v3045_v24, 0.0  ;;  %v3576_v26 = vmul.f32 0.2, %v3045_v24  ;;  %v3047_v27 = vpop.f32.mrb[43].mxu1  ;;  %3421 = vmatprep.subr.bf16.mxu1 %v7142_v23  ;;  %v3815_v30 = vpack.c.bf16 %v5999_v19, %v5985_v16  ;;  %v7161_v1 = vld [vmem:[#allocation8 + $0x330] ss:$8 sps:$4 sm:$0xff]  }
 0x318   :  { %v3674_v35 = vmul.f32 1.4142135, %v3618_v49  ;;  %v3619_v36 = vsel %vm3507_vm14, %v3043_v21, %v3563_v22  ;;  %vm3521_vm0 = vcmp.ge.f32.partialorder %v3047_v27, 0.0  ;;  %v3577_v38 = vmul.f32 0.2, %v3047_v27 }
 0x319   :  { %v3675_v58 = vmul.f32 1.4142135, %v3619_v36  ;;  %v3632_v40 = vsel %vm3520_vm15, %v3045_v24, %v3576_v26  ;;  %3401 = vmatmul.mubr.bf16.vlgmr.msra.gmra.mrb[60].mxu1 %v7616_v12  ;;  %5320 = vmatprep.mubr.bf16.mxu0 %v3815_v30  ;;  %v7152_v12 = vld [vmem:[#allocation7 + $0x810] ss:$56 sps:$4 sm:$0xff]   ;;  %v7169_v18 = vld [vmem:[#allocation8 + $0x344] ss:$8 sps:$4 sm:$0xff]  }
 0x31a   :  { %v3688_v42 = vmul.f32 1.4142135, %v3632_v40  ;;  %v3633_v43 = vsel %vm3521_vm0, %v3047_v27, %v3577_v38  ;;  %3410 = vmatprep.mubr.bf16.mxu1 %v7630_v32  ;;  %3422 = vmatpush1.bf16.msra.mxu1 %v7140_v11  ;;  %v6012_v48 = vclamps-f32 %v3674_v35, 256.0  ;;  %v7160_v32 = vld [vmem:[#allocation7 + $0x884] ss:$56 sps:$4 sm:$0xff]  }
 0x31b   :  { %v3689_v46 = vmul.f32 1.4142135, %v3633_v43  ;;  %5321 = vmatmul.mubr.bf16.vlgmr.msra.gmra.mrb[32].mxu0 %v3814_v45  ;;  %3423 = vmatprep.subr.bf16.mxu1 %v7148_v53  ;;  %v6013_v52 = vclamps-f32 %v3675_v58, 256.0  ;;  %v7164_v2 = vld [vmem:[#allocation7 + $0x8f0] ss:$56 sps:$4 sm:$0xff]  }
 0x31c   :  { %v6026_v50 = vclamps-f32 %v3688_v42, 256.0  ;;  %5342 = vmatpush1.bf16.msra.mxu0 %v7143_v13  ;;  %v7172_v5 = vld [vmem:[#allocation7 + $0x964] ss:$56 sps:$4 sm:$0xff]   ;;  %v7170_v23 = vld [vmem:[#allocation7 + $0x960] ss:$56 sps:$4 sm:$0xff]  }
 0x31d   :  { %v6027_v54 = vclamps-f32 %v3689_v46, 256.0  ;;  %5343 = vmatprep.subr.bf16.mxu0 %v7151_v41  ;;  %v7175_v6 = vld [vmem:[#allocation8 + $0x354] ss:$8 sps:$4 sm:$0xff]   ;;  %v7173_v8 = vld [vmem:[#allocation8 + $0x350] ss:$8 sps:$4 sm:$0xff]  }
 0x31e   :  { %3424 = vmatpush1.bf16.msra.mxu1 %v7146_v44  ;;  %v3828_v55 = vpack.c.bf16 %v6026_v50, %v6012_v48  ;;  %v7178_v7 = vld [vmem:[#allocation7 + $0x9d4] ss:$56 sps:$4 sm:$0xff]   ;;  %v7176_v11 = vld [vmem:[#allocation7 + $0x9d0] ss:$56 sps:$4 sm:$0xff]   ;;  %v7184_v16 = vld [vmem:[#allocation7 + $0xa44] ss:$56 sps:$4 sm:$0xff]  }
 0x31f   :  { %3425 = vmatprep.subr.bf16.mxu1 %v7154_v47  ;;  %v3829_v57 = vpack.c.bf16 %v6027_v54, %v6013_v52  ;;  %v7181_v29 = vld [vmem:[#allocation8 + $0x364] ss:$8 sps:$4 sm:$0xff]   ;;  %v7179_v19 = vld [vmem:[#allocation8 + $0x360] ss:$8 sps:$4 sm:$0xff]   ;;  %v7187_v20 = vld [vmem:[#allocation8 + $0x374] ss:$8 sps:$4 sm:$0xff]  }
 0x320   :  { %5344 = vmatpush1.bf16.msra.mxu0 %v7149_v51  ;;  %v7182_v21 = vld [vmem:[#allocation7 + $0xa40] ss:$56 sps:$4 sm:$0xff]   ;;  %v7190_v22 = vld [vmem:[#allocation8 + $0x384] ss:$8 sps:$4 sm:$0xff]   ;;  %v7193_v13 = vld [vmem:[#allocation8 + $0x394] ss:$8 sps:$4 sm:$0xff]  }
 0x321   :  { %3411 = vmatmul.mubr.bf16.gmra.mrb[64].mxu1 %v7628_v31  ;;  %5330 = vmatprep.mubr.bf16.mxu0 %v3829_v57  ;;  %v7167_v31 = vld [vmem:[#allocation8 + $0x340] ss:$8 sps:$4 sm:$0xff]   ;;  %v7185_v45 = vld [vmem:[#allocation8 + $0x370] ss:$8 sps:$4 sm:$0xff]   ;;  %v7196_v26 = vld [vmem:[#allocation8 + $0x3a4] ss:$8 sps:$4 sm:$0xff]  }
 0x322   :  { %3426 = vmatpush1.bf16.msra.mxu1 %v7152_v12  ;;  %5345 = vmatprep.subr.bf16.mxu0 %v7157_v56  ;;  %v7188_v24 = vld [vmem:[#allocation8 + $0x380] ss:$8 sps:$4 sm:$0xff]   ;;  %v7191_v49 = vld [vmem:[#allocation8 + $0x390] ss:$8 sps:$4 sm:$0xff]   ;;  %v7199_v30 = vld [vmem:[#allocation8 + $0x3b4] ss:$8 sps:$4 sm:$0xff]  }
 0x323   :  { %5331 = vmatmul.mubr.bf16.gmra.mrb[36].mxu0 %v3828_v55  ;;  %3427 = vmatprep.subr.bf16.mxu1 %v7160_v32  ;;  %v7194_v27 = vld [vmem:[#allocation8 + $0x3a0] ss:$8 sps:$4 sm:$0xff]   ;;  %v7197_v53 = vld [vmem:[#allocation8 + $0x3b0] ss:$8 sps:$4 sm:$0xff]   ;;  %v7202_v35 = vld [vmem:[#allocation8 + $0x3c4] ss:$8 sps:$4 sm:$0xff]  }
 0x324   :  { %5346 = vmatpush1.bf16.msra.mxu0 %v7155_v59  ;;  %3453 = vmatprep.mubr.bf16.mxu1 %v7484_v0  ;;  %v7205_v36 = vld [vmem:[#allocation8 + $0x3d4] ss:$8 sps:$4 sm:$0xff]   ;;  %v7208_v41 = vld [vmem:[#allocation8 + $0x3e4] ss:$8 sps:$4 sm:$0xff]   ;;  %v7206_v50 = vld [vmem:[#allocation8 + $0x3e0] ss:$8 sps:$4 sm:$0xff]  }
 0x325   :  { %5347 = vmatprep.subr.bf16.mxu0 %v7163_v60  ;;  %v7211_v52 = vld [vmem:[#allocation8 + $0x3f4] ss:$8 sps:$4 sm:$0xff]   ;;  %v7209_v59 = vld [vmem:[#allocation8 + $0x3f0] ss:$8 sps:$4 sm:$0xff]  }
 0x326   :  { %3428 = vmatpush1.bf16.msra.mxu1 %v7158_v61 }
 0x327   :  { %3429 = vmatprep.subr.bf16.mxu1 %v7166_v63  ;;  %v7214_v63 = vld [vmem:[#allocation8 + $0x404] ss:$8 sps:$4 sm:$0xff]  }
 0x328   :  { %5348 = vmatpush1.bf16.msra.mxu0 %v7161_v1 }
 0x329   :  { %5349 = vmatprep.subr.bf16.mxu0 %v7169_v18 }
 0x32a   :  { %3430 = vmatpush1.bf16.msra.mxu1 %v7164_v2 }
 0x32b   :  { %3431 = vmatprep.subr.bf16.mxu1 %v7172_v5 }
 0x32c   :  { %5350 = vmatpush1.bf16.msra.mxu0 %v7167_v31 }
 0x32d   :  { %5351 = vmatprep.subr.bf16.mxu0 %v7175_v6 }
 0x32e   :  { %3432 = vmatpush1.bf16.msra.mxu1 %v7170_v23 }
 0x32f   :  { %3433 = vmatprep.subr.bf16.mxu1 %v7178_v7 }
 0x330   :  { %5352 = vmatpush1.bf16.msra.mxu0 %v7173_v8 }
 0x331   :  { %5353 = vmatprep.subr.bf16.mxu0 %v7181_v29 }
 0x332   :  { %3434 = vmatpush1.bf16.msra.mxu1 %v7176_v11 }
 0x333   :  { %3435 = vmatprep.subr.bf16.mxu1 %v7184_v16  ;;  %v7212_v16 = vld [vmem:[#allocation8 + $0x400] ss:$8 sps:$4 sm:$0xff]  }
 0x334   :  { %5354 = vmatpush1.bf16.msra.mxu0 %v7179_v19 }
 0x335   :  { %5355 = vmatprep.subr.bf16.mxu0 %v7187_v20 }
 0x336   :  { %3436 = vmatpush1.bf16.msra.mxu1 %v7182_v21 }
 0x338   :  { %5356 = vmatpush1.bf16.msra.mxu0 %v7185_v45 }
 0x339   :  { %3454 = vmatmul.mubr.bf16.vlgmr.msra.gmra.mrb[60].mxu1 %v7641_v14  ;;  %5357 = vmatprep.subr.bf16.mxu0 %v7190_v22  ;;  %v7200_v14 = vld [vmem:[#allocation8 + $0x3c0] ss:$8 sps:$4 sm:$0xff]  }
 0x33a   :  { %3463 = vmatprep.mubr.bf16.mxu1 %v7484_v0  ;;  %v7203_v0 = vld [vmem:[#allocation8 + $0x3d0] ss:$8 sps:$4 sm:$0xff]  }
 0x33c   :  { %5358 = vmatpush1.bf16.msra.mxu0 %v7188_v24 }
 0x33d   :  { %5359 = vmatprep.subr.bf16.mxu0 %v7193_v13 }
 0x340   :  { %5360 = vmatpush1.bf16.msra.mxu0 %v7191_v49 }
 0x341   :  { %3464 = vmatmul.mubr.bf16.gmra.mrb[64].mxu1 %v7639_v9  ;;  %5361 = vmatprep.subr.bf16.mxu0 %v7196_v26 }
 0x344   :  { %5362 = vmatpush1.bf16.msra.mxu0 %v7194_v27 }
 0x345   :  { %5363 = vmatprep.subr.bf16.mxu0 %v7199_v30 }
 0x348   :  { %5364 = vmatpush1.bf16.msra.mxu0 %v7197_v53 }
 0x349   :  { %5365 = vmatprep.subr.bf16.mxu0 %v7202_v35  ;;  %v7220_v35 = vld [vmem:[#allocation8 + $0x424] ss:$8 sps:$4 sm:$0xff]  }
 0x34c   :  { %v3084_v38 = vpop.f32.mrb[44].mxu1  ;;  %5366 = vmatpush1.bf16.msra.mxu0 %v7200_v14 }
 0x34d   :  { %v3138_v58 = vadd.f32 %v7694_v10, %v3084_v38  ;;  %v3086_v40 = vpop.f32.mrb[45].mxu1  ;;  %5367 = vmatprep.subr.bf16.mxu0 %v7205_v36 }
 0x34e   :  { %v3140_v9 = vadd.f32 %v7696_v15, %v3086_v40  ;;  %v3088_v42 = vpop.f32.mrb[46].mxu1  ;;  %v7223_v40 = vld [vmem:[#allocation8 + $0x434] ss:$8 sps:$4 sm:$0xff]  }
 0x34f   :  { %vm3480_vm1 = vcmp.ge.f32.partialorder %v3138_v58, 0.0  ;;  %v3536_v43 = vmul.f32 0.2, %v3138_v58  ;;  %v3142_v44 = vadd.f32 %v7698_v62, %v3088_v42  ;;  %v3090_v46 = vpop.f32.mrb[47].mxu1  ;;  %v7224_v42 = vld [vmem:[#allocation8 + $0x440] ss:$8 sps:$4 sm:$0xff]  }
 0x350   :  { %vm3481_vm2 = vcmp.ge.f32.partialorder %v3140_v9, 0.0  ;;  %v3537_v47 = vmul.f32 0.2, %v3140_v9  ;;  %v3144_v48 = vadd.f32 %v7700_v17, %v3090_v46  ;;  %5368 = vmatpush1.bf16.msra.mxu0 %v7203_v0  ;;  %v7232_v46 = vld [vmem:[#allocation8 + $0x464] ss:$8 sps:$4 sm:$0xff]  }
 0x351   :  { %v3592_v51 = vsel %vm3480_vm1, %v3138_v58, %v3536_v43  ;;  %vm3494_vm3 = vcmp.ge.f32.partialorder %v3142_v44, 0.0  ;;  %v3550_v10 = vmul.f32 0.2, %v3142_v44  ;;  %5369 = vmatprep.subr.bf16.mxu0 %v7208_v41  ;;  %v7218_v58 = vld [vmem:[#allocation8 + $0x420] ss:$8 sps:$4 sm:$0xff]  }
 0x352   :  { %v3648_v54 = vmul.f32 1.4142135, %v3592_v51  ;;  %v3593_v12 = vsel %vm3481_vm2, %v3140_v9, %v3537_v47  ;;  %vm3495_vm4 = vcmp.ge.f32.partialorder %v3144_v48, 0.0  ;;  %v3551_v15 = vmul.f32 0.2, %v3144_v48 }
 0x353   :  { %v3649_v55 = vmul.f32 1.4142135, %v3593_v12  ;;  %v3606_v56 = vsel %vm3494_vm3, %v3142_v44, %v3550_v10  ;;  %v7221_v41 = vld [vmem:[#allocation8 + $0x430] ss:$8 sps:$4 sm:$0xff]   ;;  %v7226_v9 = vld [vmem:[#allocation8 + $0x444] ss:$8 sps:$4 sm:$0xff]  }
 0x354   :  { %v3662_v57 = vmul.f32 1.4142135, %v3606_v56  ;;  %v3607_v62 = vsel %vm3495_vm4, %v3144_v48, %v3551_v15  ;;  %v3094_v32 = vpop.f32.mrb[48].mxu1  ;;  %5370 = vmatpush1.bf16.msra.mxu0 %v7206_v50  ;;  %v5986_v1 = vclamps-f32 %v3648_v54, 256.0  ;;  %v7229_v43 = vld [vmem:[#allocation8 + $0x454] ss:$8 sps:$4 sm:$0xff]  }
 0x355   :  { %v3663_v60 = vmul.f32 1.4142135, %v3607_v62  ;;  %v3148_v17 = vadd.f32 %v7702_v25, %v3094_v32  ;;  %v3096_v61 = vpop.f32.mrb[49].mxu1  ;;  %5371 = vmatprep.subr.bf16.mxu0 %v7211_v52  ;;  %v5987_v18 = vclamps-f32 %v3649_v55, 256.0  ;;  %v7227_v44 = vld [vmem:[#allocation8 + $0x450] ss:$8 sps:$4 sm:$0xff]  }
 0x356   :  { %v6000_v2 = vclamps-f32 %v3662_v57, 256.0  ;;  %v3150_v5 = vadd.f32 %v7704_v28, %v3096_v61  ;;  %v3098_v31 = vpop.f32.mrb[50].mxu1  ;;  %v7217_v28 = vld [vmem:[#allocation8 + $0x414] ss:$8 sps:$4 sm:$0xff]   ;;  %v7230_v47 = vld [vmem:[#allocation8 + $0x460] ss:$8 sps:$4 sm:$0xff]  }
 0x357   :  { %v6001_v6 = vclamps-f32 %v3663_v60, 256.0  ;;  %vm3508_vm5 = vcmp.ge.f32.partialorder %v3148_v17, 0.0  ;;  %v3564_v23 = vmul.f32 0.2, %v3148_v17  ;;  %v3152_v7 = vadd.f32 %v7706_v33, %v3098_v31  ;;  %v3100_v8 = vpop.f32.mrb[51].mxu1 }
 0x358   :  { %v3816_v29 = vpack.c.bf16 %v6000_v2, %v5986_v1  ;;  %vm3509_vm6 = vcmp.ge.f32.partialorder %v3150_v5, 0.0  ;;  %v3565_v11 = vmul.f32 0.2, %v3150_v5  ;;  %v3154_v25 = vadd.f32 %v7708_v34, %v3100_v8  ;;  %5372 = vmatpush1.bf16.msra.mxu0 %v7209_v59  ;;  %v7215_v34 = vld [vmem:[#allocation8 + $0x410] ss:$8 sps:$4 sm:$0xff]  }
 0x359   :  { %v3620_v19 = vsel %vm3508_vm5, %v3148_v17, %v3564_v23  ;;  %vm3522_vm7 = vcmp.ge.f32.partialorder %v3152_v7, 0.0  ;;  %v3578_v20 = vmul.f32 0.2, %v3152_v7  ;;  %v3817_v21 = vpack.c.bf16 %v6001_v6, %v5987_v18  ;;  %5394 = vmatprep.subr.bf16.mxu0 %v7214_v63  ;;  %v7235_v48 = vld [vmem:[#allocation8 + $0x474] ss:$8 sps:$4 sm:$0xff]  }
 0x35a   :  { %v3676_v45 = vmul.f32 1.4142135, %v3620_v19  ;;  %v3621_v22 = vsel %vm3509_vm6, %v3150_v5, %v3565_v11  ;;  %vm3523_vm8 = vcmp.ge.f32.partialorder %v3154_v25, 0.0  ;;  %v3579_v24 = vmul.f32 0.2, %v3154_v25 }
 0x35b   :  { %v3677_v13 = vmul.f32 1.4142135, %v3621_v22  ;;  %v3634_v33 = vsel %vm3522_vm7, %v3152_v7, %v3578_v20  ;;  %5373 = vmatprep.mubr.bf16.mxu0 %v3817_v21  ;;  %v7233_v50 = vld [vmem:[#allocation8 + $0x470] ss:$8 sps:$4 sm:$0xff]   ;;  %v7238_v51 = vld [vmem:[#allocation8 + $0x484] ss:$8 sps:$4 sm:$0xff]  }
 0x35c   :  { %v3690_v49 = vmul.f32 1.4142135, %v3634_v33  ;;  %v3635_v26 = vsel %vm3523_vm8, %v3154_v25, %v3579_v24  ;;  %5374 = vmatmul.mubr.bf16.vlgmr.msra.gmra.mrb[32].mxu0 %v3816_v29  ;;  %v6014_v30 = vclamps-f32 %v3676_v45, 256.0  ;;  %v7236_v10 = vld [vmem:[#allocation8 + $0x480] ss:$8 sps:$4 sm:$0xff]  }
 0x35d   :  { %v3691_v27 = vmul.f32 1.4142135, %v3635_v26  ;;  %5395 = vmatpush1.bf16.msra.mxu0 %v7212_v16  ;;  %v6015_v14 = vclamps-f32 %v3677_v13, 256.0  ;;  %v7241_v52 = vld [vmem:[#allocation8 + $0x494] ss:$8 sps:$4 sm:$0xff]  }
 0x35e   :  { %v6028_v53 = vclamps-f32 %v3690_v49, 256.0  ;;  %5396 = vmatprep.subr.bf16.mxu0 %v7217_v28  ;;  %v7239_v54 = vld [vmem:[#allocation8 + $0x490] ss:$8 sps:$4 sm:$0xff]   ;;  %v7244_v12 = vld [vmem:[#allocation8 + $0x4a4] ss:$8 sps:$4 sm:$0xff]  }
 0x35f   :  { %v6029_v36 = vclamps-f32 %v3691_v27, 256.0  ;;  %v7242_v15 = vld [vmem:[#allocation8 + $0x4a0] ss:$8 sps:$4 sm:$0xff]   ;;  %v7247_v55 = vld [vmem:[#allocation8 + $0x4b4] ss:$8 sps:$4 sm:$0xff]  }
 0x360   :  { %v3830_v38 = vpack.c.bf16 %v6028_v53, %v6014_v30  ;;  %v7245_v56 = vld [vmem:[#allocation8 + $0x4b0] ss:$8 sps:$4 sm:$0xff]   ;;  %v7250_v57 = vld [vmem:[#allocation8 + $0x4c4] ss:$8 sps:$4 sm:$0xff]   ;;  %v7248_v62 = vld [vmem:[#allocation8 + $0x4c0] ss:$8 sps:$4 sm:$0xff]  }
 0x361   :  { %v3831_v0 = vpack.c.bf16 %v6029_v36, %v6015_v14  ;;  %5397 = vmatpush1.bf16.msra.mxu0 %v7215_v34  ;;  %v7253_v32 = vld [vmem:[#allocation8 + $0x4d4] ss:$8 sps:$4 sm:$0xff]   ;;  %v7251_v59 = vld [vmem:[#allocation8 + $0x4d0] ss:$8 sps:$4 sm:$0xff]   ;;  %v7256_v60 = vld [vmem:[#allocation8 + $0x4e4] ss:$8 sps:$4 sm:$0xff]  }
 0x362   :  { %5398 = vmatprep.subr.bf16.mxu0 %v7220_v35  ;;  %v7254_v17 = vld [vmem:[#allocation8 + $0x4e0] ss:$8 sps:$4 sm:$0xff]   ;;  %v7259_v61 = vld [vmem:[#allocation8 + $0x4f4] ss:$8 sps:$4 sm:$0xff]   ;;  %v7257_v63 = vld [vmem:[#allocation8 + $0x4f0] ss:$8 sps:$4 sm:$0xff]  }
 0x363   :  { %5383 = vmatprep.mubr.bf16.mxu0 %v3831_v0  ;;  %v7262_v1 = vld [vmem:[#allocation8 + $0x504] ss:$8 sps:$4 sm:$0xff]   ;;  %v7260_v53 = vld [vmem:[#allocation8 + $0x500] ss:$8 sps:$4 sm:$0xff]   ;;  %v7265_v0 = vld [vmem:[#allocation8 + $0x514] ss:$8 sps:$4 sm:$0xff]  }
 0x364   :  { %5384 = vmatmul.mubr.bf16.gmra.mrb[36].mxu0 %v3830_v38 }
 0x365   :  { %5399 = vmatpush1.bf16.msra.mxu0 %v7218_v58 }
 0x366   :  { %5400 = vmatprep.subr.bf16.mxu0 %v7223_v40 }
 0x369   :  { %5401 = vmatpush1.bf16.msra.mxu0 %v7221_v41 }
 0x36a   :  { %5402 = vmatprep.subr.bf16.mxu0 %v7226_v9 }
 0x36d   :  { %5403 = vmatpush1.bf16.msra.mxu0 %v7224_v42 }
 0x36e   :  { %5404 = vmatprep.subr.bf16.mxu0 %v7229_v43 }
 0x371   :  { %5405 = vmatpush1.bf16.msra.mxu0 %v7227_v44 }
 0x372   :  { %5406 = vmatprep.subr.bf16.mxu0 %v7232_v46 }
 0x375   :  { %5407 = vmatpush1.bf16.msra.mxu0 %v7230_v47  ;;  %v7263_v47 = vld [vmem:[#allocation8 + $0x510] ss:$8 sps:$4 sm:$0xff]  }
 0x376   :  { %5408 = vmatprep.subr.bf16.mxu0 %v7235_v48 }
 0x379   :  { %5409 = vmatpush1.bf16.msra.mxu0 %v7233_v50 }
 0x37a   :  { %5410 = vmatprep.subr.bf16.mxu0 %v7238_v51  ;;  %v7268_v51 = vld [vmem:[#allocation8 + $0x524] ss:$8 sps:$4 sm:$0xff]  }
 0x37d   :  { %5411 = vmatpush1.bf16.msra.mxu0 %v7236_v10 }
 0x37e   :  { %5412 = vmatprep.subr.bf16.mxu0 %v7241_v52 }
 0x381   :  { %5413 = vmatpush1.bf16.msra.mxu0 %v7239_v54 }
 0x382   :  { %5414 = vmatprep.subr.bf16.mxu0 %v7244_v12 }
 0x385   :  { %5415 = vmatpush1.bf16.msra.mxu0 %v7242_v15  ;;  %v7266_v15 = vld [vmem:[#allocation8 + $0x520] ss:$8 sps:$4 sm:$0xff]  }
 0x386   :  { %5416 = vmatprep.subr.bf16.mxu0 %v7247_v55  ;;  %v7271_v55 = vld [vmem:[#allocation8 + $0x534] ss:$8 sps:$4 sm:$0xff]  }
 0x389   :  { %5417 = vmatpush1.bf16.msra.mxu0 %v7245_v56  ;;  %v7269_v56 = vld [vmem:[#allocation8 + $0x530] ss:$8 sps:$4 sm:$0xff]  }
 0x38a   :  { %5418 = vmatprep.subr.bf16.mxu0 %v7250_v57  ;;  %v7274_v57 = vld [vmem:[#allocation8 + $0x544] ss:$8 sps:$4 sm:$0xff]  }
 0x38d   :  { %5419 = vmatpush1.bf16.msra.mxu0 %v7248_v62  ;;  %v7272_v62 = vld [vmem:[#allocation8 + $0x540] ss:$8 sps:$4 sm:$0xff]  }
 0x38e   :  { %5420 = vmatprep.subr.bf16.mxu0 %v7253_v32  ;;  %v7277_v32 = vld [vmem:[#allocation8 + $0x554] ss:$8 sps:$4 sm:$0xff]  }
 0x391   :  { %5421 = vmatpush1.bf16.msra.mxu0 %v7251_v59  ;;  %v7275_v59 = vld [vmem:[#allocation8 + $0x550] ss:$8 sps:$4 sm:$0xff]  }
 0x392   :  { %5422 = vmatprep.subr.bf16.mxu0 %v7256_v60  ;;  %v7280_v60 = vld [vmem:[#allocation8 + $0x564] ss:$8 sps:$4 sm:$0xff]  }
 0x395   :  { %5423 = vmatpush1.bf16.msra.mxu0 %v7254_v17  ;;  %v7278_v17 = vld [vmem:[#allocation8 + $0x560] ss:$8 sps:$4 sm:$0xff]  }
 0x396   :  { %5424 = vmatprep.subr.bf16.mxu0 %v7259_v61  ;;  %v7283_v61 = vld [vmem:[#allocation8 + $0x574] ss:$8 sps:$4 sm:$0xff]  }
 0x399   :  { %5425 = vmatpush1.bf16.msra.mxu0 %v7257_v63  ;;  %v7281_v63 = vld [vmem:[#allocation8 + $0x570] ss:$8 sps:$4 sm:$0xff]  }
 0x39a   :  { %5447 = vmatprep.subr.bf16.mxu0 %v7262_v1  ;;  %v7286_v1 = vld [vmem:[#allocation8 + $0x584] ss:$8 sps:$4 sm:$0xff]  }
 0x3ac   :  { %v3243_v18 = vpop.f32.mrb[52].mxu1 }
 0x3ad   :  { %vm3482_vm9 = vcmp.ge.f32.partialorder %v3243_v18, 0.0  ;;  %v3538_v2 = vmul.f32 0.2, %v3243_v18  ;;  %v3245_v5 = vpop.f32.mrb[53].mxu1 }
 0x3ae   :  { %vm3483_vm10 = vcmp.ge.f32.partialorder %v3245_v5, 0.0  ;;  %v3539_v31 = vmul.f32 0.2, %v3245_v5  ;;  %v3247_v6 = vpop.f32.mrb[54].mxu1 }
 0x3af   :  { %v3594_v23 = vsel %vm3482_vm9, %v3243_v18, %v3538_v2  ;;  %vm3496_vm11 = vcmp.ge.f32.partialorder %v3247_v6, 0.0  ;;  %v3552_v7 = vmul.f32 0.2, %v3247_v6  ;;  %v3249_v8 = vpop.f32.mrb[55].mxu1  ;;  %v7289_v18 = vld [vmem:[#allocation8 + $0x594] ss:$8 sps:$4 sm:$0xff]  }
 0x3b0   :  { %v3650_v29 = vmul.f32 1.4142135, %v3594_v23  ;;  %v3595_v11 = vsel %vm3483_vm10, %v3245_v5, %v3539_v31  ;;  %vm3497_vm12 = vcmp.ge.f32.partialorder %v3249_v8, 0.0  ;;  %v3553_v25 = vmul.f32 0.2, %v3249_v8 }
 0x3b1   :  { %v3651_v16 = vmul.f32 1.4142135, %v3595_v11  ;;  %v3608_v19 = vsel %vm3496_vm11, %v3247_v6, %v3552_v7  ;;  %v7287_v2 = vld [vmem:[#allocation8 + $0x590] ss:$8 sps:$4 sm:$0xff]   ;;  %v7292_v5 = vld [vmem:[#allocation8 + $0x5a4] ss:$8 sps:$4 sm:$0xff]  }
 0x3b2   :  { %v3664_v20 = vmul.f32 1.4142135, %v3608_v19  ;;  %v3609_v21 = vsel %vm3497_vm12, %v3249_v8, %v3553_v25  ;;  %v5988_v45 = vclamps-f32 %v3650_v29, 256.0  ;;  %v7290_v31 = vld [vmem:[#allocation8 + $0x5a0] ss:$8 sps:$4 sm:$0xff]  }
 0x3b3   :  { %v3665_v28 = vmul.f32 1.4142135, %v3609_v21  ;;  %v5989_v13 = vclamps-f32 %v3651_v16, 256.0  ;;  %v7295_v6 = vld [vmem:[#allocation8 + $0x5b4] ss:$8 sps:$4 sm:$0xff]  }
 0x3b4   :  { %v6002_v22 = vclamps-f32 %v3664_v20, 256.0  ;;  %v3253_v24 = vpop.f32.mrb[56].mxu1  ;;  %v7293_v23 = vld [vmem:[#allocation8 + $0x5b0] ss:$8 sps:$4 sm:$0xff]   ;;  %v7298_v7 = vld [vmem:[#allocation8 + $0x5c4] ss:$8 sps:$4 sm:$0xff]  }
 0x3b5   :  { %v6003_v33 = vclamps-f32 %v3665_v28, 256.0  ;;  %vm3510_vm13 = vcmp.ge.f32.partialorder %v3253_v24, 0.0  ;;  %v3566_v49 = vmul.f32 0.2, %v3253_v24  ;;  %v3255_v26 = vpop.f32.mrb[57].mxu1 }
 0x3b6   :  { %v3818_v27 = vpack.c.bf16 %v6002_v22, %v5988_v45  ;;  %vm3511_vm14 = vcmp.ge.f32.partialorder %v3255_v26, 0.0  ;;  %v3567_v34 = vmul.f32 0.2, %v3255_v26  ;;  %v3257_v30 = vpop.f32.mrb[58].mxu1  ;;  %v7296_v8 = vld [vmem:[#allocation8 + $0x5c0] ss:$8 sps:$4 sm:$0xff]  }
 0x3b7   :  { %v3622_v35 = vsel %vm3510_vm13, %v3253_v24, %v3566_v49  ;;  %vm3524_vm15 = vcmp.ge.f32.partialorder %v3257_v30, 0.0  ;;  %v3580_v14 = vmul.f32 0.2, %v3257_v30  ;;  %v3259_v36 = vpop.f32.mrb[59].mxu1  ;;  %v3819_v38 = vpack.c.bf16 %v6003_v33, %v5989_v13  ;;  %v7301_v29 = vld [vmem:[#allocation8 + $0x5d4] ss:$8 sps:$4 sm:$0xff]  }
 0x3b8   :  { %v3678_v58 = vmul.f32 1.4142135, %v3622_v35  ;;  %v3623_v40 = vsel %vm3511_vm14, %v3255_v26, %v3567_v34  ;;  %vm3525_vm0 = vcmp.ge.f32.partialorder %v3259_v36, 0.0  ;;  %v3581_v41 = vmul.f32 0.2, %v3259_v36 }
 0x3b9   :  { %v3679_v9 = vmul.f32 1.4142135, %v3623_v40  ;;  %v3636_v42 = vsel %vm3524_vm15, %v3257_v30, %v3580_v14  ;;  %5426 = vmatprep.mubr.bf16.mxu0 %v3819_v38  ;;  %v7299_v11 = vld [vmem:[#allocation8 + $0x5d0] ss:$8 sps:$4 sm:$0xff]   ;;  %v7304_v25 = vld [vmem:[#allocation8 + $0x5e4] ss:$8 sps:$4 sm:$0xff]  }
 0x3ba   :  { %v3692_v43 = vmul.f32 1.4142135, %v3636_v42  ;;  %v3637_v44 = vsel %vm3525_vm0, %v3259_v36, %v3581_v41  ;;  %5427 = vmatmul.mubr.bf16.vlgmr.msra.gmra.mrb[32].mxu0 %v3818_v27  ;;  %v6016_v48 = vclamps-f32 %v3678_v58, 256.0  ;;  %v7302_v16 = vld [vmem:[#allocation8 + $0x5e0] ss:$8 sps:$4 sm:$0xff]  }
 0x3bb   :  { %v3693_v46 = vmul.f32 1.4142135, %v3637_v44  ;;  %5448 = vmatpush1.bf16.msra.mxu0 %v7260_v53  ;;  %v6017_v10 = vclamps-f32 %v3679_v9, 256.0  ;;  %v7307_v19 = vld [vmem:[#allocation8 + $0x5f4] ss:$8 sps:$4 sm:$0xff]  }
 0x3bc   :  { %v6030_v50 = vclamps-f32 %v3692_v43, 256.0  ;;  %5449 = vmatprep.subr.bf16.mxu0 %v7265_v0  ;;  %v7305_v20 = vld [vmem:[#allocation8 + $0x5f0] ss:$8 sps:$4 sm:$0xff]   ;;  %v7310_v21 = vld [vmem:[#allocation8 + $0x604] ss:$8 sps:$4 sm:$0xff]  }
 0x3bd   :  { %v6031_v52 = vclamps-f32 %v3693_v46, 256.0  ;;  %v7308_v28 = vld [vmem:[#allocation8 + $0x600] ss:$8 sps:$4 sm:$0xff]   ;;  %v7313_v45 = vld [vmem:[#allocation8 + $0x614] ss:$8 sps:$4 sm:$0xff]  }
 0x3be   :  { %v3832_v54 = vpack.c.bf16 %v6030_v50, %v6016_v48  ;;  %v7311_v22 = vld [vmem:[#allocation8 + $0x610] ss:$8 sps:$4 sm:$0xff]   ;;  %v7316_v24 = vld [vmem:[#allocation8 + $0x624] ss:$8 sps:$4 sm:$0xff]   ;;  %v7314_v13 = vld [vmem:[#allocation8 + $0x620] ss:$8 sps:$4 sm:$0xff]  }
 0x3bf   :  { %5450 = vmatpush1.bf16.msra.mxu0 %v7263_v47  ;;  %v3833_v12 = vpack.c.bf16 %v6031_v52, %v6017_v10  ;;  %v7319_v33 = vld [vmem:[#allocation8 + $0x634] ss:$8 sps:$4 sm:$0xff]   ;;  %v7317_v49 = vld [vmem:[#allocation8 + $0x630] ss:$8 sps:$4 sm:$0xff]   ;;  %v7322_v26 = vld [vmem:[#allocation8 + $0x644] ss:$8 sps:$4 sm:$0xff]  }
 0x3c0   :  { %5451 = vmatprep.subr.bf16.mxu0 %v7268_v51  ;;  %v7320_v27 = vld [vmem:[#allocation8 + $0x640] ss:$8 sps:$4 sm:$0xff]   ;;  %v7328_v30 = vld [vmem:[#allocation8 + $0x664] ss:$8 sps:$4 sm:$0xff]   ;;  %v7331_v40 = vld [vmem:[#allocation8 + $0x674] ss:$8 sps:$4 sm:$0xff]  }
 0x3c1   :  { %5436 = vmatprep.mubr.bf16.mxu0 %v3833_v12  ;;  %v7329_v50 = vld [vmem:[#allocation8 + $0x670] ss:$8 sps:$4 sm:$0xff]  }
 0x3c2   :  { %5437 = vmatmul.mubr.bf16.gmra.mrb[36].mxu0 %v3832_v54  ;;  %v7334_v54 = vld [vmem:[#allocation8 + $0x684] ss:$8 sps:$4 sm:$0xff]  }
 0x3c3   :  { %5452 = vmatpush1.bf16.msra.mxu0 %v7266_v15  ;;  %5479 = vmatprep.mubr.bf16.mxu0 %v7728_v4  ;;  %v7284_v4 = vld [vmem:[#allocation8 + $0x580] ss:$8 sps:$4 sm:$0xff]  }
 0x3c4   :  { %5453 = vmatprep.subr.bf16.mxu0 %v7271_v55 }
 0x3c7   :  { %5454 = vmatpush1.bf16.msra.mxu0 %v7269_v56 }
 0x3c8   :  { %5455 = vmatprep.subr.bf16.mxu0 %v7274_v57 }
 0x3cb   :  { %5456 = vmatpush1.bf16.msra.mxu0 %v7272_v62 }
 0x3cc   :  { %5457 = vmatprep.subr.bf16.mxu0 %v7277_v32 }
 0x3cf   :  { %5458 = vmatpush1.bf16.msra.mxu0 %v7275_v59  ;;  %v7332_v59 = vld [vmem:[#allocation8 + $0x680] ss:$8 sps:$4 sm:$0xff]  }
 0x3d0   :  { %5459 = vmatprep.subr.bf16.mxu0 %v7280_v60 }
 0x3d3   :  { %5460 = vmatpush1.bf16.msra.mxu0 %v7278_v17 }
 0x3d4   :  { %5461 = vmatprep.subr.bf16.mxu0 %v7283_v61 }
 0x3d7   :  { %5462 = vmatpush1.bf16.msra.mxu0 %v7281_v63 }
 0x3d8   :  { %5463 = vmatprep.subr.bf16.mxu0 %v7286_v1  ;;  %v7337_v1 = vld [vmem:[#allocation8 + $0x694] ss:$8 sps:$4 sm:$0xff]  }
 0x3db   :  { %5464 = vmatpush1.bf16.msra.mxu0 %v7284_v4 }
 0x3dc   :  { %5465 = vmatprep.subr.bf16.mxu0 %v7289_v18 }
 0x3df   :  { %5466 = vmatpush1.bf16.msra.mxu0 %v7287_v2 }
 0x3e0   :  { %5467 = vmatprep.subr.bf16.mxu0 %v7292_v5 }
 0x3e3   :  { %5468 = vmatpush1.bf16.msra.mxu0 %v7290_v31 }
 0x3e4   :  { %5469 = vmatprep.subr.bf16.mxu0 %v7295_v6 }
 0x3e7   :  { %5470 = vmatpush1.bf16.msra.mxu0 %v7293_v23 }
 0x3e8   :  { %5471 = vmatprep.subr.bf16.mxu0 %v7298_v7 }
 0x3eb   :  { %5472 = vmatpush1.bf16.msra.mxu0 %v7296_v8  ;;  %v7335_v8 = vld [vmem:[#allocation8 + $0x690] ss:$8 sps:$4 sm:$0xff]  }
 0x3ec   :  { %5473 = vmatprep.subr.bf16.mxu0 %v7301_v29 }
 0x3ef   :  { %5474 = vmatpush1.bf16.msra.mxu0 %v7299_v11 }
 0x3f0   :  { %5475 = vmatprep.subr.bf16.mxu0 %v7304_v25  ;;  %v7340_v25 = vld [vmem:[#allocation8 + $0x6a4] ss:$8 sps:$4 sm:$0xff]  }
 0x3f3   :  { %5476 = vmatpush1.bf16.msra.mxu0 %v7302_v16 }
 0x3f4   :  { %5477 = vmatprep.subr.bf16.mxu0 %v7307_v19 }
 0x3f7   :  { %5478 = vmatpush1.bf16.msra.mxu0 %v7305_v20 }
 0x3f8   :  { %5500 = vmatprep.subr.bf16.mxu0 %v7310_v21  ;;  %v7338_v21 = vld [vmem:[#allocation8 + $0x6a0] ss:$8 sps:$4 sm:$0xff]  }
 0x3fa   :  { %5480 = vmatmul.mubr.bf16.vlgmr.msra.gmra.mrb[32].mxu0 %v7726_v3  ;;  %v7325_v3 = vld [vmem:[#allocation8 + $0x654] ss:$8 sps:$4 sm:$0xff]  }
 0x3fb   :  { %5489 = vmatprep.mubr.bf16.mxu0 %v7732_v39  ;;  %5501 = vmatpush1.bf16.msra.mxu0 %v7308_v28  ;;  %v7323_v39 = vld [vmem:[#allocation8 + $0x650] ss:$8 sps:$4 sm:$0xff]  }
 0x3fc   :  { %5502 = vmatprep.subr.bf16.mxu0 %v7313_v45  ;;  %v7343_v45 = vld [vmem:[#allocation8 + $0x6b4] ss:$8 sps:$4 sm:$0xff]  }
 0x3ff   :  { %5503 = vmatpush1.bf16.msra.mxu0 %v7311_v22  ;;  %v7341_v22 = vld [vmem:[#allocation8 + $0x6b0] ss:$8 sps:$4 sm:$0xff]  }
 0x400   :  { %5504 = vmatprep.subr.bf16.mxu0 %v7316_v24  ;;  %v7346_v24 = vld [vmem:[#allocation8 + $0x6c4] ss:$8 sps:$4 sm:$0xff]  }
 0x402   :  { %5490 = vmatmul.mubr.bf16.gmra.mrb[36].mxu0 %v7730_v37  ;;  %v7326_v37 = vld [vmem:[#allocation8 + $0x660] ss:$8 sps:$4 sm:$0xff]  }
 0x403   :  { %5505 = vmatpush1.bf16.msra.mxu0 %v7314_v13  ;;  %v7344_v13 = vld [vmem:[#allocation8 + $0x6c0] ss:$8 sps:$4 sm:$0xff]  }
 0x404   :  { %5506 = vmatprep.subr.bf16.mxu0 %v7319_v33  ;;  %v7349_v33 = vld [vmem:[#allocation8 + $0x6d4] ss:$8 sps:$4 sm:$0xff]  }
 0x407   :  { %5507 = vmatpush1.bf16.msra.mxu0 %v7317_v49  ;;  %v7347_v49 = vld [vmem:[#allocation8 + $0x6d0] ss:$8 sps:$4 sm:$0xff]  }
 0x408   :  { %5508 = vmatprep.subr.bf16.mxu0 %v7322_v26  ;;  %v7352_v26 = vld [vmem:[#allocation8 + $0x6e4] ss:$8 sps:$4 sm:$0xff]  }
 0x40b   :  { %5509 = vmatpush1.bf16.msra.mxu0 %v7320_v27  ;;  %v7350_v27 = vld [vmem:[#allocation8 + $0x6e0] ss:$8 sps:$4 sm:$0xff]  }
 0x40c   :  { %v3455_v34 = vpop.f32.mrb[60].mxu1  ;;  %5510 = vmatprep.subr.bf16.mxu0 %v7325_v3  ;;  %v7355_v3 = vld [vmem:[#allocation8 + $0x6f4] ss:$8 sps:$4 sm:$0xff]  }
 0x40d   :  { %vm3486_vm1 = vcmp.ge.f32.partialorder %v3455_v34, 0.0  ;;  %v3542_v53 = vmul.f32 0.2, %v3455_v34  ;;  %v3457_v35 = vpop.f32.mrb[61].mxu1 }
 0x40e   :  { %vm3487_vm2 = vcmp.ge.f32.partialorder %v3457_v35, 0.0  ;;  %v3543_v14 = vmul.f32 0.2, %v3457_v35  ;;  %v3459_v36 = vpop.f32.mrb[62].mxu1 }
 0x40f   :  { %v3598_v38 = vsel %vm3486_vm1, %v3455_v34, %v3542_v53  ;;  %vm3500_vm3 = vcmp.ge.f32.partialorder %v3459_v36, 0.0  ;;  %v3556_v0 = vmul.f32 0.2, %v3459_v36  ;;  %5511 = vmatpush1.bf16.msra.mxu0 %v7323_v39  ;;  %v3461_v58 = vpop.f32.mrb[63].mxu1  ;;  %v7353_v39 = vld [vmem:[#allocation8 + $0x6f0] ss:$8 sps:$4 sm:$0xff]  }
 0x410   :  { %v3654_v41 = vmul.f32 1.4142135, %v3598_v38  ;;  %v3599_v9 = vsel %vm3487_vm2, %v3457_v35, %v3543_v14  ;;  %vm3501_vm4 = vcmp.ge.f32.partialorder %v3461_v58, 0.0  ;;  %v3557_v42 = vmul.f32 0.2, %v3461_v58  ;;  %5512 = vmatprep.subr.bf16.mxu0 %v7328_v30 }
 0x411   :  { %v3655_v43 = vmul.f32 1.4142135, %v3599_v9  ;;  %v3612_v44 = vsel %vm3500_vm3, %v3459_v36, %v3556_v0 }
 0x412   :  { %v3668_v46 = vmul.f32 1.4142135, %v3612_v44  ;;  %v3613_v47 = vsel %vm3501_vm4, %v3461_v58, %v3557_v42  ;;  %v5992_v51 = vclamps-f32 %v3654_v41, 256.0 }
 0x413   :  { %v3669_v48 = vmul.f32 1.4142135, %v3613_v47  ;;  %5513 = vmatpush1.bf16.msra.mxu0 %v7326_v37  ;;  %v5993_v12 = vclamps-f32 %v3655_v43, 256.0 }
 0x414   :  { %v6006_v10 = vclamps-f32 %v3668_v46, 256.0  ;;  %v3465_v52 = vpop.f32.mrb[64].mxu1  ;;  %5514 = vmatprep.subr.bf16.mxu0 %v7331_v40 }
 0x415   :  { %v6007_v15 = vclamps-f32 %v3669_v48, 256.0  ;;  %vm3514_vm5 = vcmp.ge.f32.partialorder %v3465_v52, 0.0  ;;  %v3570_v55 = vmul.f32 0.2, %v3465_v52  ;;  %v3467_v56 = vpop.f32.mrb[65].mxu1 }
 0x416   :  { %v3822_v57 = vpack.c.bf16 %v6006_v10, %v5992_v51  ;;  %vm3515_vm6 = vcmp.ge.f32.partialorder %v3467_v56, 0.0  ;;  %v3571_v62 = vmul.f32 0.2, %v3467_v56  ;;  %v3469_v32 = vpop.f32.mrb[66].mxu1 }
 0x417   :  { %v3626_v60 = vsel %vm3514_vm5, %v3465_v52, %v3570_v55  ;;  %vm3528_vm7 = vcmp.ge.f32.partialorder %v3469_v32, 0.0  ;;  %v3584_v17 = vmul.f32 0.2, %v3469_v32  ;;  %5515 = vmatpush1.bf16.msra.mxu0 %v7329_v50  ;;  %v3471_v61 = vpop.f32.mrb[67].mxu1  ;;  %v3823_v63 = vpack.c.bf16 %v6007_v15, %v5993_v12 }
 0x418   :  { %v3682_v4 = vmul.f32 1.4142135, %v3626_v60  ;;  %v3627_v18 = vsel %vm3515_vm6, %v3467_v56, %v3571_v62  ;;  %vm3529_vm8 = vcmp.ge.f32.partialorder %v3471_v61, 0.0  ;;  %v3585_v2 = vmul.f32 0.2, %v3471_v61  ;;  %5516 = vmatprep.subr.bf16.mxu0 %v7334_v54 }
 0x419   :  { %v3683_v5 = vmul.f32 1.4142135, %v3627_v18  ;;  %v3640_v31 = vsel %vm3528_vm7, %v3469_v32, %v3584_v17  ;;  %5532 = vmatprep.mubr.bf16.mxu0 %v3823_v63 }
 0x41a   :  { %v3696_v6 = vmul.f32 1.4142135, %v3640_v31  ;;  %v3641_v23 = vsel %vm3529_vm8, %v3471_v61, %v3585_v2  ;;  %v6020_v29 = vclamps-f32 %v3682_v4, 256.0 }
 0x41b   :  { %v3697_v7 = vmul.f32 1.4142135, %v3641_v23  ;;  %5517 = vmatpush1.bf16.msra.mxu0 %v7332_v59  ;;  %v6021_v16 = vclamps-f32 %v3683_v5, 256.0 }
 0x41c   :  { %v6034_v11 = vclamps-f32 %v3696_v6, 256.0  ;;  %5518 = vmatprep.subr.bf16.mxu0 %v7337_v1 }
 0x41d   :  { %v6035_v19 = vclamps-f32 %v3697_v7, 256.0 }
 0x41e   :  { %v3836_v20 = vpack.c.bf16 %v6034_v11, %v6020_v29 }
 0x41f   :  { %5519 = vmatpush1.bf16.msra.mxu0 %v7335_v8  ;;  %v3837_v28 = vpack.c.bf16 %v6035_v19, %v6021_v16 }
 0x420   :  { %5520 = vmatprep.subr.bf16.mxu0 %v7340_v25 }
 0x423   :  { %5521 = vmatpush1.bf16.msra.mxu0 %v7338_v21 }
 0x424   :  { %5522 = vmatprep.subr.bf16.mxu0 %v7343_v45 }
 0x427   :  { %5523 = vmatpush1.bf16.msra.mxu0 %v7341_v22 }
 0x428   :  { %5524 = vmatprep.subr.bf16.mxu0 %v7346_v24 }
 0x42b   :  { %5525 = vmatpush1.bf16.msra.mxu0 %v7344_v13 }
 0x42c   :  { %5526 = vmatprep.subr.bf16.mxu0 %v7349_v33 }
 0x42f   :  { %5527 = vmatpush1.bf16.msra.mxu0 %v7347_v49 }
 0x430   :  { %5528 = vmatprep.subr.bf16.mxu0 %v7352_v26 }
 0x433   :  { %5529 = vmatpush1.bf16.msra.mxu0 %v7350_v27 }
 0x434   :  { %5530 = vmatprep.subr.bf16.mxu0 %v7355_v3 }
 0x437   :  { %5531 = vmatpush1.bf16.msra.mxu0 %v7353_v39 }
 0x43a   :  { %5533 = vmatmul.mubr.bf16.vlgmr.msra.gmra.mrb[32].mxu0 %v3822_v57 }
 0x43b   :  { %5542 = vmatprep.mubr.bf16.mxu0 %v3837_v28 }
 0x442   :  { %5543 = vmatmul.mubr.bf16.gmra.mrb[36].mxu0 %v3836_v20 }
 0x50d   :  { %v5534_v34 = vpop.f32.mrb[32].mxu0 }
 0x50e   :  { %5553 = vst [vmem:[#allocation10] sm:$0xff] %v5534_v34  ;;  %v5536_v30 = vpop.f32.mrb[33].mxu0 }
 0x50f   :  { %5554 = vst [vmem:[#allocation10 + $0x8] sm:$0xff] %v5536_v30  ;;  %v5538_v53 = vpop.f32.mrb[34].mxu0 }
 0x510   :  { %5555 = vst [vmem:[#allocation10 + $0x10] sm:$0xff] %v5538_v53  ;;  %v5540_v35 = vpop.f32.mrb[35].mxu0 }
 0x511   :  { %5556 = vst [vmem:[#allocation10 + $0x18] sm:$0xff] %v5540_v35 }
 0x515   :  { %v5544_v14 = vpop.f32.mrb[36].mxu0 }
 0x516   :  { %5557 = vst [vmem:[#allocation10 + $0x20] sm:$0xff] %v5544_v14  ;;  %v5546_v36 = vpop.f32.mrb[37].mxu0 }
 0x517   :  { %5558 = vst [vmem:[#allocation10 + $0x28] sm:$0xff] %v5546_v36  ;;  %v5548_v37 = vpop.f32.mrb[38].mxu0 }
 0x518   :  { %5559 = vst [vmem:[#allocation10 + $0x30] sm:$0xff] %v5548_v37  ;;  %v5550_v38 = vpop.f32.mrb[39].mxu0 }
 0x519   :  { %5560 = vst [vmem:[#allocation10 + $0x38] sm:$0xff] %v5550_v38 }
 0x51a   :  { %7455 = shalt.err (!%p7452_p8)
}
 0x51b   :  { %s7456_s21 = scalar_lea.hbm %s7770_s5, 1024 }
 0x51c   :  { %p7457_p9 = scmp.ne.s32.totalorder %s7770_s5, %s7456_s21  ;;  %p7460_p10 = scmp.lt.u32.totalorder %s7456_s21, %s7770_s5 }
 0x51e   :  { %p7462_p11 = pnand %p7460_p10, %p7457_p9 }
 0x520   :  { %7465 = shalt.err (!%p7462_p11)
}
 0x521   :  { %s7486_s8 = smov 256   ;;  %s7487_s9 = smov 16  }
 0x522   :  { %5572 = dma.vmem_to_hbm [thread:$0]  %s5567_s26, 1024, %s7770_s5, [#allocation4], %s7486_s8, %s7486_s8, %s7487_s9  }
 0x523   :  { %7472 = dma.done.wait [#allocation4], 1024  }
 0x524   :  { %7473 = vsyncadd [#allocation4], 4294966272 }
 0x525   :  { %5576 = vsyncpa [#allocation3], 1 }
 0x526   :  { %5577 = vsyncpa [#allocation6], 1 }
 0x527   :  { %5578 = vsyncpa [#allocation9], 1 }
 0x528   :  { %5579 = vsyncpa [#allocation4], 1 }

</bundles_post_ra>
